<compile_context>
chip_gen: v5e
topology: v5e:2x2
jax: 0.10.0
libtpu: 0.0.40
codegen_flags: <defaults>
</compile_context>

<pallas_src>
import functools

import numpy as np
import jax
import jax.numpy as jnp
from jax.experimental import pallas as pl
from jax.experimental.pallas import tpu as pltpu

NFILTER = 8          # params.filter (small for demo)
Z_DIM = 16           # params.z_dim
LRELU_SLOPE = 0.2
GN_EPS = 1e-5        # torch GroupNorm default eps

# Per-conv-layer static config:
# (param, Hin, Win, Cin, Hout, Wout, Cout_total, co_off, stride, pad, transposed)
_LAYERS = (
    ("e_conv1_1", 32, 32, 3,           16, 16, NFILTER,     0, 2, 1, False),
    ("e_conv2",   16, 16, NFILTER,      8,  8, NFILTER * 2, 0, 2, 1, False),
    ("e_conv3",    8,  8, NFILTER * 2,  4,  4, NFILTER * 4, 0, 2, 1, False),
    ("e_conv4",    4,  4, NFILTER * 4,  1,  1, Z_DIM,       0, 1, 0, False),
    ("d_conv1",    1,  1, Z_DIM,        4,  4, NFILTER * 4, 0, 1, 0, True),
    ("d_conv2",    4,  4, NFILTER * 4,  8,  8, NFILTER * 2, 0, 2, 1, True),
    ("d_conv3",    8,  8, NFILTER * 2, 16, 16, NFILTER,     0, 2, 1, True),
    ("d_conv4",   16, 16, NFILTER,     32, 32, 3,           0, 2, 1, True),
)


# ---------------------------------------------------------------------------
# Host-side lowering: weights -> (Mwide, Gcat) matrices; GN -> (P, gamma/beta).
# Activation layout: rows = (image b, spatial h) b-major, lanes = w*C + c.
# ---------------------------------------------------------------------------
def _build_m(w, Win, Cin, Wout, Cout_total, co_off, stride, pad, transposed):
    """Width im2col + channel contraction for all 4 kh taps -> [128, 512] (bf16)."""
    w = np.asarray(w, np.float32)
    k = w.shape[2]
    Cout = w.shape[1] if transposed else w.shape[0]
    M = np.zeros((k, 128, 128), np.float32)
    for kh in range(k):
        for iw in range(Win):
            for ci in range(Cin):
                q = iw * Cin + ci
                for ow in range(Wout):
                    kw = (ow + pad - stride * iw) if transposed \
                        else (iw - stride * ow + pad)
                    if 0 <= kw < k:
                        for co in range(Cout):
                            val = w[ci, co, kh, kw] if transposed else w[co, ci, kh, kw]
                            M[kh, q, ow * Cout_total + co_off + co] = val
    # columns ordered kh-major: [128, k*128]
    return M.transpose(1, 0, 2).reshape(128, k * 128)


def _build_g(bt, Hin, Hout, k, stride, pad, transposed):
    """Block-diag (per image) 0/1 height-selection: [bt*Hout, k*bt*Hin] (f32)."""
    G = np.zeros((bt * Hout, k * bt * Hin), np.float32)
    for b in range(bt):
        for kh in range(k):
            if transposed:
                for ih in range(Hin):
                    oh = stride * ih + kh - pad
                    if 0 <= oh < Hout:
                        G[b * Hout + oh, kh * bt * Hin + b * Hin + ih] = 1.0
            else:
                for oh in range(Hout):
                    ih = stride * oh + kh - pad
                    if 0 <= ih < Hin:
                        G[b * Hout + oh, kh * bt * Hin + b * Hin + ih] = 1.0
    return G


def _build_p(bt, H, n_spatial):
    """Per-image row mean + broadcast matrix, block-diag over (half, image)."""
    R = bt * H
    P = np.zeros((2 * R, 2 * R), np.float32)
    blk = np.full((H, H), 1.0 / float(n_spatial), np.float32)
    for half in range(2):
        for b in range(bt):
            o = half * R + b * H
            P[o:o + H, o:o + H] = blk
    return P


def _build_gb(W, C_total, channels, gamma, beta):
    """Per-lane gamma/beta ([2,128]); lanes of non-normalized channels -> 0."""
    gamma = np.asarray(gamma, np.float32)
    beta = np.asarray(beta, np.float32)
    gb = np.zeros((2, 128), np.float32)
    for i, c in enumerate(channels):
        for w in range(W):
            q = w * C_total + c
            gb[0, q] = gamma[i]
            gb[1, q] = beta[i]
    return gb


def _build_label_lut(w2, nf):
    """lut[cls] = lrelu(conv1_2(one-hot label map of class cls)) in the
    activation layout (rows = oh, lanes = ow*nf + nf//2 + co)."""
    w2 = np.asarray(w2, np.float32)                     # [nf//2, 10, 4, 4]
    Cout = w2.shape[0]
    lut = np.zeros((10, 16, 128), np.float32)
    for cls in range(10):
        for oh in range(16):
            for ow in range(16):
                acc = np.zeros((Cout,), np.float32)
                for kh in range(4):
                    ih = 2 * oh + kh - 1
                    if not (0 <= ih < 32):
                        continue
                    for kw in range(4):
                        iw = 2 * ow + kw - 1
                        if not (0 <= iw < 32):
                            continue
                        acc += w2[:, cls, kh, kw]
                acc = np.where(acc >= 0.0, acc, LRELU_SLOPE * acc)
                for co in range(Cout):
                    lut[cls, oh, ow * nf + nf // 2 + co] = acc[co]
    return lut


def prepare_constants(params, bt):
    p = {k: np.asarray(v, np.float32) for k, v in params.items()}
    nf = NFILTER

    Ms, Gs = [], []
    for (name, Hin, _Win, Cin, Hout, Wout, CoT, co_off, s, pad, tr) in _LAYERS:
        Ms.append(_build_m(p[name], _Win, Cin, Wout, CoT, co_off, s, pad, tr))
        Gs.append(_build_g(bt, Hin, Hout, 4, s, pad, tr))

    gb = np.stack([
        _build_gb(16, nf,     range(nf // 2), p["e_norm1_g"], p["e_norm1_b"]),
        _build_gb(8,  nf * 2, range(nf * 2),  p["e_norm2_g"], p["e_norm2_b"]),
        _build_gb(4,  nf * 4, range(nf * 4),  p["e_norm3_g"], p["e_norm3_b"]),
        _build_gb(4,  nf * 4, range(nf * 4),  p["d_norm1_g"], p["d_norm1_b"]),
        _build_gb(8,  nf * 2, range(nf * 2),  p["d_norm2_g"], p["d_norm2_b"]),
        _build_gb(16, nf,     range(nf),      p["d_norm3_g"], p["d_norm3_b"]),
    ], axis=0)                                           # [6, 2, 128]

    return {
        "m": jnp.asarray(np.stack(Ms, axis=0), jnp.bfloat16),   # [8, 128, 512]
        "g": [jnp.asarray(G, jnp.float32) for G in Gs],
        "p16": jnp.asarray(_build_p(bt, 16, 256), jnp.float32),
        "p8": jnp.asarray(_build_p(bt, 8, 64), jnp.float32),
        "p4": jnp.asarray(_build_p(bt, 4, 16), jnp.float32),
        "gb": jnp.asarray(gb, jnp.float32),
        "lut": jnp.asarray(_build_label_lut(p["e_conv1_2"], nf), jnp.float32),
    }


# ---------------------------------------------------------------------------
# The fused kernel: whole AE forward for BT images per grid step.
# ---------------------------------------------------------------------------
def _ae_kernel(x_ref, lut_ref, m_ref,
               g1, g2, g3, g4, g5, g6, g7, g8,
               p16_ref, p8_ref, p4_ref, gb_ref,
               recon_ref, z_ref):

    def conv(x, idx, g_ref):
        # one bf16 matmul does all 4 kh taps (K=128 -> N=512) ...
        y = jnp.dot(x.astype(jnp.bfloat16), m_ref[idx],
                    preferred_element_type=jnp.float32)           # [R, 512]
        # ... then one f32 0/1 matmul does height selection / stride / padding.
        ys = jnp.concatenate(
            [y[:, 0:128], y[:, 128:256], y[:, 256:384], y[:, 384:512]], axis=0)
        return jnp.dot(g_ref[...], ys, preferred_element_type=jnp.float32)

    def gn_lrelu(x, p_ref, idx, csize):
        # per-channel lane sums via XLU lane rolls (stats stay in f32)
        xs = jnp.concatenate([x, x * x], axis=0)                  # [2R, 128]
        shift = csize
        while shift < 128:
            xs = xs + pltpu.roll(xs, shift, axis=1)
            shift *= 2
        # per-image row mean (+ broadcast back) in one small f32 matmul
        s = jnp.dot(p_ref[...], xs, preferred_element_type=jnp.float32)
        r = x.shape[0]
        mean = s[:r]
        var = s[r:] - mean * mean
        g = gb_ref[idx, 0:1, :]
        b = gb_ref[idx, 1:2, :]
        y = (x - mean) * (jax.lax.rsqrt(var + GN_EPS) * g) + b
        return jnp.maximum(y, LRELU_SLOPE * y)

    # ---------------- encoder ----------------
    x0 = x_ref[...]                                               # [BT*32, 128]
    a1 = gn_lrelu(conv(x0, 0, g1), p16_ref, 0, 8) + lut_ref[...]  # [BT*16, 128]
    a2 = gn_lrelu(conv(a1, 1, g2), p8_ref, 1, 16)                 # [BT*8, 128]
    a3 = gn_lrelu(conv(a2, 2, g3), p4_ref, 2, 32)                 # [BT*4, 128]
    z = conv(a3, 3, g4)                                           # [BT, 128]
    z_ref[0] = z

    # ---------------- decoder ----------------
    d1 = gn_lrelu(conv(z, 4, g5), p4_ref, 3, 32)                  # [BT*4, 128]
    d2 = gn_lrelu(conv(d1, 5, g6), p8_ref, 4, 16)                 # [BT*8, 128]
    d3 = gn_lrelu(conv(d2, 6, g7), p16_ref, 5, 8)                 # [BT*16, 128]
    recon_ref[...] = jnp.tanh(conv(d3, 7, g8))                    # [BT*32, 128]


# ---------------------------------------------------------------------------
# JAX wrapper: one pallas_call for the entire AE forward.
# ---------------------------------------------------------------------------
def _const_spec(a):
    zeros = (0,) * a.ndim
    return pl.BlockSpec(a.shape, lambda i: zeros)


@functools.partial(jax.jit, static_argnums=(3,))
def ae_forward(x, label, consts, bt):
    B = x.shape[0]
    assert B % bt == 0 and bt % 2 == 0, (B, bt)
    nsteps = B // bt

    # NCHW image -> rows = (b, h) b-major, lanes = w*3 + c, zero padded to 128.
    ximg = jnp.transpose(x, (0, 2, 3, 1)).reshape(B, 32, 96)
    ximg = jnp.pad(ximg, ((0, 0), (0, 0), (0, 32))).reshape(B * 32, 128)
    # label branch is a host-precomputed LUT; tiny gather outside the kernel.
    lutsel = jnp.take(consts["lut"], label, axis=0).reshape(B * 16, 128)

    m, gs = consts["m"], consts["g"]
    p16, p8, p4, gb = consts["p16"], consts["p8"], consts["p4"], consts["gb"]

    in_specs = ([pl.BlockSpec((bt * 32, 128), lambda i: (i, 0)),
                 pl.BlockSpec((bt * 16, 128), lambda i: (i, 0)),
                 _const_spec(m)]
                + [_const_spec(g) for g in gs]
                + [_const_spec(p16), _const_spec(p8), _const_spec(p4),
                   _const_spec(gb)])
    out_specs = [pl.BlockSpec((bt * 32, 128), lambda i: (i, 0)),
                 pl.BlockSpec((1, bt, 128), lambda i: (i, 0, 0))]
    out_shape = [jax.ShapeDtypeStruct((B * 32, 128), jnp.float32),
                 jax.ShapeDtypeStruct((nsteps, bt, 128), jnp.float32)]

    # advisory cost estimate
    flops = 0
    for cfg in _LAYERS:
        hin, hout = cfg[1], cfg[4]
        flops += 2 * (bt * hin) * 128 * 512            # X @ Mwide
        flops += 2 * (bt * hout) * (4 * bt * hin) * 128  # Gcat @ Ystack
    for h in (16, 8, 4, 4, 8, 16):
        flops += 2 * (2 * bt * h) * (2 * bt * h) * 128   # GN P matmul
    flops *= nsteps
    bytes_accessed = int(ximg.size * 4 + lutsel.size * 4
                         + (B * 32 * 128 + B * 128) * 4
                         + m.size * 2 + sum(int(g.size) for g in gs) * 4
                         + (p16.size + p8.size + p4.size + gb.size) * 4)

    recon_p, z_p = pl.pallas_call(
        _ae_kernel,
        grid=(nsteps,),
        in_specs=in_specs,
        out_specs=out_specs,
        out_shape=out_shape,
        compiler_params=pltpu.CompilerParams(dimension_semantics=("parallel",)),
        cost_estimate=pl.CostEstimate(flops=int(flops),
                                      transcendentals=int(B * 32 * 128),
                                      bytes_accessed=bytes_accessed),
    )(ximg, lutsel, m, *gs, p16, p8, p4, gb)

    recon = recon_p.reshape(B, 32, 128)[:, :, :96]
    recon = recon.reshape(B, 32, 32, 3).transpose(0, 3, 1, 2)
    z = z_p.reshape(B, 128)[:, :Z_DIM].reshape(B, Z_DIM, 1, 1)
    return recon, z


# ---------------------------------------------------------------------------
# Parameters (deterministic init, shapes match the PyTorch module, bias=False)
# ---------------------------------------------------------------------------
def init_params(key, nf=NFILTER, z_dim=Z_DIM):
    def w(k_, shape):
        return 0.02 * jax.random.normal(k_, shape, jnp.float32)

    ks = jax.random.split(key, 9)
    p = {}
    p["e_conv1_1"] = w(ks[0], (nf // 2, 3, 4, 4))
    p["e_norm1_g"] = jnp.ones((nf // 2,), jnp.float32)
    p["e_norm1_b"] = jnp.zeros((nf // 2,), jnp.float32)
    p["e_conv1_2"] = w(ks[1], (nf // 2, 10, 4, 4))
    p["e_conv2"] = w(ks[2], (nf * 2, nf, 4, 4))
    p["e_norm2_g"] = jnp.ones((nf * 2,), jnp.float32)
    p["e_norm2_b"] = jnp.zeros((nf * 2,), jnp.float32)
    p["e_conv3"] = w(ks[3], (nf * 4, nf * 2, 4, 4))
    p["e_norm3_g"] = jnp.ones((nf * 4,), jnp.float32)
    p["e_norm3_b"] = jnp.zeros((nf * 4,), jnp.float32)
    p["e_conv4"] = w(ks[4], (z_dim, nf * 4, 4, 4))
    p["d_conv1"] = w(ks[5], (z_dim, nf * 4, 4, 4))      # ConvT: [Cin, Cout, k, k]
    p["d_norm1_g"] = jnp.ones((nf * 4,), jnp.float32)
    p["d_norm1_b"] = jnp.zeros((nf * 4,), jnp.float32)
    p["d_conv2"] = w(ks[6], (nf * 4, nf * 2, 4, 4))
    p["d_norm2_g"] = jnp.ones((nf * 2,), jnp.float32)
    p["d_norm2_b"] = jnp.zeros((nf * 2,), jnp.float32)
    p["d_conv3"] = w(ks[7], (nf * 2, nf, 4, 4))
    p["d_norm3_g"] = jnp.ones((nf,), jnp.float32)
    p["d_norm3_b"] = jnp.zeros((nf,), jnp.float32)
    p["d_conv4"] = w(ks[8], (nf, 3, 4, 4))
    return p


# ---------------------------------------------------------------------------
# Pure-JAX reference (mirrors the PyTorch module) for self-checking.
# ---------------------------------------------------------------------------
def _ref_conv(x, w, stride, pad):
    return jax.lax.conv_general_dilated(
        x, w, window_strides=(stride, stride), padding=[(pad, pad), (pad, pad)],
        dimension_numbers=("NCHW", "OIHW", "NCHW"))


def _ref_convt(x, wt, stride, pad):
    k = wt.shape[2]
    w_eq = jnp.flip(wt, (2, 3)).transpose(1, 0, 2, 3)
    return jax.lax.conv_general_dilated(
        x, w_eq, window_strides=(1, 1),
        padding=[(k - 1 - pad, k - 1 - pad)] * 2, lhs_dilation=(stride, stride),
        dimension_numbers=("NCHW", "OIHW", "NCHW"))


def _ref_gn(x, gamma, beta):
    mean = x.mean(axis=(2, 3), keepdims=True)
    var = ((x - mean) ** 2).mean(axis=(2, 3), keepdims=True)
    xn = (x - mean) / jnp.sqrt(var + GN_EPS)
    return xn * gamma[None, :, None, None] + beta[None, :, None, None]


def _ref_lrelu(x):
    return jnp.where(x >= 0, x, LRELU_SLOPE * x)


def reference_forward(params, x, label):
    B = x.shape[0]
    lab = jnp.broadcast_to(
        jax.nn.one_hot(label, 10, dtype=x.dtype)[:, :, None, None], (B, 10, 32, 32))
    h = _ref_lrelu(_ref_gn(_ref_conv(x, params["e_conv1_1"], 2, 1),
                           params["e_norm1_g"], params["e_norm1_b"]))
    y2 = _ref_lrelu(_ref_conv(lab, params["e_conv1_2"], 2, 1))
    h = jnp.concatenate([h, y2], axis=1)
    h = _ref_lrelu(_ref_gn(_ref_conv(h, params["e_conv2"], 2, 1),
                           params["e_norm2_g"], params["e_norm2_b"]))
    h = _ref_lrelu(_ref_gn(_ref_conv(h, params["e_conv3"], 2, 1),
                           params["e_norm3_g"], params["e_norm3_b"]))
    z = _ref_conv(h, params["e_conv4"], 1, 0)
    d = _ref_lrelu(_ref_gn(_ref_convt(z, params["d_conv1"], 1, 0),
                           params["d_norm1_g"], params["d_norm1_b"]))
    d = _ref_lrelu(_ref_gn(_ref_convt(d, params["d_conv2"], 2, 1),
                           params["d_norm2_g"], params["d_norm2_b"]))
    d = _ref_lrelu(_ref_gn(_ref_convt(d, params["d_conv3"], 2, 1),
                           params["d_norm3_g"], params["d_norm3_b"]))
    recon = jnp.tanh(_ref_convt(d, params["d_conv4"], 2, 1))
    return recon, z


if __name__ == "__main__":
    key = jax.random.PRNGKey(0)
    kp, kx, ky = jax.random.split(key, 3)
    params = init_params(kp)

    B, BT = 8, 4                     # 2 grid steps x 4 images (both v7x TCs busy)
    consts = prepare_constants(params, BT)

    x = jax.random.normal(kx, (B, 3, 32, 32), jnp.float32)
    y = jax.random.randint(ky, (B,), 0, 10, dtype=jnp.int32)

    recon, z = ae_forward(x, y, consts, BT)
    jax.block_until_ready((recon, z))

    assert recon.shape == (B, 3, 32, 32), recon.shape
    assert z.shape == (B, Z_DIM, 1, 1), z.shape
    assert bool(jnp.all(jnp.isfinite(recon))) and bool(jnp.all(jnp.isfinite(z)))

    # numerical self-check against a pure-JAX reference of the PyTorch module
    recon_want, z_want = reference_forward(params, x, y)
    z_want = z_want.reshape(B, Z_DIM, 1, 1)
    assert np.allclose(np.asarray(recon), np.asarray(recon_want),
                       atol=5e-2, rtol=1e-1), \
        float(np.max(np.abs(np.asarray(recon) - np.asarray(recon_want))))
    assert np.allclose(np.asarray(z), np.asarray(z_want), atol=5e-2, rtol=1e-1), \
        float(np.max(np.abs(np.asarray(z) - np.asarray(z_want))))

    print("KERNEL_OK")
</pallas_src>

<mosaic_0001>
module attributes {stable_mosaic.version = 11 : i64} {
  func.func @_ae_kernel(%arg0: i32, %arg1: memref<128x128xf32, #tpu.memory_space<vmem>>, %arg2: memref<64x128xf32, #tpu.memory_space<vmem>>, %arg3: memref<8x128x512xbf16, #tpu.memory_space<vmem>>, %arg4: memref<64x512xf32, #tpu.memory_space<vmem>>, %arg5: memref<32x256xf32, #tpu.memory_space<vmem>>, %arg6: memref<16x128xf32, #tpu.memory_space<vmem>>, %arg7: memref<4x64xf32, #tpu.memory_space<vmem>>, %arg8: memref<16x16xf32, #tpu.memory_space<vmem>>, %arg9: memref<32x64xf32, #tpu.memory_space<vmem>>, %arg10: memref<64x128xf32, #tpu.memory_space<vmem>>, %arg11: memref<128x256xf32, #tpu.memory_space<vmem>>, %arg12: memref<128x128xf32, #tpu.memory_space<vmem>>, %arg13: memref<64x64xf32, #tpu.memory_space<vmem>>, %arg14: memref<32x32xf32, #tpu.memory_space<vmem>>, %arg15: memref<6x2x128xf32, #tpu.memory_space<vmem>>, %arg16: memref<128x128xf32, #tpu.memory_space<vmem>>, %arg17: memref<1x4x128xf32, #tpu.memory_space<vmem>>) attributes {dimension_semantics = [#tpu.dimension_semantics<parallel>], iteration_bounds = array<i64: 2>, scalar_prefetch = 0 : i64, scratch_operands = 0 : i64, tpu.core_type = #tpu.core_type<tc>, window_params = [{transform_indices = @transform_0, window_bounds = array<i64: 128, 128>}, {transform_indices = @transform_1, window_bounds = array<i64: 64, 128>}, {pipeline_mode = #tpu.pipeline_mode<synchronous>, transform_indices = @transform_2, window_bounds = array<i64: 8, 128, 512>}, {pipeline_mode = #tpu.pipeline_mode<synchronous>, transform_indices = @transform_3, window_bounds = array<i64: 64, 512>}, {pipeline_mode = #tpu.pipeline_mode<synchronous>, transform_indices = @transform_4, window_bounds = array<i64: 32, 256>}, {pipeline_mode = #tpu.pipeline_mode<synchronous>, transform_indices = @transform_5, window_bounds = array<i64: 16, 128>}, {pipeline_mode = #tpu.pipeline_mode<synchronous>, transform_indices = @transform_6, window_bounds = array<i64: 4, 64>}, {pipeline_mode = #tpu.pipeline_mode<synchronous>, transform_indices = @transform_7, window_bounds = array<i64: 16, 16>}, {pipeline_mode = #tpu.pipeline_mode<synchronous>, transform_indices = @transform_8, window_bounds = array<i64: 32, 64>}, {pipeline_mode = #tpu.pipeline_mode<synchronous>, transform_indices = @transform_9, window_bounds = array<i64: 64, 128>}, {pipeline_mode = #tpu.pipeline_mode<synchronous>, transform_indices = @transform_10, window_bounds = array<i64: 128, 256>}, {pipeline_mode = #tpu.pipeline_mode<synchronous>, transform_indices = @transform_11, window_bounds = array<i64: 128, 128>}, {pipeline_mode = #tpu.pipeline_mode<synchronous>, transform_indices = @transform_12, window_bounds = array<i64: 64, 64>}, {pipeline_mode = #tpu.pipeline_mode<synchronous>, transform_indices = @transform_13, window_bounds = array<i64: 32, 32>}, {pipeline_mode = #tpu.pipeline_mode<synchronous>, transform_indices = @transform_14, window_bounds = array<i64: 6, 2, 128>}, {transform_indices = @transform_15, window_bounds = array<i64: 128, 128>}, {transform_indices = @transform_16, window_bounds = array<i64: 1, 4, 128>}]} {
    %c0 = arith.constant 0 : index
    %c0_0 = arith.constant 0 : index
    %0 = vector.load %arg1[%c0, %c0_0] : memref<128x128xf32, #tpu.memory_space<vmem>>, vector<128x128xf32>
    %1 = arith.truncf %0 : vector<128x128xf32> to vector<128x128xbf16>
    %c0_1 = arith.constant 0 : index
    %c0_2 = arith.constant 0 : index
    %c0_3 = arith.constant 0 : index
    %2 = vector.load %arg3[%c0_1, %c0_2, %c0_3] : memref<8x128x512xbf16, #tpu.memory_space<vmem>>, vector<1x128x512xbf16>
    %3 = vector.shape_cast %2 : vector<1x128x512xbf16> to vector<128x512xbf16>
    %cst = arith.constant dense<0.000000e+00> : vector<128x512xf32>
    %4 = tpu.matmul %1, %3, %cst {dimension_numbers = #tpu.dot_dimension_numbers<[1], [0], [0], [1], [0, 0, 1, 1], [], []>} : vector<128x128xbf16>, vector<128x512xbf16>, vector<128x512xf32> -> vector<128x512xf32>
    %5 = vector.extract_strided_slice %4 {offsets = [0, 0], sizes = [128, 128], strides = [1, 1]} : vector<128x512xf32> to vector<128x128xf32>
    %6 = vector.extract_strided_slice %4 {offsets = [0, 128], sizes = [128, 128], strides = [1, 1]} : vector<128x512xf32> to vector<128x128xf32>
    %7 = vector.extract_strided_slice %4 {offsets = [0, 256], sizes = [128, 128], strides = [1, 1]} : vector<128x512xf32> to vector<128x128xf32>
    %8 = vector.extract_strided_slice %4 {offsets = [0, 384], sizes = [128, 128], strides = [1, 1]} : vector<128x512xf32> to vector<128x128xf32>
    %9 = tpu.concatenate %5, %6, %7, %8 in 0 : vector<128x128xf32>, vector<128x128xf32>, vector<128x128xf32>, vector<128x128xf32> -> vector<512x128xf32>
    %c0_4 = arith.constant 0 : index
    %c0_5 = arith.constant 0 : index
    %10 = vector.load %arg4[%c0_4, %c0_5] : memref<64x512xf32, #tpu.memory_space<vmem>>, vector<64x512xf32>
    %cst_6 = arith.constant dense<0.000000e+00> : vector<64x128xf32>
    %11 = tpu.matmul %10, %9, %cst_6 {dimension_numbers = #tpu.dot_dimension_numbers<[1], [0], [0], [1], [0, 0, 1, 1], [], []>} : vector<64x512xf32>, vector<512x128xf32>, vector<64x128xf32> -> vector<64x128xf32>
    %12 = arith.mulf %11, %11 : vector<64x128xf32>
    %13 = tpu.concatenate %11, %12 in 0 : vector<64x128xf32>, vector<64x128xf32> -> vector<128x128xf32>
    %c8_i32 = arith.constant 8 : i32
    %14 = tpu.dynamic_rotate %13 by %c8_i32 dim 1 : vector<128x128xf32>, i32 -> vector<128x128xf32>
    %15 = arith.addf %13, %14 : vector<128x128xf32>
    %c16_i32 = arith.constant 16 : i32
    %16 = tpu.dynamic_rotate %15 by %c16_i32 dim 1 : vector<128x128xf32>, i32 -> vector<128x128xf32>
    %17 = arith.addf %15, %16 : vector<128x128xf32>
    %c32_i32 = arith.constant 32 : i32
    %18 = tpu.dynamic_rotate %17 by %c32_i32 dim 1 : vector<128x128xf32>, i32 -> vector<128x128xf32>
    %19 = arith.addf %17, %18 : vector<128x128xf32>
    %c64_i32 = arith.constant 64 : i32
    %20 = tpu.dynamic_rotate %19 by %c64_i32 dim 1 : vector<128x128xf32>, i32 -> vector<128x128xf32>
    %21 = arith.addf %19, %20 : vector<128x128xf32>
    %c0_7 = arith.constant 0 : index
    %c0_8 = arith.constant 0 : index
    %22 = vector.load %arg12[%c0_7, %c0_8] : memref<128x128xf32, #tpu.memory_space<vmem>>, vector<128x128xf32>
    %cst_9 = arith.constant dense<0.000000e+00> : vector<128x128xf32>
    %23 = tpu.matmul %22, %21, %cst_9 {dimension_numbers = #tpu.dot_dimension_numbers<[1], [0], [0], [1], [0, 0, 1, 1], [], []>} : vector<128x128xf32>, vector<128x128xf32>, vector<128x128xf32> -> vector<128x128xf32>
    %24 = vector.extract_strided_slice %23 {offsets = [0, 0], sizes = [64, 128], strides = [1, 1]} : vector<128x128xf32> to vector<64x128xf32>
    %25 = vector.extract_strided_slice %23 {offsets = [64, 0], sizes = [64, 128], strides = [1, 1]} : vector<128x128xf32> to vector<64x128xf32>
    %26 = arith.mulf %24, %24 : vector<64x128xf32>
    %27 = arith.subf %25, %26 : vector<64x128xf32>
    %c0_10 = arith.constant 0 : index
    %c0_11 = arith.constant 0 : index
    %c0_12 = arith.constant 0 : index
    %28 = vector.load %arg15[%c0_10, %c0_11, %c0_12] : memref<6x2x128xf32, #tpu.memory_space<vmem>>, vector<1x1x128xf32>
    %29 = vector.shape_cast %28 : vector<1x1x128xf32> to vector<1x128xf32>
    %c0_13 = arith.constant 0 : index
    %c1 = arith.constant 1 : index
    %c0_14 = arith.constant 0 : index
    %30 = vector.load %arg15[%c0_13, %c1, %c0_14] : memref<6x2x128xf32, #tpu.memory_space<vmem>>, vector<1x1x128xf32>
    %31 = vector.shape_cast %30 : vector<1x1x128xf32> to vector<1x128xf32>
    %32 = arith.subf %11, %24 : vector<64x128xf32>
    %cst_15 = arith.constant 9.99999974E-6 : f32
    %33 = vector.broadcast %cst_15 : f32 to vector<64x128xf32>
    %34 = arith.addf %27, %33 : vector<64x128xf32>
    %35 = math.rsqrt %34 : vector<64x128xf32>
    %36 = vector.broadcast %29 : vector<1x128xf32> to vector<64x128xf32>
    %37 = arith.mulf %35, %36 : vector<64x128xf32>
    %38 = arith.mulf %32, %37 : vector<64x128xf32>
    %39 = vector.broadcast %31 : vector<1x128xf32> to vector<64x128xf32>
    %40 = arith.addf %38, %39 : vector<64x128xf32>
    %cst_16 = arith.constant 2.000000e-01 : f32
    %41 = vector.broadcast %cst_16 : f32 to vector<64x128xf32>
    %42 = arith.mulf %41, %40 : vector<64x128xf32>
    %43 = arith.maximumf %40, %42 : vector<64x128xf32>
    %c0_17 = arith.constant 0 : index
    %c0_18 = arith.constant 0 : index
    %44 = vector.load %arg2[%c0_17, %c0_18] : memref<64x128xf32, #tpu.memory_space<vmem>>, vector<64x128xf32>
    %45 = arith.addf %43, %44 : vector<64x128xf32>
    %46 = arith.truncf %45 : vector<64x128xf32> to vector<64x128xbf16>
    %c1_19 = arith.constant 1 : index
    %c0_20 = arith.constant 0 : index
    %c0_21 = arith.constant 0 : index
    %47 = vector.load %arg3[%c1_19, %c0_20, %c0_21] : memref<8x128x512xbf16, #tpu.memory_space<vmem>>, vector<1x128x512xbf16>
    %48 = vector.shape_cast %47 : vector<1x128x512xbf16> to vector<128x512xbf16>
    %cst_22 = arith.constant dense<0.000000e+00> : vector<64x512xf32>
    %49 = tpu.matmul %46, %48, %cst_22 {dimension_numbers = #tpu.dot_dimension_numbers<[1], [0], [0], [1], [0, 0, 1, 1], [], []>} : vector<64x128xbf16>, vector<128x512xbf16>, vector<64x512xf32> -> vector<64x512xf32>
    %50 = vector.extract_strided_slice %49 {offsets = [0, 0], sizes = [64, 128], strides = [1, 1]} : vector<64x512xf32> to vector<64x128xf32>
    %51 = vector.extract_strided_slice %49 {offsets = [0, 128], sizes = [64, 128], strides = [1, 1]} : vector<64x512xf32> to vector<64x128xf32>
    %52 = vector.extract_strided_slice %49 {offsets = [0, 256], sizes = [64, 128], strides = [1, 1]} : vector<64x512xf32> to vector<64x128xf32>
    %53 = vector.extract_strided_slice %49 {offsets = [0, 384], sizes = [64, 128], strides = [1, 1]} : vector<64x512xf32> to vector<64x128xf32>
    %54 = tpu.concatenate %50, %51, %52, %53 in 0 : vector<64x128xf32>, vector<64x128xf32>, vector<64x128xf32>, vector<64x128xf32> -> vector<256x128xf32>
    %c0_23 = arith.constant 0 : index
    %c0_24 = arith.constant 0 : index
    %55 = vector.load %arg5[%c0_23, %c0_24] : memref<32x256xf32, #tpu.memory_space<vmem>>, vector<32x256xf32>
    %cst_25 = arith.constant dense<0.000000e+00> : vector<32x128xf32>
    %56 = tpu.matmul %55, %54, %cst_25 {dimension_numbers = #tpu.dot_dimension_numbers<[1], [0], [0], [1], [0, 0, 1, 1], [], []>} : vector<32x256xf32>, vector<256x128xf32>, vector<32x128xf32> -> vector<32x128xf32>
    %57 = arith.mulf %56, %56 : vector<32x128xf32>
    %58 = tpu.concatenate %56, %57 in 0 : vector<32x128xf32>, vector<32x128xf32> -> vector<64x128xf32>
    %c16_i32_26 = arith.constant 16 : i32
    %59 = tpu.dynamic_rotate %58 by %c16_i32_26 dim 1 : vector<64x128xf32>, i32 -> vector<64x128xf32>
    %60 = arith.addf %58, %59 : vector<64x128xf32>
    %c32_i32_27 = arith.constant 32 : i32
    %61 = tpu.dynamic_rotate %60 by %c32_i32_27 dim 1 : vector<64x128xf32>, i32 -> vector<64x128xf32>
    %62 = arith.addf %60, %61 : vector<64x128xf32>
    %c64_i32_28 = arith.constant 64 : i32
    %63 = tpu.dynamic_rotate %62 by %c64_i32_28 dim 1 : vector<64x128xf32>, i32 -> vector<64x128xf32>
    %64 = arith.addf %62, %63 : vector<64x128xf32>
    %c0_29 = arith.constant 0 : index
    %c0_30 = arith.constant 0 : index
    %65 = vector.load %arg13[%c0_29, %c0_30] : memref<64x64xf32, #tpu.memory_space<vmem>>, vector<64x64xf32>
    %cst_31 = arith.constant dense<0.000000e+00> : vector<64x128xf32>
    %66 = tpu.matmul %65, %64, %cst_31 {dimension_numbers = #tpu.dot_dimension_numbers<[1], [0], [0], [1], [0, 0, 1, 1], [], []>} : vector<64x64xf32>, vector<64x128xf32>, vector<64x128xf32> -> vector<64x128xf32>
    %67 = vector.extract_strided_slice %66 {offsets = [0, 0], sizes = [32, 128], strides = [1, 1]} : vector<64x128xf32> to vector<32x128xf32>
    %68 = vector.extract_strided_slice %66 {offsets = [32, 0], sizes = [32, 128], strides = [1, 1]} : vector<64x128xf32> to vector<32x128xf32>
    %69 = arith.mulf %67, %67 : vector<32x128xf32>
    %70 = arith.subf %68, %69 : vector<32x128xf32>
    %c1_32 = arith.constant 1 : index
    %c0_33 = arith.constant 0 : index
    %c0_34 = arith.constant 0 : index
    %71 = vector.load %arg15[%c1_32, %c0_33, %c0_34] : memref<6x2x128xf32, #tpu.memory_space<vmem>>, vector<1x1x128xf32>
    %72 = vector.shape_cast %71 : vector<1x1x128xf32> to vector<1x128xf32>
    %c1_35 = arith.constant 1 : index
    %c1_36 = arith.constant 1 : index
    %c0_37 = arith.constant 0 : index
    %73 = vector.load %arg15[%c1_35, %c1_36, %c0_37] : memref<6x2x128xf32, #tpu.memory_space<vmem>>, vector<1x1x128xf32>
    %74 = vector.shape_cast %73 : vector<1x1x128xf32> to vector<1x128xf32>
    %75 = arith.subf %56, %67 : vector<32x128xf32>
    %cst_38 = arith.constant 9.99999974E-6 : f32
    %76 = vector.broadcast %cst_38 : f32 to vector<32x128xf32>
    %77 = arith.addf %70, %76 : vector<32x128xf32>
    %78 = math.rsqrt %77 : vector<32x128xf32>
    %79 = vector.broadcast %72 : vector<1x128xf32> to vector<32x128xf32>
    %80 = arith.mulf %78, %79 : vector<32x128xf32>
    %81 = arith.mulf %75, %80 : vector<32x128xf32>
    %82 = vector.broadcast %74 : vector<1x128xf32> to vector<32x128xf32>
    %83 = arith.addf %81, %82 : vector<32x128xf32>
    %cst_39 = arith.constant 2.000000e-01 : f32
    %84 = vector.broadcast %cst_39 : f32 to vector<32x128xf32>
    %85 = arith.mulf %84, %83 : vector<32x128xf32>
    %86 = arith.maximumf %83, %85 : vector<32x128xf32>
    %87 = arith.truncf %86 : vector<32x128xf32> to vector<32x128xbf16>
    %c2 = arith.constant 2 : index
    %c0_40 = arith.constant 0 : index
    %c0_41 = arith.constant 0 : index
    %88 = vector.load %arg3[%c2, %c0_40, %c0_41] : memref<8x128x512xbf16, #tpu.memory_space<vmem>>, vector<1x128x512xbf16>
    %89 = vector.shape_cast %88 : vector<1x128x512xbf16> to vector<128x512xbf16>
    %cst_42 = arith.constant dense<0.000000e+00> : vector<32x512xf32>
    %90 = tpu.matmul %87, %89, %cst_42 {dimension_numbers = #tpu.dot_dimension_numbers<[1], [0], [0], [1], [0, 0, 1, 1], [], []>} : vector<32x128xbf16>, vector<128x512xbf16>, vector<32x512xf32> -> vector<32x512xf32>
    %91 = vector.extract_strided_slice %90 {offsets = [0, 0], sizes = [32, 128], strides = [1, 1]} : vector<32x512xf32> to vector<32x128xf32>
    %92 = vector.extract_strided_slice %90 {offsets = [0, 128], sizes = [32, 128], strides = [1, 1]} : vector<32x512xf32> to vector<32x128xf32>
    %93 = vector.extract_strided_slice %90 {offsets = [0, 256], sizes = [32, 128], strides = [1, 1]} : vector<32x512xf32> to vector<32x128xf32>
    %94 = vector.extract_strided_slice %90 {offsets = [0, 384], sizes = [32, 128], strides = [1, 1]} : vector<32x512xf32> to vector<32x128xf32>
    %95 = tpu.concatenate %91, %92, %93, %94 in 0 : vector<32x128xf32>, vector<32x128xf32>, vector<32x128xf32>, vector<32x128xf32> -> vector<128x128xf32>
    %c0_43 = arith.constant 0 : index
    %c0_44 = arith.constant 0 : index
    %96 = vector.load %arg6[%c0_43, %c0_44] : memref<16x128xf32, #tpu.memory_space<vmem>>, vector<16x128xf32>
    %cst_45 = arith.constant dense<0.000000e+00> : vector<16x128xf32>
    %97 = tpu.matmul %96, %95, %cst_45 {dimension_numbers = #tpu.dot_dimension_numbers<[1], [0], [0], [1], [0, 0, 1, 1], [], []>} : vector<16x128xf32>, vector<128x128xf32>, vector<16x128xf32> -> vector<16x128xf32>
    %98 = arith.mulf %97, %97 : vector<16x128xf32>
    %99 = tpu.concatenate %97, %98 in 0 : vector<16x128xf32>, vector<16x128xf32> -> vector<32x128xf32>
    %c32_i32_46 = arith.constant 32 : i32
    %100 = tpu.dynamic_rotate %99 by %c32_i32_46 dim 1 : vector<32x128xf32>, i32 -> vector<32x128xf32>
    %101 = arith.addf %99, %100 : vector<32x128xf32>
    %c64_i32_47 = arith.constant 64 : i32
    %102 = tpu.dynamic_rotate %101 by %c64_i32_47 dim 1 : vector<32x128xf32>, i32 -> vector<32x128xf32>
    %103 = arith.addf %101, %102 : vector<32x128xf32>
    %c0_48 = arith.constant 0 : index
    %c0_49 = arith.constant 0 : index
    %104 = vector.load %arg14[%c0_48, %c0_49] : memref<32x32xf32, #tpu.memory_space<vmem>>, vector<32x32xf32>
    %cst_50 = arith.constant dense<0.000000e+00> : vector<32x128xf32>
    %105 = tpu.matmul %104, %103, %cst_50 {dimension_numbers = #tpu.dot_dimension_numbers<[1], [0], [0], [1], [0, 0, 1, 1], [], []>} : vector<32x32xf32>, vector<32x128xf32>, vector<32x128xf32> -> vector<32x128xf32>
    %106 = vector.extract_strided_slice %105 {offsets = [0, 0], sizes = [16, 128], strides = [1, 1]} : vector<32x128xf32> to vector<16x128xf32>
    %107 = vector.extract_strided_slice %105 {offsets = [16, 0], sizes = [16, 128], strides = [1, 1]} : vector<32x128xf32> to vector<16x128xf32>
    %108 = arith.mulf %106, %106 : vector<16x128xf32>
    %109 = arith.subf %107, %108 : vector<16x128xf32>
    %c2_51 = arith.constant 2 : index
    %c0_52 = arith.constant 0 : index
    %c0_53 = arith.constant 0 : index
    %110 = vector.load %arg15[%c2_51, %c0_52, %c0_53] : memref<6x2x128xf32, #tpu.memory_space<vmem>>, vector<1x1x128xf32>
    %111 = vector.shape_cast %110 : vector<1x1x128xf32> to vector<1x128xf32>
    %c2_54 = arith.constant 2 : index
    %c1_55 = arith.constant 1 : index
    %c0_56 = arith.constant 0 : index
    %112 = vector.load %arg15[%c2_54, %c1_55, %c0_56] : memref<6x2x128xf32, #tpu.memory_space<vmem>>, vector<1x1x128xf32>
    %113 = vector.shape_cast %112 : vector<1x1x128xf32> to vector<1x128xf32>
    %114 = arith.subf %97, %106 : vector<16x128xf32>
    %cst_57 = arith.constant 9.99999974E-6 : f32
    %115 = vector.broadcast %cst_57 : f32 to vector<16x128xf32>
    %116 = arith.addf %109, %115 : vector<16x128xf32>
    %117 = math.rsqrt %116 : vector<16x128xf32>
    %118 = vector.broadcast %111 : vector<1x128xf32> to vector<16x128xf32>
    %119 = arith.mulf %117, %118 : vector<16x128xf32>
    %120 = arith.mulf %114, %119 : vector<16x128xf32>
    %121 = vector.broadcast %113 : vector<1x128xf32> to vector<16x128xf32>
    %122 = arith.addf %120, %121 : vector<16x128xf32>
    %cst_58 = arith.constant 2.000000e-01 : f32
    %123 = vector.broadcast %cst_58 : f32 to vector<16x128xf32>
    %124 = arith.mulf %123, %122 : vector<16x128xf32>
    %125 = arith.maximumf %122, %124 : vector<16x128xf32>
    %126 = arith.truncf %125 : vector<16x128xf32> to vector<16x128xbf16>
    %c3 = arith.constant 3 : index
    %c0_59 = arith.constant 0 : index
    %c0_60 = arith.constant 0 : index
    %127 = vector.load %arg3[%c3, %c0_59, %c0_60] : memref<8x128x512xbf16, #tpu.memory_space<vmem>>, vector<1x128x512xbf16>
    %128 = vector.shape_cast %127 : vector<1x128x512xbf16> to vector<128x512xbf16>
    %cst_61 = arith.constant dense<0.000000e+00> : vector<16x512xf32>
    %129 = tpu.matmul %126, %128, %cst_61 {dimension_numbers = #tpu.dot_dimension_numbers<[1], [0], [0], [1], [0, 0, 1, 1], [], []>} : vector<16x128xbf16>, vector<128x512xbf16>, vector<16x512xf32> -> vector<16x512xf32>
    %130 = vector.extract_strided_slice %129 {offsets = [0, 0], sizes = [16, 128], strides = [1, 1]} : vector<16x512xf32> to vector<16x128xf32>
    %131 = vector.extract_strided_slice %129 {offsets = [0, 128], sizes = [16, 128], strides = [1, 1]} : vector<16x512xf32> to vector<16x128xf32>
    %132 = vector.extract_strided_slice %129 {offsets = [0, 256], sizes = [16, 128], strides = [1, 1]} : vector<16x512xf32> to vector<16x128xf32>
    %133 = vector.extract_strided_slice %129 {offsets = [0, 384], sizes = [16, 128], strides = [1, 1]} : vector<16x512xf32> to vector<16x128xf32>
    %134 = tpu.concatenate %130, %131, %132, %133 in 0 : vector<16x128xf32>, vector<16x128xf32>, vector<16x128xf32>, vector<16x128xf32> -> vector<64x128xf32>
    %c0_62 = arith.constant 0 : index
    %c0_63 = arith.constant 0 : index
    %135 = vector.load %arg7[%c0_62, %c0_63] : memref<4x64xf32, #tpu.memory_space<vmem>>, vector<4x64xf32>
    %cst_64 = arith.constant dense<0.000000e+00> : vector<4x128xf32>
    %136 = tpu.matmul %135, %134, %cst_64 {dimension_numbers = #tpu.dot_dimension_numbers<[1], [0], [0], [1], [0, 0, 1, 1], [], []>} : vector<4x64xf32>, vector<64x128xf32>, vector<4x128xf32> -> vector<4x128xf32>
    %c0_65 = arith.constant 0 : index
    %c0_66 = arith.constant 0 : index
    %c0_67 = arith.constant 0 : index
    %137 = vector.load %arg17[%c0_65, %c0_66, %c0_67] : memref<1x4x128xf32, #tpu.memory_space<vmem>>, vector<1x4x128xf32>
    %138 = vector.shape_cast %137 : vector<1x4x128xf32> to vector<4x128xf32>
    %139 = vector.shape_cast %136 : vector<4x128xf32> to vector<1x4x128xf32>
    tpu.vector_store %arg17[%c0_65, %c0_66, %c0_67], %139 {strides = array<i32>} : memref<1x4x128xf32, #tpu.memory_space<vmem>>, vector<1x4x128xf32>,
    %140 = arith.truncf %136 : vector<4x128xf32> to vector<4x128xbf16>
    %c4 = arith.constant 4 : index
    %c0_68 = arith.constant 0 : index
    %c0_69 = arith.constant 0 : index
    %141 = vector.load %arg3[%c4, %c0_68, %c0_69] : memref<8x128x512xbf16, #tpu.memory_space<vmem>>, vector<1x128x512xbf16>
    %142 = vector.shape_cast %141 : vector<1x128x512xbf16> to vector<128x512xbf16>
    %cst_70 = arith.constant dense<0.000000e+00> : vector<4x512xf32>
    %143 = tpu.matmul %140, %142, %cst_70 {dimension_numbers = #tpu.dot_dimension_numbers<[1], [0], [0], [1], [0, 0, 1, 1], [], []>} : vector<4x128xbf16>, vector<128x512xbf16>, vector<4x512xf32> -> vector<4x512xf32>
    %144 = vector.extract_strided_slice %143 {offsets = [0, 0], sizes = [4, 128], strides = [1, 1]} : vector<4x512xf32> to vector<4x128xf32>
    %145 = vector.extract_strided_slice %143 {offsets = [0, 128], sizes = [4, 128], strides = [1, 1]} : vector<4x512xf32> to vector<4x128xf32>
    %146 = vector.extract_strided_slice %143 {offsets = [0, 256], sizes = [4, 128], strides = [1, 1]} : vector<4x512xf32> to vector<4x128xf32>
    %147 = vector.extract_strided_slice %143 {offsets = [0, 384], sizes = [4, 128], strides = [1, 1]} : vector<4x512xf32> to vector<4x128xf32>
    %148 = tpu.concatenate %144, %145, %146, %147 in 0 : vector<4x128xf32>, vector<4x128xf32>, vector<4x128xf32>, vector<4x128xf32> -> vector<16x128xf32>
    %c0_71 = arith.constant 0 : index
    %c0_72 = arith.constant 0 : index
    %149 = vector.load %arg8[%c0_71, %c0_72] : memref<16x16xf32, #tpu.memory_space<vmem>>, vector<16x16xf32>
    %cst_73 = arith.constant dense<0.000000e+00> : vector<16x128xf32>
    %150 = tpu.matmul %149, %148, %cst_73 {dimension_numbers = #tpu.dot_dimension_numbers<[1], [0], [0], [1], [0, 0, 1, 1], [], []>} : vector<16x16xf32>, vector<16x128xf32>, vector<16x128xf32> -> vector<16x128xf32>
    %151 = arith.mulf %150, %150 : vector<16x128xf32>
    %152 = tpu.concatenate %150, %151 in 0 : vector<16x128xf32>, vector<16x128xf32> -> vector<32x128xf32>
    %c32_i32_74 = arith.constant 32 : i32
    %153 = tpu.dynamic_rotate %152 by %c32_i32_74 dim 1 : vector<32x128xf32>, i32 -> vector<32x128xf32>
    %154 = arith.addf %152, %153 : vector<32x128xf32>
    %c64_i32_75 = arith.constant 64 : i32
    %155 = tpu.dynamic_rotate %154 by %c64_i32_75 dim 1 : vector<32x128xf32>, i32 -> vector<32x128xf32>
    %156 = arith.addf %154, %155 : vector<32x128xf32>
    %c0_76 = arith.constant 0 : index
    %c0_77 = arith.constant 0 : index
    %157 = vector.load %arg14[%c0_76, %c0_77] : memref<32x32xf32, #tpu.memory_space<vmem>>, vector<32x32xf32>
    %cst_78 = arith.constant dense<0.000000e+00> : vector<32x128xf32>
    %158 = tpu.matmul %157, %156, %cst_78 {dimension_numbers = #tpu.dot_dimension_numbers<[1], [0], [0], [1], [0, 0, 1, 1], [], []>} : vector<32x32xf32>, vector<32x128xf32>, vector<32x128xf32> -> vector<32x128xf32>
    %159 = vector.extract_strided_slice %158 {offsets = [0, 0], sizes = [16, 128], strides = [1, 1]} : vector<32x128xf32> to vector<16x128xf32>
    %160 = vector.extract_strided_slice %158 {offsets = [16, 0], sizes = [16, 128], strides = [1, 1]} : vector<32x128xf32> to vector<16x128xf32>
    %161 = arith.mulf %159, %159 : vector<16x128xf32>
    %162 = arith.subf %160, %161 : vector<16x128xf32>
    %c3_79 = arith.constant 3 : index
    %c0_80 = arith.constant 0 : index
    %c0_81 = arith.constant 0 : index
    %163 = vector.load %arg15[%c3_79, %c0_80, %c0_81] : memref<6x2x128xf32, #tpu.memory_space<vmem>>, vector<1x1x128xf32>
    %164 = vector.shape_cast %163 : vector<1x1x128xf32> to vector<1x128xf32>
    %c3_82 = arith.constant 3 : index
    %c1_83 = arith.constant 1 : index
    %c0_84 = arith.constant 0 : index
    %165 = vector.load %arg15[%c3_82, %c1_83, %c0_84] : memref<6x2x128xf32, #tpu.memory_space<vmem>>, vector<1x1x128xf32>
    %166 = vector.shape_cast %165 : vector<1x1x128xf32> to vector<1x128xf32>
    %167 = arith.subf %150, %159 : vector<16x128xf32>
    %cst_85 = arith.constant 9.99999974E-6 : f32
    %168 = vector.broadcast %cst_85 : f32 to vector<16x128xf32>
    %169 = arith.addf %162, %168 : vector<16x128xf32>
    %170 = math.rsqrt %169 : vector<16x128xf32>
    %171 = vector.broadcast %164 : vector<1x128xf32> to vector<16x128xf32>
    %172 = arith.mulf %170, %171 : vector<16x128xf32>
    %173 = arith.mulf %167, %172 : vector<16x128xf32>
    %174 = vector.broadcast %166 : vector<1x128xf32> to vector<16x128xf32>
    %175 = arith.addf %173, %174 : vector<16x128xf32>
    %cst_86 = arith.constant 2.000000e-01 : f32
    %176 = vector.broadcast %cst_86 : f32 to vector<16x128xf32>
    %177 = arith.mulf %176, %175 : vector<16x128xf32>
    %178 = arith.maximumf %175, %177 : vector<16x128xf32>
    %179 = arith.truncf %178 : vector<16x128xf32> to vector<16x128xbf16>
    %c5 = arith.constant 5 : index
    %c0_87 = arith.constant 0 : index
    %c0_88 = arith.constant 0 : index
    %180 = vector.load %arg3[%c5, %c0_87, %c0_88] : memref<8x128x512xbf16, #tpu.memory_space<vmem>>, vector<1x128x512xbf16>
    %181 = vector.shape_cast %180 : vector<1x128x512xbf16> to vector<128x512xbf16>
    %cst_89 = arith.constant dense<0.000000e+00> : vector<16x512xf32>
    %182 = tpu.matmul %179, %181, %cst_89 {dimension_numbers = #tpu.dot_dimension_numbers<[1], [0], [0], [1], [0, 0, 1, 1], [], []>} : vector<16x128xbf16>, vector<128x512xbf16>, vector<16x512xf32> -> vector<16x512xf32>
    %183 = vector.extract_strided_slice %182 {offsets = [0, 0], sizes = [16, 128], strides = [1, 1]} : vector<16x512xf32> to vector<16x128xf32>
    %184 = vector.extract_strided_slice %182 {offsets = [0, 128], sizes = [16, 128], strides = [1, 1]} : vector<16x512xf32> to vector<16x128xf32>
    %185 = vector.extract_strided_slice %182 {offsets = [0, 256], sizes = [16, 128], strides = [1, 1]} : vector<16x512xf32> to vector<16x128xf32>
    %186 = vector.extract_strided_slice %182 {offsets = [0, 384], sizes = [16, 128], strides = [1, 1]} : vector<16x512xf32> to vector<16x128xf32>
    %187 = tpu.concatenate %183, %184, %185, %186 in 0 : vector<16x128xf32>, vector<16x128xf32>, vector<16x128xf32>, vector<16x128xf32> -> vector<64x128xf32>
    %c0_90 = arith.constant 0 : index
    %c0_91 = arith.constant 0 : index
    %188 = vector.load %arg9[%c0_90, %c0_91] : memref<32x64xf32, #tpu.memory_space<vmem>>, vector<32x64xf32>
    %cst_92 = arith.constant dense<0.000000e+00> : vector<32x128xf32>
    %189 = tpu.matmul %188, %187, %cst_92 {dimension_numbers = #tpu.dot_dimension_numbers<[1], [0], [0], [1], [0, 0, 1, 1], [], []>} : vector<32x64xf32>, vector<64x128xf32>, vector<32x128xf32> -> vector<32x128xf32>
    %190 = arith.mulf %189, %189 : vector<32x128xf32>
    %191 = tpu.concatenate %189, %190 in 0 : vector<32x128xf32>, vector<32x128xf32> -> vector<64x128xf32>
    %c16_i32_93 = arith.constant 16 : i32
    %192 = tpu.dynamic_rotate %191 by %c16_i32_93 dim 1 : vector<64x128xf32>, i32 -> vector<64x128xf32>
    %193 = arith.addf %191, %192 : vector<64x128xf32>
    %c32_i32_94 = arith.constant 32 : i32
    %194 = tpu.dynamic_rotate %193 by %c32_i32_94 dim 1 : vector<64x128xf32>, i32 -> vector<64x128xf32>
    %195 = arith.addf %193, %194 : vector<64x128xf32>
    %c64_i32_95 = arith.constant 64 : i32
    %196 = tpu.dynamic_rotate %195 by %c64_i32_95 dim 1 : vector<64x128xf32>, i32 -> vector<64x128xf32>
    %197 = arith.addf %195, %196 : vector<64x128xf32>
    %c0_96 = arith.constant 0 : index
    %c0_97 = arith.constant 0 : index
    %198 = vector.load %arg13[%c0_96, %c0_97] : memref<64x64xf32, #tpu.memory_space<vmem>>, vector<64x64xf32>
    %cst_98 = arith.constant dense<0.000000e+00> : vector<64x128xf32>
    %199 = tpu.matmul %198, %197, %cst_98 {dimension_numbers = #tpu.dot_dimension_numbers<[1], [0], [0], [1], [0, 0, 1, 1], [], []>} : vector<64x64xf32>, vector<64x128xf32>, vector<64x128xf32> -> vector<64x128xf32>
    %200 = vector.extract_strided_slice %199 {offsets = [0, 0], sizes = [32, 128], strides = [1, 1]} : vector<64x128xf32> to vector<32x128xf32>
    %201 = vector.extract_strided_slice %199 {offsets = [32, 0], sizes = [32, 128], strides = [1, 1]} : vector<64x128xf32> to vector<32x128xf32>
    %202 = arith.mulf %200, %200 : vector<32x128xf32>
    %203 = arith.subf %201, %202 : vector<32x128xf32>
    %c4_99 = arith.constant 4 : index
    %c0_100 = arith.constant 0 : index
    %c0_101 = arith.constant 0 : index
    %204 = vector.load %arg15[%c4_99, %c0_100, %c0_101] : memref<6x2x128xf32, #tpu.memory_space<vmem>>, vector<1x1x128xf32>
    %205 = vector.shape_cast %204 : vector<1x1x128xf32> to vector<1x128xf32>
    %c4_102 = arith.constant 4 : index
    %c1_103 = arith.constant 1 : index
    %c0_104 = arith.constant 0 : index
    %206 = vector.load %arg15[%c4_102, %c1_103, %c0_104] : memref<6x2x128xf32, #tpu.memory_space<vmem>>, vector<1x1x128xf32>
    %207 = vector.shape_cast %206 : vector<1x1x128xf32> to vector<1x128xf32>
    %208 = arith.subf %189, %200 : vector<32x128xf32>
    %cst_105 = arith.constant 9.99999974E-6 : f32
    %209 = vector.broadcast %cst_105 : f32 to vector<32x128xf32>
    %210 = arith.addf %203, %209 : vector<32x128xf32>
    %211 = math.rsqrt %210 : vector<32x128xf32>
    %212 = vector.broadcast %205 : vector<1x128xf32> to vector<32x128xf32>
    %213 = arith.mulf %211, %212 : vector<32x128xf32>
    %214 = arith.mulf %208, %213 : vector<32x128xf32>
    %215 = vector.broadcast %207 : vector<1x128xf32> to vector<32x128xf32>
    %216 = arith.addf %214, %215 : vector<32x128xf32>
    %cst_106 = arith.constant 2.000000e-01 : f32
    %217 = vector.broadcast %cst_106 : f32 to vector<32x128xf32>
    %218 = arith.mulf %217, %216 : vector<32x128xf32>
    %219 = arith.maximumf %216, %218 : vector<32x128xf32>
    %220 = arith.truncf %219 : vector<32x128xf32> to vector<32x128xbf16>
    %c6 = arith.constant 6 : index
    %c0_107 = arith.constant 0 : index
    %c0_108 = arith.constant 0 : index
    %221 = vector.load %arg3[%c6, %c0_107, %c0_108] : memref<8x128x512xbf16, #tpu.memory_space<vmem>>, vector<1x128x512xbf16>
    %222 = vector.shape_cast %221 : vector<1x128x512xbf16> to vector<128x512xbf16>
    %cst_109 = arith.constant dense<0.000000e+00> : vector<32x512xf32>
    %223 = tpu.matmul %220, %222, %cst_109 {dimension_numbers = #tpu.dot_dimension_numbers<[1], [0], [0], [1], [0, 0, 1, 1], [], []>} : vector<32x128xbf16>, vector<128x512xbf16>, vector<32x512xf32> -> vector<32x512xf32>
    %224 = vector.extract_strided_slice %223 {offsets = [0, 0], sizes = [32, 128], strides = [1, 1]} : vector<32x512xf32> to vector<32x128xf32>
    %225 = vector.extract_strided_slice %223 {offsets = [0, 128], sizes = [32, 128], strides = [1, 1]} : vector<32x512xf32> to vector<32x128xf32>
    %226 = vector.extract_strided_slice %223 {offsets = [0, 256], sizes = [32, 128], strides = [1, 1]} : vector<32x512xf32> to vector<32x128xf32>
    %227 = vector.extract_strided_slice %223 {offsets = [0, 384], sizes = [32, 128], strides = [1, 1]} : vector<32x512xf32> to vector<32x128xf32>
    %228 = tpu.concatenate %224, %225, %226, %227 in 0 : vector<32x128xf32>, vector<32x128xf32>, vector<32x128xf32>, vector<32x128xf32> -> vector<128x128xf32>
    %c0_110 = arith.constant 0 : index
    %c0_111 = arith.constant 0 : index
    %229 = vector.load %arg10[%c0_110, %c0_111] : memref<64x128xf32, #tpu.memory_space<vmem>>, vector<64x128xf32>
    %cst_112 = arith.constant dense<0.000000e+00> : vector<64x128xf32>
    %230 = tpu.matmul %229, %228, %cst_112 {dimension_numbers = #tpu.dot_dimension_numbers<[1], [0], [0], [1], [0, 0, 1, 1], [], []>} : vector<64x128xf32>, vector<128x128xf32>, vector<64x128xf32> -> vector<64x128xf32>
    %231 = arith.mulf %230, %230 : vector<64x128xf32>
    %232 = tpu.concatenate %230, %231 in 0 : vector<64x128xf32>, vector<64x128xf32> -> vector<128x128xf32>
    %c8_i32_113 = arith.constant 8 : i32
    %233 = tpu.dynamic_rotate %232 by %c8_i32_113 dim 1 : vector<128x128xf32>, i32 -> vector<128x128xf32>
    %234 = arith.addf %232, %233 : vector<128x128xf32>
    %c16_i32_114 = arith.constant 16 : i32
    %235 = tpu.dynamic_rotate %234 by %c16_i32_114 dim 1 : vector<128x128xf32>, i32 -> vector<128x128xf32>
    %236 = arith.addf %234, %235 : vector<128x128xf32>
    %c32_i32_115 = arith.constant 32 : i32
    %237 = tpu.dynamic_rotate %236 by %c32_i32_115 dim 1 : vector<128x128xf32>, i32 -> vector<128x128xf32>
    %238 = arith.addf %236, %237 : vector<128x128xf32>
    %c64_i32_116 = arith.constant 64 : i32
    %239 = tpu.dynamic_rotate %238 by %c64_i32_116 dim 1 : vector<128x128xf32>, i32 -> vector<128x128xf32>
    %240 = arith.addf %238, %239 : vector<128x128xf32>
    %c0_117 = arith.constant 0 : index
    %c0_118 = arith.constant 0 : index
    %241 = vector.load %arg12[%c0_117, %c0_118] : memref<128x128xf32, #tpu.memory_space<vmem>>, vector<128x128xf32>
    %cst_119 = arith.constant dense<0.000000e+00> : vector<128x128xf32>
    %242 = tpu.matmul %241, %240, %cst_119 {dimension_numbers = #tpu.dot_dimension_numbers<[1], [0], [0], [1], [0, 0, 1, 1], [], []>} : vector<128x128xf32>, vector<128x128xf32>, vector<128x128xf32> -> vector<128x128xf32>
    %243 = vector.extract_strided_slice %242 {offsets = [0, 0], sizes = [64, 128], strides = [1, 1]} : vector<128x128xf32> to vector<64x128xf32>
    %244 = vector.extract_strided_slice %242 {offsets = [64, 0], sizes = [64, 128], strides = [1, 1]} : vector<128x128xf32> to vector<64x128xf32>
    %245 = arith.mulf %243, %243 : vector<64x128xf32>
    %246 = arith.subf %244, %245 : vector<64x128xf32>
    %c5_120 = arith.constant 5 : index
    %c0_121 = arith.constant 0 : index
    %c0_122 = arith.constant 0 : index
    %247 = vector.load %arg15[%c5_120, %c0_121, %c0_122] : memref<6x2x128xf32, #tpu.memory_space<vmem>>, vector<1x1x128xf32>
    %248 = vector.shape_cast %247 : vector<1x1x128xf32> to vector<1x128xf32>
    %c5_123 = arith.constant 5 : index
    %c1_124 = arith.constant 1 : index
    %c0_125 = arith.constant 0 : index
    %249 = vector.load %arg15[%c5_123, %c1_124, %c0_125] : memref<6x2x128xf32, #tpu.memory_space<vmem>>, vector<1x1x128xf32>
    %250 = vector.shape_cast %249 : vector<1x1x128xf32> to vector<1x128xf32>
    %251 = arith.subf %230, %243 : vector<64x128xf32>
    %cst_126 = arith.constant 9.99999974E-6 : f32
    %252 = vector.broadcast %cst_126 : f32 to vector<64x128xf32>
    %253 = arith.addf %246, %252 : vector<64x128xf32>
    %254 = math.rsqrt %253 : vector<64x128xf32>
    %255 = vector.broadcast %248 : vector<1x128xf32> to vector<64x128xf32>
    %256 = arith.mulf %254, %255 : vector<64x128xf32>
    %257 = arith.mulf %251, %256 : vector<64x128xf32>
    %258 = vector.broadcast %250 : vector<1x128xf32> to vector<64x128xf32>
    %259 = arith.addf %257, %258 : vector<64x128xf32>
    %cst_127 = arith.constant 2.000000e-01 : f32
    %260 = vector.broadcast %cst_127 : f32 to vector<64x128xf32>
    %261 = arith.mulf %260, %259 : vector<64x128xf32>
    %262 = arith.maximumf %259, %261 : vector<64x128xf32>
    %263 = arith.truncf %262 : vector<64x128xf32> to vector<64x128xbf16>
    %c7 = arith.constant 7 : index
    %c0_128 = arith.constant 0 : index
    %c0_129 = arith.constant 0 : index
    %264 = vector.load %arg3[%c7, %c0_128, %c0_129] : memref<8x128x512xbf16, #tpu.memory_space<vmem>>, vector<1x128x512xbf16>
    %265 = vector.shape_cast %264 : vector<1x128x512xbf16> to vector<128x512xbf16>
    %cst_130 = arith.constant dense<0.000000e+00> : vector<64x512xf32>
    %266 = tpu.matmul %263, %265, %cst_130 {dimension_numbers = #tpu.dot_dimension_numbers<[1], [0], [0], [1], [0, 0, 1, 1], [], []>} : vector<64x128xbf16>, vector<128x512xbf16>, vector<64x512xf32> -> vector<64x512xf32>
    %267 = vector.extract_strided_slice %266 {offsets = [0, 0], sizes = [64, 128], strides = [1, 1]} : vector<64x512xf32> to vector<64x128xf32>
    %268 = vector.extract_strided_slice %266 {offsets = [0, 128], sizes = [64, 128], strides = [1, 1]} : vector<64x512xf32> to vector<64x128xf32>
    %269 = vector.extract_strided_slice %266 {offsets = [0, 256], sizes = [64, 128], strides = [1, 1]} : vector<64x512xf32> to vector<64x128xf32>
    %270 = vector.extract_strided_slice %266 {offsets = [0, 384], sizes = [64, 128], strides = [1, 1]} : vector<64x512xf32> to vector<64x128xf32>
    %271 = tpu.concatenate %267, %268, %269, %270 in 0 : vector<64x128xf32>, vector<64x128xf32>, vector<64x128xf32>, vector<64x128xf32> -> vector<256x128xf32>
    %c0_131 = arith.constant 0 : index
    %c0_132 = arith.constant 0 : index
    %272 = vector.load %arg11[%c0_131, %c0_132] : memref<128x256xf32, #tpu.memory_space<vmem>>, vector<128x256xf32>
    %cst_133 = arith.constant dense<0.000000e+00> : vector<128x128xf32>
    %273 = tpu.matmul %272, %271, %cst_133 {dimension_numbers = #tpu.dot_dimension_numbers<[1], [0], [0], [1], [0, 0, 1, 1], [], []>} : vector<128x256xf32>, vector<256x128xf32>, vector<128x128xf32> -> vector<128x128xf32>
    %274 = math.tanh %273 : vector<128x128xf32>
    %c0_134 = arith.constant 0 : index
    %c0_135 = arith.constant 0 : index
    %275 = vector.load %arg16[%c0_134, %c0_135] : memref<128x128xf32, #tpu.memory_space<vmem>>, vector<128x128xf32>
    tpu.vector_store %arg16[%c0_134, %c0_135], %274 {strides = array<i32>} : memref<128x128xf32, #tpu.memory_space<vmem>>, vector<128x128xf32>,
    return
  }
  func.func @transform_0(%arg0: i32) -> (i32, i32) {
    %c0_i32 = arith.constant 0 : i32
    %c0_i32_0 = arith.constant 0 : i32
    return %arg0, %c0_i32 : i32, i32
  }
  func.func @transform_1(%arg0: i32) -> (i32, i32) {
    %c0_i32 = arith.constant 0 : i32
    %c0_i32_0 = arith.constant 0 : i32
    return %arg0, %c0_i32 : i32, i32
  }
  func.func @transform_2(%arg0: i32) -> (i32, i32, i32) {
    %c0_i32 = arith.constant 0 : i32
    %c0_i32_0 = arith.constant 0 : i32
    %c0_i32_1 = arith.constant 0 : i32
    %c0_i32_2 = arith.constant 0 : i32
    return %c0_i32, %c0_i32_0, %c0_i32_1 : i32, i32, i32
  }
  func.func @transform_3(%arg0: i32) -> (i32, i32) {
    %c0_i32 = arith.constant 0 : i32
    %c0_i32_0 = arith.constant 0 : i32
    %c0_i32_1 = arith.constant 0 : i32
    return %c0_i32, %c0_i32_0 : i32, i32
  }
  func.func @transform_4(%arg0: i32) -> (i32, i32) {
    %c0_i32 = arith.constant 0 : i32
    %c0_i32_0 = arith.constant 0 : i32
    %c0_i32_1 = arith.constant 0 : i32
    return %c0_i32, %c0_i32_0 : i32, i32
  }
  func.func @transform_5(%arg0: i32) -> (i32, i32) {
    %c0_i32 = arith.constant 0 : i32
    %c0_i32_0 = arith.constant 0 : i32
    %c0_i32_1 = arith.constant 0 : i32
    return %c0_i32, %c0_i32_0 : i32, i32
  }
  func.func @transform_6(%arg0: i32) -> (i32, i32) {
    %c0_i32 = arith.constant 0 : i32
    %c0_i32_0 = arith.constant 0 : i32
    %c0_i32_1 = arith.constant 0 : i32
    return %c0_i32, %c0_i32_0 : i32, i32
  }
  func.func @transform_7(%arg0: i32) -> (i32, i32) {
    %c0_i32 = arith.constant 0 : i32
    %c0_i32_0 = arith.constant 0 : i32
    %c0_i32_1 = arith.constant 0 : i32
    return %c0_i32, %c0_i32_0 : i32, i32
  }
  func.func @transform_8(%arg0: i32) -> (i32, i32) {
    %c0_i32 = arith.constant 0 : i32
    %c0_i32_0 = arith.constant 0 : i32
    %c0_i32_1 = arith.constant 0 : i32
    return %c0_i32, %c0_i32_0 : i32, i32
  }
  func.func @transform_9(%arg0: i32) -> (i32, i32) {
    %c0_i32 = arith.constant 0 : i32
    %c0_i32_0 = arith.constant 0 : i32
    %c0_i32_1 = arith.constant 0 : i32
    return %c0_i32, %c0_i32_0 : i32, i32
  }
  func.func @transform_10(%arg0: i32) -> (i32, i32) {
    %c0_i32 = arith.constant 0 : i32
    %c0_i32_0 = arith.constant 0 : i32
    %c0_i32_1 = arith.constant 0 : i32
    return %c0_i32, %c0_i32_0 : i32, i32
  }
  func.func @transform_11(%arg0: i32) -> (i32, i32) {
    %c0_i32 = arith.constant 0 : i32
    %c0_i32_0 = arith.constant 0 : i32
    %c0_i32_1 = arith.constant 0 : i32
    return %c0_i32, %c0_i32_0 : i32, i32
  }
  func.func @transform_12(%arg0: i32) -> (i32, i32) {
    %c0_i32 = arith.constant 0 : i32
    %c0_i32_0 = arith.constant 0 : i32
    %c0_i32_1 = arith.constant 0 : i32
    return %c0_i32, %c0_i32_0 : i32, i32
  }
  func.func @transform_13(%arg0: i32) -> (i32, i32) {
    %c0_i32 = arith.constant 0 : i32
    %c0_i32_0 = arith.constant 0 : i32
    %c0_i32_1 = arith.constant 0 : i32
    return %c0_i32, %c0_i32_0 : i32, i32
  }
  func.func @transform_14(%arg0: i32) -> (i32, i32, i32) {
    %c0_i32 = arith.constant 0 : i32
    %c0_i32_0 = arith.constant 0 : i32
    %c0_i32_1 = arith.constant 0 : i32
    %c0_i32_2 = arith.constant 0 : i32
    return %c0_i32, %c0_i32_0, %c0_i32_1 : i32, i32, i32
  }
  func.func @transform_15(%arg0: i32) -> (i32, i32) {
    %c0_i32 = arith.constant 0 : i32
    %c0_i32_0 = arith.constant 0 : i32
    return %arg0, %c0_i32 : i32, i32
  }
  func.func @transform_16(%arg0: i32) -> (i32, i32, i32) {
    %c0_i32 = arith.constant 0 : i32
    %c0_i32_0 = arith.constant 0 : i32
    %c0_i32_1 = arith.constant 0 : i32
    return %arg0, %c0_i32, %c0_i32_0 : i32, i32, i32
  }
}

</mosaic_0001>

<bundles_post_ra>
// kernel: ae_forward.1
= control target key start
LH: loop header
LB: loop body
LE: loop exit
PB: predicated region body
PF: predicated region fallthrough
CT: control target
= control target key end

     0   :  { %s10065_s0 = inlined_call_operand.vmem [shape: f32[256,128], index: 0, kind: input, shape index: {}]   ;;  %s10066_s1 = inlined_call_operand.vmem [shape: f32[128,128], index: 1, kind: input, shape index: {}]   ;;  %s10067_s2 = inlined_call_operand.vmem [shape: bf16[8,128,512], index: 2, kind: input, shape index: {}]   ;;  %s10068_s3 = inlined_call_operand.vmem [shape: f32[64,512], index: 3, kind: input, shape index: {}]   ;;  %s10069_s4 = inlined_call_operand.vmem [shape: f32[32,256], index: 4, kind: input, shape index: {}]   ;;  %s10070_s5 = inlined_call_operand.vmem [shape: f32[16,128], index: 5, kind: input, shape index: {}]   ;;  %s10071_s6 = inlined_call_operand.vmem [shape: f32[4,64], index: 6, kind: input, shape index: {}]   ;;  %s10072_s7 = inlined_call_operand.vmem [shape: f32[16,16], index: 7, kind: input, shape index: {}]   ;;  %s10073_s8 = inlined_call_operand.vmem [shape: f32[32,64], index: 8, kind: input, shape index: {}]   ;;  %s10074_s9 = inlined_call_operand.vmem [shape: f32[64,128], index: 9, kind: input, shape index: {}]   ;;  %s10075_s10 = inlined_call_operand.vmem [shape: f32[128,256], index: 10, kind: input, shape index: {}]   ;;  %s10076_s11 = inlined_call_operand.vmem [shape: f32[128,128], index: 11, kind: input, shape index: {}]   ;;  %s10077_s12 = inlined_call_operand.vmem [shape: f32[64,64], index: 12, kind: input, shape index: {}]   ;;  %s10078_s13 = inlined_call_operand.vmem [shape: f32[32,32], index: 13, kind: input, shape index: {}]   ;;  %s10079_s14 = inlined_call_operand.vmem [shape: f32[6,2,128], index: 14, kind: input, shape index: {}]   ;;  %s10080_s15 = inlined_call_operand.vmem [shape: f32[256,128], index: 15, kind: output, shape index: {0}]   ;;  %s10081_s16 = inlined_call_operand.hbm [shape: f32[2,4,128], index: 16, kind: output, shape index: {1}]  }
   0x1   :  { %10099 = sst [smem:[#allocation11_spill]] %s10065_s0 }
   0x2   :  { %10100 = sst [smem:[#allocation12_spill]] %s10066_s1 }
   0x3   :  { %10101 = sst [smem:[#allocation13_spill]] %s10068_s3 }
   0x4   :  { %10102 = sst [smem:[#allocation14_spill]] %s10069_s4 }
   0x5   :  { %10103 = sst [smem:[#allocation15_spill]] %s10070_s5 }
   0x6   :  { %22 = vsyncpa [#allocation3], 0 }
   0x7   :  { %24 = vsyncpa [#allocation3 + $0x1], 0  ;;  %s7099_s21 = smov 0   ;;  %s7101_s22 = smov 0  }
   0x8   :  { %s7103_s23 = smov 0   ;;  %s7105_s24 = smov 0  }
   0x9 LB: > { %10104 = sst [smem:[#allocation5_spill]] %s6996_s21  ;;  %s7120_s25 = sadd.s32 4294967295, %s7008_s24   ;;  %s7008_s24 = sphi %s7105_s24, %s10128_s24   ;;  %s7004_s23 = sphi %s7103_s23, %s10133_s23   ;;  %s7000_s22 = sphi %s7101_s22, %s10132_s22   ;;  %s6996_s21 = sphi %s7099_s21, %s10131_s21  }
   0xa   : > { %10105 = sst [smem:[#allocation6_spill]] %s7004_s23  ;;  %s5227_s26 = sadd.s32 4294967294, %s7008_s24  }
   0xb   : > { %10106 = sst [smem:[#allocation7_spill]] %s7008_s24  ;;  %s7124_s27 = sadd.s32 1, %s7008_s24  }
   0xc   : > { %10107 = sst [smem:[#allocation8_spill]] %s7124_s27  ;;  %s388_s28 = sadd.s32 1, %s7004_s23 }
   0xd   : > { %s385_s29 = ssub.s32 %s7008_s24, %s7124_s27  ;;  %p398_p0 = scmp.ne.s32.totalorder %s7004_s23, %s7000_s22 }
   0xe   : > { %p386_p1 = scmp.eq.s32.totalorder %s385_s29, 0  ;;  %p399_p2 = scmp.eq.s32.totalorder %s7120_s25, 1 }
   0xf   : > { %p404_p3 = scmp.ne.s32.totalorder %s7000_s22, %s6996_s21  ;;  %p405_p4 = scmp.eq.s32.totalorder %s5227_s26, 1 }
  0x10   : > { %s7135_s30 = scalar_select %p386_p1, %s7004_s23, %s388_s28  }
  0x11   : > { %p7137_p5 = por %p399_p2, %p398_p0  ;;  %p7141_p6 = por %p405_p4, %p404_p3 }
  0x12   : > { %10108 = sst [smem:[#allocation9_spill]] %s7135_s30  ;;  %p5230_p7 = scmp.ge.s32.totalorder %s7008_s24, 1 }
  0x13   : > { %s10110_s17 = scalar_select %p7141_p6, 1, 0 }
  0x14   : > { %p480_p8 = scmp.lt.s32.totalorder %s7008_s24, 3 }
  0x15   : > { %10111 = sst [smem:[#allocation10_spill]] %s10110_s17 }
  0x16   : > { %p481_p9 = pnand %p5230_p7, %p480_p8 }
  0x17   : > { %s5232_s28 = sshll.u32 (!%p481_p9), %s7120_s25, 4  ;;  %s10113_s20 = sld [smem:[#allocation11_spill]] (!%p481_p9) }
  0x18   : > { %484 = sbr.rel (%p481_p9) target bundleno = 6579 (0x19b3), region = 80  ;;  %p7225_p10 = scmp.lt.s32.totalorder (!%p481_p9), %s5232_s28, 31 }
  0x19   : > { %s10114_s3 = sld [smem:[#allocation13_spill]] (!%p481_p9)  ;;  %s10089_s23 = smov (!%p481_p9), 8  }
  0x1a   : > { %s10095_s21 = smov (!%p481_p9), 16   ;;  %s10093_s29 = smov (!%p481_p9), 32  }
  0x1b   : > { %s10091_s18 = smov (!%p481_p9), 64   ;;  %s5234_s19 = sshll.u32 (!%p481_p9), %s7120_s25, 3 }
  0x1c   : > { %p547_p11 = scmp.lt.s32.totalorder (!%p481_p9), %s5234_s19, 15  ;;  %s10115_s1 = sld [smem:[#allocation12_spill]] (!%p481_p9) }
  0x1d   : > { %v5352_v0 = vld [vmem:[%s10067_s2 + $0xe0] sm:$0xf]  ;;  %v6561_v1 = vld [vmem:[%s10067_s2 + $0xec] sm:$0xf0]  ;;  %v5360_v2 = vld [vmem:[%s10067_s2 + $0xe8] sm:$0xf] }
  0x1e   : > { %v5353_v3 = vor.u32 %v6561_v1, %v5352_v0  ;;  %v6562_v4 = vld [vmem:[%s10067_s2 + $0xf4] sm:$0xf0]  ;;  %v5336_v5 = vld [vmem:[%s10067_s2 + $0xc0] sm:$0xf]  ;;  %v6557_v6 = vld [vmem:[%s10067_s2 + $0xcc] sm:$0xf0] }
  0x1f   : > { %v5361_v7 = vor.u32 %v6562_v4, %v5360_v2  ;;  %v5344_v8 = vld [vmem:[%s10067_s2 + $0xc8] sm:$0xf]  ;;  %v6558_v9 = vld [vmem:[%s10067_s2 + $0xd4] sm:$0xf0]  ;;  %v5337_v10 = vor.u32 %v6557_v6, %v5336_v5  ;;  %v5320_v12 = vld [vmem:[%s10067_s2 + $0xa0] sm:$0xf] }
  0x20   : > { %774 = vmatpush.bf16.msra.mxu0 %v5353_v3  ;;  %v5345_v11 = vor.u32 %v6558_v9, %v5344_v8  ;;  %v6553_v13 = vld [vmem:[%s10067_s2 + $0xac] sm:$0xf0]  ;;  %v5328_v14 = vld [vmem:[%s10067_s2 + $0xa8] sm:$0xf]  ;;  %v6554_v15 = vld [vmem:[%s10067_s2 + $0xb4] sm:$0xf0] }
  0x21   : > { %6795 = vmatpush.bf16.msra.mxu3 %v5361_v7  ;;  %872 = vmatpush.bf16.msra.mxu2 %v5361_v7  ;;  %v5321_v16 = vor.u32 %v6553_v13, %v5320_v12  ;;  %v5329_v17 = vor.u32 %v6554_v15, %v5328_v14  ;;  %v5304_v18 = vld [vmem:[%s10067_s2 + $0x80] sm:$0xf]  ;;  %v6549_v19 = vld [vmem:[%s10067_s2 + $0x8c] sm:$0xf0]  ;;  %v5312_v20 = vld [vmem:[%s10067_s2 + $0x88] sm:$0xf] }
  0x22   : > { %v6550_v21 = vld [vmem:[%s10067_s2 + $0x94] sm:$0xf0]  ;;  %v6559_v22 = vld [vmem:[%s10067_s2 + $0xe4] sm:$0xf]  ;;  %v5354_v23 = vld [vmem:[%s10067_s2 + $0xf0] sm:$0xf0]  ;;  %v5305_v26 = vor.u32 %v6549_v19, %v5304_v18 }
  0x23   : > { %v5288_v24 = vld [vmem:[%s10067_s2 + $0x60] sm:$0xf]  ;;  %v7204_v25 = vor.u32 %v6559_v22, %v5354_v23  ;;  %v6545_v27 = vld [vmem:[%s10067_s2 + $0x6c] sm:$0xf0]  ;;  %v6555_v28 = vld [vmem:[%s10067_s2 + $0xc4] sm:$0xf]  ;;  %v5313_v30 = vor.u32 %v6550_v21, %v5312_v20 }
  0x24   : > { %775 = vmatpush.bf16.msra.mxu0 %v5337_v10  ;;  %v5338_v29 = vld [vmem:[%s10067_s2 + $0xd0] sm:$0xf0]  ;;  %v5296_v31 = vld [vmem:[%s10067_s2 + $0x68] sm:$0xf]  ;;  %v6546_v32 = vld [vmem:[%s10067_s2 + $0x74] sm:$0xf0]  ;;  %v5289_v36 = vor.u32 %v6545_v27, %v5288_v24 }
  0x25   : > { %6796 = vmatpush.bf16.msra.mxu3 %v5345_v11  ;;  %873 = vmatpush.bf16.msra.mxu2 %v5345_v11  ;;  %v7222_v33 = vor.u32 %v6555_v28, %v5338_v29  ;;  %v6551_v34 = vld [vmem:[%s10067_s2 + $0xa4] sm:$0xf]  ;;  %v5322_v35 = vld [vmem:[%s10067_s2 + $0xb0] sm:$0xf0]  ;;  %v5272_v37 = vld [vmem:[%s10067_s2 + $0x40] sm:$0xf]  ;;  %v5297_v40 = vor.u32 %v6546_v32, %v5296_v31 }
  0x26   : > { %6787 = vmatpush.bf16.msra.mxu1 %v7204_v25  ;;  %v6541_v38 = vld [vmem:[%s10067_s2 + $0x4c] sm:$0xf0]  ;;  %v5280_v39 = vld [vmem:[%s10067_s2 + $0x48] sm:$0xf]  ;;  %v6542_v41 = vld [vmem:[%s10067_s2 + $0x54] sm:$0xf0]  ;;  %v7248_v42 = vor.u32 %v6551_v34, %v5322_v35 }
  0x27   : > { %v6547_v43 = vld [vmem:[%s10067_s2 + $0x84] sm:$0xf]  ;;  %v5306_v44 = vld [vmem:[%s10067_s2 + $0x90] sm:$0xf0]  ;;  %s10135_s28 = smov (!%p7225_p10, %s5232_s28), 31  ;;  %v5273_v45 = vor.u32 %v6541_v38, %v5272_v37  ;;  %v5281_v47 = vor.u32 %v6542_v41, %v5280_v39  ;;  %s10137_s19 = smov (!%p547_p11, %s5234_s19), 15 }
  0x28   : > { %776 = vmatpush.bf16.msra.mxu0 %v5321_v16  ;;  %v5256_v46 = vld [vmem:[%s10067_s2 + $0x20] sm:$0xf]  ;;  %v6537_v48 = vld [vmem:[%s10067_s2 + $0x2c] sm:$0xf0]  ;;  %v5264_v49 = vld [vmem:[%s10067_s2 + $0x28] sm:$0xf]  ;;  %v7273_v51 = vor.u32 %v6547_v43, %v5306_v44 }
  0x29   : > { %6797 = vmatpush.bf16.msra.mxu3 %v5329_v17  ;;  %874 = vmatpush.bf16.msra.mxu2 %v5329_v17  ;;  %v6538_v50 = vld [vmem:[%s10067_s2 + $0x34] sm:$0xf0]  ;;  %s10088_s17 = sshll.u32 %s10135_s28, 3  ;;  %v6543_v52 = vld [vmem:[%s10067_s2 + $0x64] sm:$0xf]  ;;  %v5257_v56 = vor.u32 %v6537_v48, %v5256_v46  ;;  %s5235_s27 = sshll.u32 %s10137_s19, 3 }
  0x2a   : > { %6788 = vmatpush.bf16.msra.mxu1 %v7222_v33  ;;  %v5290_v53 = vld [vmem:[%s10067_s2 + $0x70] sm:$0xf0]  ;;  %v5240_v54 = vld [vmem:[%s10067_s2] sm:$0xf]  ;;  %v6533_v55 = vld [vmem:[%s10067_s2 + $0xc] sm:$0xf0]  ;;  %v5265_v57 = vor.u32 %v6538_v50, %v5264_v49  ;;  %s7299_s26 = scalar_lea.vmem %s10113_s20, %s10088_s17 }
  0x2b   : > { %v5248_v58 = vld [vmem:[%s10067_s2 + $0x8] sm:$0xf]  ;;  %v6534_v59 = vld [vmem:[%s10067_s2 + $0x14] sm:$0xf0]  ;;  %v5293_v60 = vor.u32 %v6543_v52, %v5290_v53  ;;  %v6539_v61 = vld [vmem:[%s10067_s2 + $0x44] sm:$0xf]  ;;  %v5241_v63 = vor.u32 %v6533_v55, %v5240_v54 }
  0x2c   : > { %777 = vmatpush.bf16.msra.mxu0 %v5305_v26  ;;  %v5274_v62 = vld [vmem:[%s10067_s2 + $0x50] sm:$0xf0]  ;;  %v558_v0 = vld [vmem:[%s7299_s26] sm:$0xff]  ;;  %v559_v1 = vld [vmem:[%s7299_s26 + $0x8] sm:$0xff]  ;;  %v5249_v2 = vor.u32 %v6534_v59, %v5248_v58  ;;  %s10116_s4 = sld [smem:[#allocation14_spill]]  ;;  %s10117_s20 = smov 16  }
  0x2d   : > { %6798 = vmatpush.bf16.msra.mxu3 %v5313_v30  ;;  %875 = vmatpush.bf16.msra.mxu2 %v5313_v30  ;;  %v566_v3 = vld [vmem:[%s7299_s26 + $0x40] sm:$0xff]  ;;  %v567_v4 = vld [vmem:[%s7299_s26 + $0x48] sm:$0xff]  ;;  %v5277_v5 = vor.u32 %v6539_v61, %v5274_v62  ;;  %v5258_v7 = vld [vmem:[%s10067_s2 + $0x30] sm:$0xf0]  ;;  %v7318_v8 = vpack.c.bf16 %v559_v1, %v558_v0  ;;  %s10119_s30 = smov 64   ;;  %s10120_s5 = sld [smem:[#allocation15_spill]] }
  0x2e   : > { %6789 = vmatpush.bf16.msra.mxu1 %v7248_v42  ;;  %v6535_v6 = vld [vmem:[%s10067_s2 + $0x24] sm:$0xf]  ;;  %v7320_v9 = vpack.c.bf16 %v567_v4, %v566_v3  ;;  %v5242_v12 = vld [vmem:[%s10067_s2 + $0x10] sm:$0xf0]  ;;  %v6560_v13 = vld [vmem:[%s10067_s2 + $0xec] sm:$0xf] }
  0x2f   : > { %v5261_v10 = vor.u32 %v6535_v6, %v5258_v7  ;;  %v6531_v11 = vld [vmem:[%s10067_s2 + $0x4] sm:$0xf]  ;;  %v5362_v14 = vld [vmem:[%s10067_s2 + $0xf8] sm:$0xf0]  ;;  %v6556_v15 = vld [vmem:[%s10067_s2 + $0xcc] sm:$0xf] }
  0x30   : > { %778 = vmatpush.bf16.msra.mxu0 %v5289_v36  ;;  %v5245_v16 = vor.u32 %v6531_v11, %v5242_v12  ;;  %v562_v17 = vld [vmem:[%s7299_s26 + $0x20] sm:$0xff]  ;;  %v563_v18 = vld [vmem:[%s7299_s26 + $0x28] sm:$0xff]  ;;  %v5365_v19 = vor.u32 %v6560_v13, %v5362_v14  ;;  %v5346_v20 = vld [vmem:[%s10067_s2 + $0xd8] sm:$0xf0] }
  0x31   : > { %6799 = vmatpush.bf16.msra.mxu3 %v5297_v40  ;;  %876 = vmatpush.bf16.msra.mxu2 %v5297_v40  ;;  %v5349_v21 = vor.u32 %v6556_v15, %v5346_v20  ;;  %v7347_v22 = vpack.c.bf16 %v563_v18, %v562_v17  ;;  %v6552_v23 = vld [vmem:[%s10067_s2 + $0xac] sm:$0xf]  ;;  %v5330_v24 = vld [vmem:[%s10067_s2 + $0xb8] sm:$0xf0]  ;;  %v568_v30 = vld [vmem:[%s7299_s26 + $0x50] sm:$0xff] }
  0x32   : > { %6790 = vmatpush.bf16.msra.mxu1 %v7273_v51  ;;  %v5333_v26 = vor.u32 %v6552_v23, %v5330_v24  ;;  %v561_v27 = vld [vmem:[%s7299_s26 + $0x18] sm:$0xff]  ;;  %v6548_v28 = vld [vmem:[%s10067_s2 + $0x8c] sm:$0xf]  ;;  %v564_v38 = vld [vmem:[%s7299_s26 + $0x30] sm:$0xff] }
  0x33   : > { %v5314_v29 = vld [vmem:[%s10067_s2 + $0x98] sm:$0xf0]  ;;  %v6544_v35 = vld [vmem:[%s10067_s2 + $0x6c] sm:$0xf]  ;;  %v570_v49 = vld [vmem:[%s7299_s26 + $0x60] sm:$0xff] }
  0x34   : > { %779 = vmatpush.bf16.msra.mxu0 %v5273_v45  ;;  %v569_v31 = vld [vmem:[%s7299_s26 + $0x58] sm:$0xff]  ;;  %v6540_v37 = vld [vmem:[%s10067_s2 + $0x4c] sm:$0xf]  ;;  %v572_v53 = vld [vmem:[%s7299_s26 + $0x70] sm:$0xff] }
  0x35   : > { %6800 = vmatpush.bf16.msra.mxu3 %v5281_v47  ;;  %877 = vmatpush.bf16.msra.mxu2 %v5281_v47  ;;  %v579_v34 = vpack.c.bf16 %v569_v31, %v568_v30  ;;  %v5298_v36 = vld [vmem:[%s10067_s2 + $0x78] sm:$0xf0]  ;;  %v6536_v44 = vld [vmem:[%s10067_s2 + $0x2c] sm:$0xf] }
  0x36   : > { %6791 = vmatpush.bf16.msra.mxu1 %v5293_v60  ;;  %v565_v39 = vld [vmem:[%s7299_s26 + $0x38] sm:$0xff]  ;;  %v5301_v40 = vor.u32 %v6544_v35, %v5298_v36  ;;  %v6532_v47 = vld [vmem:[%s10067_s2 + $0xc] sm:$0xf] }
  0x37   : > { %v5282_v41 = vld [vmem:[%s10067_s2 + $0x58] sm:$0xf0]  ;;  %v577_v43 = vpack.c.bf16 %v565_v39, %v564_v38  ;;  %v571_v50 = vld [vmem:[%s7299_s26 + $0x68] sm:$0xff] }
  0x38   : > { %780 = vmatpush.bf16.msra.mxu0 %v5257_v56  ;;  %v5266_v45 = vld [vmem:[%s10067_s2 + $0x38] sm:$0xf0]  ;;  %v580_v52 = vpack.c.bf16 %v571_v50, %v570_v49 }
  0x39   : > { %6801 = vmatpush.bf16.msra.mxu3 %v5265_v57  ;;  %878 = vmatpush.bf16.msra.mxu2 %v5265_v57  ;;  %v5269_v46 = vor.u32 %v6536_v44, %v5266_v45  ;;  %v5250_v48 = vld [vmem:[%s10067_s2 + $0x18] sm:$0xf0] }
  0x3a   : > { %6792 = vmatpush.bf16.msra.mxu1 %v5277_v5  ;;  %v573_v54 = vld [vmem:[%s7299_s26 + $0x78] sm:$0xff] }
  0x3b   : > { %v581_v55 = vpack.c.bf16 %v573_v54, %v572_v53 }
  0x3c   : > { %781 = vmatpush.bf16.msra.mxu0 %v5241_v63 }
  0x3d   : > { %6802 = vmatpush.bf16.msra.mxu3 %v5249_v2  ;;  %879 = vmatpush.bf16.msra.mxu2 %v5249_v2 }
  0x3e   : > { %6793 = vmatpush.bf16.msra.mxu1 %v5261_v10 }
  0x3f   : > { %782 = vmatmul.bf16.vlgmr.msra.gmra.mxu0 %v7318_v8 }
  0x40   : > { %823 = vmatpush.bf16.msrb.mxu0 %v7204_v25  ;;  %900 = vmatmul.bf16.vlgmr.msra.gmra.mxu3 %v7320_v9  ;;  %v560_v25 = vld [vmem:[%s7299_s26 + $0x10] sm:$0xff] }
  0x41   : > { %880 = vmatmul.bf16.vlgmr.msra.gmra.mxu2 %v7318_v8  ;;  %921 = vmatpush.bf16.msrb.mxu3 %v5365_v19  ;;  %v7368_v32 = vpack.c.bf16 %v561_v27, %v560_v25 }
  0x42   : > { %6794 = vmatpush.bf16.msra.mxu1 %v5245_v16 }
  0x44   : > { %824 = vmatpush.bf16.msrb.mxu0 %v7222_v33  ;;  %v5317_v33 = vor.u32 %v6548_v28, %v5314_v29 }
  0x45   : > { %922 = vmatpush.bf16.msrb.mxu3 %v5349_v21  ;;  %841 = vmatmul.bf16.vlgmr.msra.gmra.mxu1 %v7347_v22 }
  0x48   : > { %825 = vmatpush.bf16.msrb.mxu0 %v7248_v42  ;;  %v5285_v42 = vor.u32 %v6540_v37, %v5282_v41 }
  0x49   : > { %923 = vmatpush.bf16.msrb.mxu3 %v5333_v26 }
  0x4c   : > { %826 = vmatpush.bf16.msrb.mxu0 %v7273_v51  ;;  %v5253_v51 = vor.u32 %v6532_v47, %v5250_v48 }
  0x4d   : > { %924 = vmatpush.bf16.msrb.mxu3 %v5317_v33 }
  0x4f   : > { %787 = vmatmul.bf16.gmra.mxu0 %v7368_v32 }
  0x50   : > { %827 = vmatpush.bf16.msrb.mxu0 %v5293_v60  ;;  %905 = vmatmul.bf16.gmra.mxu3 %v579_v34 }
  0x51   : > { %885 = vmatmul.bf16.gmra.mxu2 %v7368_v32  ;;  %925 = vmatpush.bf16.msrb.mxu3 %v5301_v40 }
  0x54   : > { %828 = vmatpush.bf16.msrb.mxu0 %v5277_v5 }
  0x55   : > { %926 = vmatpush.bf16.msrb.mxu3 %v5285_v42  ;;  %846 = vmatmul.bf16.gmra.mxu1 %v577_v43 }
  0x58   : > { %829 = vmatpush.bf16.msrb.mxu0 %v5261_v10 }
  0x59   : > { %927 = vmatpush.bf16.msrb.mxu3 %v5269_v46 }
  0x5c   : > { %830 = vmatpush.bf16.msrb.mxu0 %v5245_v16 }
  0x5d   : > { %928 = vmatpush.bf16.msrb.mxu3 %v5253_v51 }
  0x5f   : > { %792 = vmatmul.bf16.gmra.mxu0 %v7347_v22 }
  0x60   : > { %910 = vmatmul.bf16.gmra.mxu3 %v580_v52 }
  0x61   : > { %890 = vmatmul.bf16.gmra.mxu2 %v7347_v22 }
  0x65   : > { %851 = vmatmul.bf16.gmra.mxu1 %v7320_v9 }
  0x6f   : > { %797 = vmatmul.bf16.gmra.mxu0 %v577_v43 }
  0x70   : > { %915 = vmatmul.bf16.gmra.mxu3 %v581_v55 }
  0x71   : > { %895 = vmatmul.bf16.gmra.mxu2 %v577_v43 }
  0x75   : > { %856 = vmatmul.bf16.gmra.mxu1 %v579_v34 }
  0x7f   : > { %802 = vmatmul.bf16.gmra.mxu0 %v7320_v9 }
  0x80   : > { %929 = vmatmul.bf16.vlgmr.msrb.gmra.mxu3 %v7318_v8 }
  0x85   : > { %861 = vmatmul.bf16.gmra.mxu1 %v580_v52 }
  0x8f   : > { %807 = vmatmul.bf16.gmra.mxu0 %v579_v34 }
  0x90   : > { %934 = vmatmul.bf16.gmra.mxu3 %v7368_v32 }
  0x95   : > { %866 = vmatmul.bf16.gmra.mxu1 %v581_v55 }
  0x9f   : > { %812 = vmatmul.bf16.gmra.mxu0 %v580_v52 }
  0xa0   : > { %939 = vmatmul.bf16.gmra.mxu3 %v7347_v22 }
  0xaf   : > { %817 = vmatmul.bf16.gmra.mxu0 %v581_v55 }
  0xb0   : > { %944 = vmatmul.bf16.gmra.mxu3 %v577_v43 }
  0xbc   : > { %v7409_v56 = vpop.f32.mrf.mxu0 }
  0xbf   : > { %831 = vmatmul.bf16.vlgmr.msrb.gmra.mxu0 %v7318_v8 }
  0xc0   : > { %949 = vmatmul.bf16.gmra.mxu3 %v7320_v9 }
  0xc2   : > { %v7415_v59 = vpop.f32.mrf.mxu1 }
  0xc3   : > { %v901_v57 = vpop.f32.mrf.mxu3 }
  0xc4   : > { %v7413_v58 = vpop.f32.mrf.mxu0  ;;  %v881_v12 = vpop.f32.mrf.mxu2 }
  0xca   : > { %v7419_v62 = vpop.f32.mrf.mxu1 }
  0xcb   : > { %v903_v60 = vpop.f32.mrf.mxu3 }
  0xcc   : > { %v7417_v61 = vpop.f32.mrf.mxu0  ;;  %v883_v16 = vpop.f32.mrf.mxu2 }
  0xcf   : > { %836 = vmatmul.bf16.gmra.mxu0 %v7368_v32 }
  0xd0   : > { %954 = vmatmul.bf16.gmra.mxu3 %v579_v34 }
  0xd2   : > { %v847_v1 = vpop.f32.mrf.mxu1 }
  0xd3   : > { %v906_v63 = vpop.f32.mrf.mxu3 }
  0xd4   : > { %v7422_v0 = vpop.f32.mrf.mxu0  ;;  %v886_v20 = vpop.f32.mrf.mxu2 }
  0xda   : > { %v849_v4 = vpop.f32.mrf.mxu1 }
  0xdb   : > { %v908_v2 = vpop.f32.mrf.mxu3 }
  0xdc   : > { %v7424_v3 = vpop.f32.mrf.mxu0  ;;  %v888_v24 = vpop.f32.mrf.mxu2 }
  0xe0   : > { %959 = vmatmul.bf16.gmra.mxu3 %v580_v52 }
  0xe2   : > { %v852_v7 = vpop.f32.mrf.mxu1 }
  0xe3   : > { %v911_v5 = vpop.f32.mrf.mxu3 }
  0xe4   : > { %v7426_v6 = vpop.f32.mrf.mxu0  ;;  %v891_v28 = vpop.f32.mrf.mxu2 }
  0xea   : > { %v854_v10 = vpop.f32.mrf.mxu1 }
  0xeb   : > { %v913_v8 = vpop.f32.mrf.mxu3 }
  0xec   : > { %v7428_v9 = vpop.f32.mrf.mxu0  ;;  %v893_v32 = vpop.f32.mrf.mxu2 }
  0xf0   : > { %964 = vmatmul.bf16.gmra.mxu3 %v581_v55  ;;  %v972_v55 = vld [vmem:[%s10114_s3 + $0x10] sm:$0xff] }
  0xf2   : > { %v857_v14 = vpop.f32.mrf.mxu1 }
  0xf3   : > { %v916_v11 = vpop.f32.mrf.mxu3 }
  0xf4   : > { %v7430_v13 = vpop.f32.mrf.mxu0  ;;  %v896_v36 = vpop.f32.mrf.mxu2 }
  0xfa   : > { %v859_v18 = vpop.f32.mrf.mxu1 }
  0xfb   : > { %v918_v15 = vpop.f32.mrf.mxu3 }
  0xfc   : > { %1084 = vmatpush.msrb.mxu2 %v918_v15  ;;  %v803_v17 = vpop.f32.mrf.mxu0  ;;  %v898_v39 = vpop.f32.mrf.mxu2  ;;  %v995_v15 = vld [vmem:[%s10114_s3 + $0xc8] sm:$0xff] }
  0xfe   : > { %1085 = vmatpush.msrb.mxu2 %v916_v11  ;;  %v991_v11 = vld [vmem:[%s10114_s3 + $0xa8] sm:$0xff] }
 0x100   : > { %1086 = vmatpush.msrb.mxu2 %v913_v8  ;;  %v992_v8 = vld [vmem:[%s10114_s3 + $0xb0] sm:$0xff] }
 0x102   : > { %1087 = vmatpush.msrb.mxu2 %v911_v5  ;;  %v862_v22 = vpop.f32.mrf.mxu1  ;;  %v973_v5 = vld [vmem:[%s10114_s3 + $0x18] sm:$0xff] }
 0x103   : > { %v7432_v19 = vpop.f32.mrf.mxu3 }
 0x104   : > { %1088 = vmatpush.msrb.mxu2 %v908_v2  ;;  %v805_v21 = vpop.f32.mrf.mxu0  ;;  %v982_v2 = vld [vmem:[%s10114_s3 + $0x60] sm:$0xff] }
 0x106   : > { %1089 = vmatpush.msrb.mxu2 %v906_v63  ;;  %v978_v63 = vld [vmem:[%s10114_s3 + $0x40] sm:$0xff] }
 0x108   : > { %1090 = vmatpush.msrb.mxu2 %v903_v60  ;;  %v974_v60 = vld [vmem:[%s10114_s3 + $0x20] sm:$0xff] }
 0x10a   : > { %1091 = vmatpush.msrb.mxu2 %v901_v57  ;;  %v864_v26 = vpop.f32.mrf.mxu1 }
 0x10b   : > { %v7434_v23 = vpop.f32.mrf.mxu3 }
 0x10c   : > { %v808_v25 = vpop.f32.mrf.mxu0  ;;  %1092 = vmatpush.msrb.mxu2 %v898_v39 }
 0x10e   : > { %1093 = vmatpush.msrb.mxu2 %v896_v36 }
 0x110   : > { %1094 = vmatpush.msrb.mxu2 %v893_v32 }
 0x112   : > { %v867_v30 = vpop.f32.mrf.mxu1  ;;  %1095 = vmatpush.msrb.mxu2 %v891_v28 }
 0x113   : > { %v7436_v27 = vpop.f32.mrf.mxu3 }
 0x114   : > { %v810_v29 = vpop.f32.mrf.mxu0  ;;  %1096 = vmatpush.msrb.mxu2 %v888_v24 }
 0x116   : > { %1097 = vmatpush.msrb.mxu2 %v886_v20  ;;  %v989_v20 = vld [vmem:[%s10114_s3 + $0x98] sm:$0xff] }
 0x118   : > { %1098 = vmatpush.msrb.mxu2 %v883_v16  ;;  %v1000_v16 = vld [vmem:[%s10114_s3 + $0xf0] sm:$0xff] }
 0x11a   : > { %v869_v34 = vpop.f32.mrf.mxu1  ;;  %1099 = vmatpush.msrb.mxu2 %v881_v12  ;;  %v996_v12 = vld [vmem:[%s10114_s3 + $0xd0] sm:$0xff] }
 0x11b   : > { %v7438_v31 = vpop.f32.mrf.mxu3  ;;  %1043 = vmatpush.msrb.mxu1 %v869_v34  ;;  %1100 = vmatmul.f32.vlgmr.msrb.gmra.mxu2 %v972_v55 }
 0x11c   : > { %v813_v33 = vpop.f32.mrf.mxu0 }
 0x11d   : > { %1044 = vmatpush.msrb.mxu1 %v867_v30 }
 0x11f   : > { %1045 = vmatpush.msrb.mxu1 %v864_v26 }
 0x121   : > { %1046 = vmatpush.msrb.mxu1 %v862_v22  ;;  %v997_v22 = vld [vmem:[%s10114_s3 + $0xd8] sm:$0xff] }
 0x123   : > { %v7440_v35 = vpop.f32.mrf.mxu3  ;;  %1047 = vmatpush.msrb.mxu1 %v859_v18  ;;  %v998_v18 = vld [vmem:[%s10114_s3 + $0xe0] sm:$0xff] }
 0x124   : > { %v815_v37 = vpop.f32.mrf.mxu0 }
 0x125   : > { %1048 = vmatpush.msrb.mxu1 %v857_v14  ;;  %v994_v14 = vld [vmem:[%s10114_s3 + $0xc0] sm:$0xff] }
 0x127   : > { %1049 = vmatpush.msrb.mxu1 %v854_v10  ;;  %v990_v10 = vld [vmem:[%s10114_s3 + $0xa0] sm:$0xff] }
 0x129   : > { %1050 = vmatpush.msrb.mxu1 %v852_v7  ;;  %v987_v7 = vld [vmem:[%s10114_s3 + $0x88] sm:$0xff] }
 0x12b   : > { %v7442_v38 = vpop.f32.mrf.mxu3  ;;  %1051 = vmatpush.msrb.mxu1 %v849_v4  ;;  %v988_v4 = vld [vmem:[%s10114_s3 + $0x90] sm:$0xff] }
 0x12c   : > { %v818_v40 = vpop.f32.mrf.mxu0 }
 0x12d   : > { %1052 = vmatpush.msrb.mxu1 %v847_v1  ;;  %v984_v1 = vld [vmem:[%s10114_s3 + $0x70] sm:$0xff] }
 0x12f   : > { %1053 = vmatpush.msrb.mxu1 %v7419_v62  ;;  %v980_v62 = vld [vmem:[%s10114_s3 + $0x50] sm:$0xff] }
 0x131   : > { %1054 = vmatpush.msrb.mxu1 %v7415_v59  ;;  %v976_v59 = vld [vmem:[%s10114_s3 + $0x30] sm:$0xff] }
 0x132   : > { %1103 = vmatmul.f32.gmra.mxu2 %v976_v59 }
 0x133   : > { %v7445_v41 = vpop.f32.mrf.mxu3 }
 0x134   : > { %v820_v42 = vpop.f32.mrf.mxu0 }
 0x135   : > { %1002 = vmatpush.msra.mxu0 %v820_v42 }
 0x137   : > { %1003 = vmatpush.msra.mxu0 %v818_v40 }
 0x139   : > { %1004 = vmatpush.msra.mxu0 %v815_v37 }
 0x13a   : > { %1106 = vmatmul.f32.gmra.mxu2 %v980_v62 }
 0x13b   : > { %v947_v43 = vpop.f32.mrf.mxu3  ;;  %1005 = vmatpush.msra.mxu0 %v813_v33 }
 0x13c   : > { %v832_v45 = vpop.f32.mrf.mxu0 }
 0x13d   : > { %1006 = vmatpush.msra.mxu0 %v810_v29 }
 0x13f   : > { %1007 = vmatpush.msra.mxu0 %v808_v25 }
 0x141   : > { %1008 = vmatpush.msra.mxu0 %v805_v21  ;;  %v993_v21 = vld [vmem:[%s10114_s3 + $0xb8] sm:$0xff] }
 0x142   : > { %1109 = vmatmul.f32.gmra.mxu2 %v984_v1 }
 0x143   : > { %v950_v44 = vpop.f32.mrf.mxu3  ;;  %1009 = vmatpush.msra.mxu0 %v803_v17  ;;  %v985_v17 = vld [vmem:[%s10114_s3 + $0x78] sm:$0xff] }
 0x144   : > { %v834_v47 = vpop.f32.mrf.mxu0 }
 0x145   : > { %1010 = vmatpush.msra.mxu0 %v7430_v13  ;;  %v981_v13 = vld [vmem:[%s10114_s3 + $0x58] sm:$0xff] }
 0x147   : > { %1011 = vmatpush.msra.mxu0 %v7428_v9  ;;  %v977_v9 = vld [vmem:[%s10114_s3 + $0x38] sm:$0xff] }
 0x149   : > { %1012 = vmatpush.msra.mxu0 %v7426_v6  ;;  %v986_v6 = vld [vmem:[%s10114_s3 + $0x80] sm:$0xff] }
 0x14a   : > { %1112 = vmatmul.f32.gmra.mxu2 %v988_v4 }
 0x14b   : > { %v952_v46 = vpop.f32.mrf.mxu3  ;;  %1013 = vmatpush.msra.mxu0 %v7424_v3  ;;  %v983_v3 = vld [vmem:[%s10114_s3 + $0x68] sm:$0xff] }
 0x14c   : > { %v837_v49 = vpop.f32.mrf.mxu0 }
 0x14d   : > { %1014 = vmatpush.msra.mxu0 %v7422_v0  ;;  %v979_v0 = vld [vmem:[%s10114_s3 + $0x48] sm:$0xff] }
 0x14f   : > { %1015 = vmatpush.msra.mxu0 %v7417_v61  ;;  %v975_v61 = vld [vmem:[%s10114_s3 + $0x28] sm:$0xff] }
 0x151   : > { %1016 = vmatpush.msra.mxu0 %v7413_v58  ;;  %v971_v58 = vld [vmem:[%s10114_s3 + $0x8] sm:$0xff] }
 0x152   : > { %1115 = vmatmul.f32.gmra.mxu2 %v992_v8 }
 0x153   : > { %v955_v48 = vpop.f32.mrf.mxu3  ;;  %1017 = vmatpush.msra.mxu0 %v7409_v56  ;;  %v970_v56 = vld [vmem:[%s10114_s3] sm:$0xff] }
 0x154   : > { %v839_v51 = vpop.f32.mrf.mxu0  ;;  %1018 = vmatmul.f32.vlgmr.msra.gmra.mxu0 %v970_v56 }
 0x155   : > { %1055 = vmatpush.msrb.mxu1 %v839_v51 }
 0x157   : > { %1056 = vmatpush.msrb.mxu1 %v837_v49 }
 0x159   : > { %1057 = vmatpush.msrb.mxu1 %v834_v47 }
 0x15a   : > { %1118 = vmatmul.f32.gmra.mxu2 %v996_v12 }
 0x15b   : > { %v957_v50 = vpop.f32.mrf.mxu3  ;;  %1058 = vmatpush.msrb.mxu1 %v832_v45 }
 0x15c   : > { %1059 = vmatmul.f32.vlgmr.msrb.gmra.mxu1 %v971_v58  ;;  %1021 = vmatmul.f32.gmra.mxu0 %v974_v60 }
 0x162   : > { %1121 = vmatmul.f32.gmra.mxu2 %v1000_v16 }
 0x163   : > { %v960_v52 = vpop.f32.mrf.mxu3 }
 0x164   : > { %1062 = vmatmul.f32.gmra.mxu1 %v975_v61  ;;  %1024 = vmatmul.f32.gmra.mxu0 %v978_v63 }
 0x16b   : > { %v962_v53 = vpop.f32.mrf.mxu3 }
 0x16c   : > { %1065 = vmatmul.f32.gmra.mxu1 %v979_v0  ;;  %1027 = vmatmul.f32.gmra.mxu0 %v982_v2 }
 0x173   : > { %v965_v54 = vpop.f32.mrf.mxu3 }
 0x174   : > { %1068 = vmatmul.f32.gmra.mxu1 %v983_v3  ;;  %1030 = vmatmul.f32.gmra.mxu0 %v986_v6 }
 0x17b   : > { %v967_v57 = vpop.f32.mrf.mxu3 }
 0x17c   : > { %1125 = vmatpush.msra.mxu3 %v967_v57  ;;  %1071 = vmatmul.f32.gmra.mxu1 %v987_v7 }
 0x17d   : > { %1033 = vmatmul.f32.gmra.mxu0 %v990_v10 }
 0x17e   : > { %1126 = vmatpush.msra.mxu3 %v965_v54 }
 0x180   : > { %1127 = vmatpush.msra.mxu3 %v962_v53 }
 0x182   : > { %1128 = vmatpush.msra.mxu3 %v960_v52 }
 0x184   : > { %1129 = vmatpush.msra.mxu3 %v957_v50  ;;  %1074 = vmatmul.f32.gmra.mxu1 %v991_v11 }
 0x185   : > { %1036 = vmatmul.f32.gmra.mxu0 %v994_v14 }
 0x186   : > { %1130 = vmatpush.msra.mxu3 %v955_v48 }
 0x188   : > { %1131 = vmatpush.msra.mxu3 %v952_v46 }
 0x18a   : > { %1132 = vmatpush.msra.mxu3 %v950_v44 }
 0x18c   : > { %1133 = vmatpush.msra.mxu3 %v947_v43  ;;  %1077 = vmatmul.f32.gmra.mxu1 %v995_v15 }
 0x18d   : > { %1039 = vmatmul.f32.gmra.mxu0 %v998_v18 }
 0x18e   : > { %1134 = vmatpush.msra.mxu3 %v7445_v41 }
 0x190   : > { %1135 = vmatpush.msra.mxu3 %v7442_v38 }
 0x192   : > { %1136 = vmatpush.msra.mxu3 %v7440_v35 }
 0x194   : > { %1137 = vmatpush.msra.mxu3 %v7438_v31 }
 0x196   : > { %1138 = vmatpush.msra.mxu3 %v7436_v27 }
 0x198   : > { %1139 = vmatpush.msra.mxu3 %v7434_v23  ;;  %v1001_v23 = vld [vmem:[%s10114_s3 + $0xf8] sm:$0xff] }
 0x19a   : > { %1140 = vmatpush.msra.mxu3 %v7432_v19  ;;  %v999_v19 = vld [vmem:[%s10114_s3 + $0xe8] sm:$0xff] }
 0x19b   : > { %1141 = vmatmul.f32.vlgmr.msra.gmra.mxu3 %v973_v5  ;;  %1080 = vmatmul.f32.gmra.mxu1 %v999_v19 }
 0x19e   : > { %v1101_v26 = vpop.f32.mrf.mxu2 }
 0x1a3   : > { %1144 = vmatmul.f32.gmra.mxu3 %v977_v9 }
 0x1ab   : > { %1147 = vmatmul.f32.gmra.mxu3 %v981_v13 }
 0x1b3   : > { %1150 = vmatmul.f32.gmra.mxu3 %v985_v17 }
 0x1b5   : > { %v1104_v29 = vpop.f32.mrf.mxu2 }
 0x1bb   : > { %1153 = vmatmul.f32.gmra.mxu3 %v989_v20 }
 0x1bd   : > { %v1107_v33 = vpop.f32.mrf.mxu2 }
 0x1c3   : > { %1156 = vmatmul.f32.gmra.mxu3 %v993_v21 }
 0x1c5   : > { %v1110_v38 = vpop.f32.mrf.mxu2 }
 0x1cb   : > { %1159 = vmatmul.f32.gmra.mxu3 %v997_v22 }
 0x1cd   : > { %v1113_v46 = vpop.f32.mrf.mxu2 }
 0x1d1   : > { %v1019_v24 = vpop.f32.mrf.mxu0 }
 0x1d3   : > { %1162 = vmatmul.f32.gmra.mxu3 %v1001_v23 }
 0x1d5   : > { %v1116_v55 = vpop.f32.mrf.mxu2 }
 0x1d9   : > { %v1060_v25 = vpop.f32.mrf.mxu1  ;;  %v1022_v27 = vpop.f32.mrf.mxu0 }
 0x1da   : > { %v1061_v63 = vadd.f32 %v1060_v25, %v1019_v24 }
 0x1dc   : > { %v1102_v4 = vadd.f32 %v1101_v26, %v1061_v63 }
 0x1dd   : > { %v1119_v1 = vpop.f32.mrf.mxu2 }
 0x1e1   : > { %v1063_v28 = vpop.f32.mrf.mxu1  ;;  %v1025_v30 = vpop.f32.mrf.mxu0 }
 0x1e2   : > { %v1064_v17 = vadd.f32 %v1063_v28, %v1022_v27 }
 0x1e4   : > { %v1105_v20 = vadd.f32 %v1104_v29, %v1064_v17 }
 0x1e5   : > { %v1122_v13 = vpop.f32.mrf.mxu2 }
 0x1e9   : > { %v1066_v31 = vpop.f32.mrf.mxu1  ;;  %v1028_v34 = vpop.f32.mrf.mxu0 }
 0x1ea   : > { %v1067_v37 = vadd.f32 %v1066_v31, %v1025_v30 }
 0x1ec   : > { %v1108_v39 = vadd.f32 %v1107_v33, %v1067_v37 }
 0x1f1   : > { %v1069_v35 = vpop.f32.mrf.mxu1  ;;  %v1031_v40 = vpop.f32.mrf.mxu0 }
 0x1f2   : > { %v1070_v44 = vadd.f32 %v1069_v35, %v1028_v34 }
 0x1f4   : > { %v1111_v47 = vadd.f32 %v1110_v38, %v1070_v44 }
 0x1f9   : > { %v1072_v42 = vpop.f32.mrf.mxu1 }
 0x1fa   : > { %v1073_v50 = vadd.f32 %v1072_v42, %v1031_v40  ;;  %v1034_v51 = vpop.f32.mrf.mxu0 }
 0x1fc   : > { %v1114_v54 = vadd.f32 %v1113_v46, %v1073_v50 }
 0x201   : > { %v1075_v52 = vpop.f32.mrf.mxu1 }
 0x202   : > { %v1076_v58 = vadd.f32 %v1075_v52, %v1034_v51  ;;  %v1037_v60 = vpop.f32.mrf.mxu0 }
 0x204   : > { %v1117_v62 = vadd.f32 %v1116_v55, %v1076_v58 }
 0x209   : > { %v1078_v61 = vpop.f32.mrf.mxu1 }
 0x20a   : > { %v1079_v3 = vadd.f32 %v1078_v61, %v1037_v60  ;;  %v1040_v7 = vpop.f32.mrf.mxu0 }
 0x20c   : > { %v1120_v6 = vadd.f32 %v1119_v1, %v1079_v3 }
 0x218   : > { %v1081_v8 = vpop.f32.mrf.mxu1 }
 0x219   : > { %v1082_v12 = vadd.f32 %v1081_v8, %v1040_v7 }
 0x21b   : > { %v1123_v16 = vadd.f32 %v1122_v13, %v1082_v12 }
 0x21e   : > { %v1142_v32 = vpop.f32.mrf.mxu3 }
 0x21f   : > { %v7579_v9 = vadd.f32 %v1142_v32, %v1102_v4 }
 0x221   : > { %v1166_v14 = vmul.f32 %v7579_v9, %v7579_v9 }
 0x226   : > { %v1145_v36 = vpop.f32.mrf.mxu3 }
 0x227   : > { %v7598_v22 = vadd.f32 %v1145_v36, %v1105_v20 }
 0x229   : > { %v1167_v23 = vmul.f32 %v7598_v22, %v7598_v22 }
 0x22e   : > { %v1148_v41 = vpop.f32.mrf.mxu3 }
 0x22f   : > { %v7559_v43 = vadd.f32 %v1148_v41, %v1108_v39 }
 0x231   : > { %v1168_v45 = vmul.f32 %v7559_v43, %v7559_v43 }
 0x233   : > { %1194 = vrot.lane.b32.xlu2 %v1168_v45, %s10089_s23 }
 0x236   : > { %v1151_v48 = vpop.f32.mrf.mxu3 }
 0x237   : > { %v7564_v49 = vadd.f32 %v1151_v48, %v1111_v47 }
 0x239   : > { %v1169_v53 = vmul.f32 %v7564_v49, %v7564_v49 }
 0x23b   : > { %1196 = vrot.lane.b32.xlu2 %v1169_v53, %s10089_s23 }
 0x23e   : > { %v1154_v57 = vpop.f32.mrf.mxu3 }
 0x23f   : > { %v7569_v56 = vadd.f32 %v1154_v57, %v1114_v54 }
 0x241   : > { %v1170_v59 = vmul.f32 %v7569_v56, %v7569_v56 }
 0x243   : > { %1198 = vrot.lane.b32.xlu1 %v1170_v59, %s10089_s23 }
 0x246   : > { %v1157_v0 = vpop.f32.mrf.mxu3 }
 0x247   : > { %v7574_v2 = vadd.f32 %v1157_v0, %v1117_v62 }
 0x249   : > { %v1171_v5 = vmul.f32 %v7574_v2, %v7574_v2 }
 0x24b   : > { %1200 = vrot.lane.b32.xlu1 %v1171_v5, %s10089_s23 }
 0x24e   : > { %v1160_v10 = vpop.f32.mrf.mxu3 }
 0x24f   : > { %v7581_v11 = vadd.f32 %v1160_v10, %v1120_v6 }
 0x251   : > { %v1172_v15 = vmul.f32 %v7581_v11, %v7581_v11 }
 0x253   : > { %1190 = vrot.lane.b32.xlu1 %v1166_v14, %s10089_s23  ;;  %1202 = vrot.lane.b32.xlu0 %v1172_v15, %s10089_s23 }
 0x256   : > { %v1163_v18 = vpop.f32.mrf.mxu3 }
 0x257   : > { %v7589_v19 = vadd.f32 %v1163_v18, %v1123_v16 }
 0x259   : > { %1188 = vrot.lane.b32.xlu2 %v7589_v19, %s10089_s23  ;;  %v1173_v21 = vmul.f32 %v7589_v19, %v7589_v19 }
 0x25b   : > { %1184 = vrot.lane.b32.xlu1 %v7574_v2, %s10089_s23  ;;  %1204 = vrot.lane.b32.xlu0 %v1173_v21, %s10089_s23 }
 0x261   : > { %1182 = vrot.lane.b32.xlu2 %v7569_v56, %s10089_s23 }
 0x263   : > { %1178 = vrot.lane.b32.xlu1 %v7559_v43, %s10089_s23  ;;  %1192 = vrot.lane.b32.xlu0 %v1167_v23, %s10089_s23 }
 0x269   : > { %1176 = vrot.lane.b32.xlu2 %v7598_v22, %s10089_s23 }
 0x26b   : > { %1186 = vrot.lane.b32.xlu0 %v7581_v11, %s10089_s23 }
 0x273   : > { %1180 = vrot.lane.b32.xlu0 %v7564_v49, %s10089_s23 }
 0x27b   : > { %1174 = vrot.lane.b32.xlu0 %v7579_v9, %s10089_s23  ;;  %s7921_s23 = scalar_lea.vmem %s10115_s1, %s5235_s27  ;;  %s10118_s27 = smov 32  }
 0x28d   : > { %v1195_v24 = vpop.permute.xlu2 %1194 }
 0x28e   : > { %v1216_v25 = vadd.f32 %v1195_v24, %v1168_v45 }
 0x290   : > { %1242 = vrot.lane.b32.xlu0 %v1216_v25, %s10095_s21 }
 0x295   : > { %v1197_v26 = vpop.permute.xlu2 %1196 }
 0x296   : > { %v1217_v27 = vadd.f32 %v1197_v26, %v1169_v53 }
 0x298   : > { %1244 = vrot.lane.b32.xlu2 %v1217_v27, %s10095_s21 }
 0x2b3   : > { %v1189_v32 = vpop.permute.xlu2 %1188 }
 0x2b4   : > { %v1213_v34 = vadd.f32 %v1189_v32, %v7589_v19 }
 0x2b5   : > { %v1199_v28 = vpop.permute.xlu1 %1198 }
 0x2b6   : > { %v1218_v29 = vadd.f32 %v1199_v28, %v1170_v59 }
 0x2b8   : > { %1246 = vrot.lane.b32.xlu1 %v1218_v29, %s10095_s21 }
 0x2bb   : > { %v1183_v37 = vpop.permute.xlu2 %1182 }
 0x2bc   : > { %v1210_v39 = vadd.f32 %v1183_v37, %v7569_v56 }
 0x2bd   : > { %v1201_v30 = vpop.permute.xlu1 %1200 }
 0x2be   : > { %v1219_v31 = vadd.f32 %v1201_v30, %v1171_v5 }
 0x2c0   : > { %1248 = vrot.lane.b32.xlu0 %v1219_v31, %s10095_s21 }
 0x2c3   : > { %v1177_v44 = vpop.permute.xlu2 %1176 }
 0x2c4   : > { %v1207_v46 = vadd.f32 %v1177_v44, %v7598_v22 }
 0x2c5   : > { %v1203_v33 = vpop.permute.xlu0 %1202  ;;  %v1191_v36 = vpop.permute.xlu1 %1190 }
 0x2c6   : > { %v1220_v35 = vadd.f32 %v1203_v33, %v1172_v15  ;;  %v1214_v40 = vadd.f32 %v1191_v36, %v1166_v14 }
 0x2c8   : > { %1250 = vrot.lane.b32.xlu2 %v1220_v35, %s10095_s21  ;;  %1236 = vrot.lane.b32.xlu0 %v1213_v34, %s10095_s21 }
 0x2cd   : > { %v1205_v38 = vpop.permute.xlu0 %1204  ;;  %v1185_v42 = vpop.permute.xlu1 %1184 }
 0x2ce   : > { %v1221_v41 = vadd.f32 %v1205_v38, %v1173_v21  ;;  %v1211_v47 = vadd.f32 %v1185_v42, %v7574_v2 }
 0x2d0   : > { %1238 = vrot.lane.b32.xlu2 %v1214_v40, %s10095_s21  ;;  %1230 = vrot.lane.b32.xlu0 %v1210_v39, %s10095_s21 }
 0x2d1   : > { %1252 = vrot.lane.b32.xlu1 %v1221_v41, %s10095_s21 }
 0x2d5   : > { %v1193_v45 = vpop.permute.xlu0 %1192  ;;  %v1179_v50 = vpop.permute.xlu1 %1178 }
 0x2d6   : > { %v1215_v48 = vadd.f32 %v1193_v45, %v1167_v23  ;;  %v1208_v52 = vadd.f32 %v1179_v50, %v7559_v43 }
 0x2d8   : > { %1232 = vrot.lane.b32.xlu2 %v1211_v47, %s10095_s21  ;;  %1224 = vrot.lane.b32.xlu0 %v1207_v46, %s10095_s21 }
 0x2d9   : > { %1240 = vrot.lane.b32.xlu1 %v1215_v48, %s10095_s21 }
 0x2dd   : > { %v1187_v51 = vpop.permute.xlu0 %1186 }
 0x2de   : > { %v1212_v53 = vadd.f32 %v1187_v51, %v7581_v11 }
 0x2e0   : > { %1226 = vrot.lane.b32.xlu2 %v1208_v52, %s10095_s21 }
 0x2e1   : > { %1234 = vrot.lane.b32.xlu1 %v1212_v53, %s10095_s21 }
 0x2e5   : > { %v1181_v54 = vpop.permute.xlu0 %1180 }
 0x2e6   : > { %v1209_v55 = vadd.f32 %v1181_v54, %v7564_v49 }
 0x2e9   : > { %1228 = vrot.lane.b32.xlu1 %v1209_v55, %s10095_s21 }
 0x2ed   : > { %v1175_v57 = vpop.permute.xlu0 %1174 }
 0x2ee   : > { %v1206_v58 = vadd.f32 %v1175_v57, %v7579_v9 }
 0x2f1   : > { %1222 = vrot.lane.b32.xlu1 %v1206_v58, %s10095_s21 }
 0x2f2   : > { %v1245_v59 = vpop.permute.xlu2 %1244 }
 0x2f3   : > { %v1265_v60 = vadd.f32 %v1245_v59, %v1217_v27 }
 0x2f5   : > { %1292 = vrot.lane.b32.xlu0 %v1265_v60, %s10093_s29 }
 0x302   : > { %v1243_v61 = vpop.permute.xlu0 %1242 }
 0x303   : > { %v1264_v62 = vadd.f32 %v1243_v61, %v1216_v25 }
 0x305   : > { %1290 = vrot.lane.b32.xlu1 %v1264_v62, %s10093_s29 }
 0x322   : > { %v1251_v63 = vpop.permute.xlu2 %1250 }
 0x323   : > { %v1268_v0 = vadd.f32 %v1251_v63, %v1220_v35 }
 0x325   : > { %1298 = vrot.lane.b32.xlu0 %v1268_v0, %s10093_s29 }
 0x32a   : > { %v1247_v1 = vpop.permute.xlu1 %1246  ;;  %v1239_v3 = vpop.permute.xlu2 %1238 }
 0x32b   : > { %v1266_v4 = vadd.f32 %v1247_v1, %v1218_v29  ;;  %v1262_v5 = vadd.f32 %v1239_v3, %v1214_v40 }
 0x32d   : > { %1294 = vrot.lane.b32.xlu2 %v1266_v4, %s10093_s29  ;;  %1286 = vrot.lane.b32.xlu0 %v1262_v5, %s10093_s29 }
 0x332   : > { %v1233_v6 = vpop.permute.xlu2 %1232  ;;  %v1249_v7 = vpop.permute.xlu0 %1248 }
 0x333   : > { %v1259_v8 = vadd.f32 %v1233_v6, %v1211_v47  ;;  %v1267_v10 = vadd.f32 %v1249_v7, %v1219_v31 }
 0x335   : > { %1280 = vrot.lane.b32.xlu0 %v1259_v8, %s10093_s29  ;;  %1296 = vrot.lane.b32.xlu1 %v1267_v10, %s10093_s29 }
 0x33a   : > { %v1227_v12 = vpop.permute.xlu2 %1226  ;;  %v1237_v13 = vpop.permute.xlu0 %1236 }
 0x33b   : > { %v1256_v14 = vadd.f32 %v1227_v12, %v1208_v52  ;;  %v1261_v15 = vadd.f32 %v1237_v13, %v1213_v34 }
 0x33d   : > { %1274 = vrot.lane.b32.xlu0 %v1256_v14, %s10093_s29  ;;  %1284 = vrot.lane.b32.xlu1 %v1261_v15, %s10093_s29 }
 0x342   : > { %v1231_v16 = vpop.permute.xlu0 %1230 }
 0x343   : > { %v1253_v17 = vpop.permute.xlu1 %1252  ;;  %v1258_v18 = vadd.f32 %v1231_v16, %v1210_v39 }
 0x344   : > { %v1269_v20 = vadd.f32 %v1253_v17, %v1221_v41 }
 0x345   : > { %1278 = vrot.lane.b32.xlu1 %v1258_v18, %s10093_s29 }
 0x346   : > { %1300 = vrot.lane.b32.xlu2 %v1269_v20, %s10093_s29 }
 0x34a   : > { %v1225_v21 = vpop.permute.xlu0 %1224 }
 0x34b   : > { %v1241_v23 = vpop.permute.xlu1 %1240  ;;  %v1255_v24 = vadd.f32 %v1225_v21, %v1207_v46 }
 0x34c   : > { %v1263_v25 = vadd.f32 %v1241_v23, %v1215_v48 }
 0x34d   : > { %1272 = vrot.lane.b32.xlu1 %v1255_v24, %s10093_s29 }
 0x34e   : > { %1288 = vrot.lane.b32.xlu2 %v1263_v25, %s10093_s29 }
 0x353   : > { %v1235_v26 = vpop.permute.xlu1 %1234 }
 0x354   : > { %v1260_v27 = vadd.f32 %v1235_v26, %v1212_v53 }
 0x356   : > { %1282 = vrot.lane.b32.xlu2 %v1260_v27, %s10093_s29 }
 0x35b   : > { %v1229_v28 = vpop.permute.xlu1 %1228 }
 0x35c   : > { %v1257_v29 = vadd.f32 %v1229_v28, %v1209_v55 }
 0x35e   : > { %1276 = vrot.lane.b32.xlu2 %v1257_v29, %s10093_s29 }
 0x363   : > { %v1223_v30 = vpop.permute.xlu1 %1222 }
 0x364   : > { %v1254_v31 = vadd.f32 %v1223_v30, %v1206_v58 }
 0x366   : > { %1270 = vrot.lane.b32.xlu2 %v1254_v31, %s10093_s29  ;;  %s10121_s29 = smov 8  }
 0x367   : > { %v1293_v32 = vpop.permute.xlu0 %1292 }
 0x368   : > { %v7655_v33 = vadd.f32 %v1293_v32, %v1265_v60 }
 0x36a   : > { %1340 = vrot.lane.b32.xlu1 %v7655_v33, %s10091_s18 }
 0x377   : > { %v1291_v34 = vpop.permute.xlu1 %1290 }
 0x378   : > { %v1312_v35 = vadd.f32 %v1291_v34, %v1264_v62 }
 0x37a   : > { %1338 = vrot.lane.b32.xlu2 %v1312_v35, %s10091_s18 }
 0x387   : > { %v1295_v36 = vpop.permute.xlu2 %1294 }
 0x388   : > { %v1314_v37 = vadd.f32 %v1295_v36, %v1266_v4 }
 0x38a   : > { %1342 = vrot.lane.b32.xlu0 %v1314_v37, %s10091_s18 }
 0x397   : > { %v1299_v38 = vpop.permute.xlu0 %1298 }
 0x398   : > { %v1316_v39 = vadd.f32 %v1299_v38, %v1268_v0 }
 0x39a   : > { %1346 = vrot.lane.b32.xlu1 %v1316_v39, %s10091_s18 }
 0x39f   : > { %v1287_v40 = vpop.permute.xlu0 %1286 }
 0x3a0   : > { %v1301_v41 = vpop.permute.xlu2 %1300  ;;  %v1310_v42 = vadd.f32 %v1287_v40, %v1262_v5  ;;  %v1366_v40 = vld [vmem:[%s10076_s11] sm:$0xff] }
 0x3a1   : > { %v1317_v44 = vadd.f32 %v1301_v41, %v1269_v20  ;;  %v1367_v41 = vld [vmem:[%s10076_s11 + $0x8] sm:$0xff] }
 0x3a2   : > { %1334 = vrot.lane.b32.xlu1 %v1310_v42, %s10091_s18 }
 0x3a3   : > { %1348 = vrot.lane.b32.xlu0 %v1317_v44, %s10091_s18 }
 0x3a7   : > { %v1297_v45 = vpop.permute.xlu1 %1296  ;;  %v1281_v46 = vpop.permute.xlu0 %1280 }
 0x3a8   : > { %v1289_v47 = vpop.permute.xlu2 %1288  ;;  %v1315_v48 = vadd.f32 %v1297_v45, %v1267_v10  ;;  %v1307_v50 = vadd.f32 %v1281_v46, %v1259_v8  ;;  %v1370_v45 = vld [vmem:[%s10076_s11 + $0x20] sm:$0xff]  ;;  %v1371_v46 = vld [vmem:[%s10076_s11 + $0x28] sm:$0xff] }
 0x3a9   : > { %v1311_v51 = vadd.f32 %v1289_v47, %v1263_v25  ;;  %v1372_v47 = vld [vmem:[%s10076_s11 + $0x30] sm:$0xff] }
 0x3aa   : > { %1344 = vrot.lane.b32.xlu2 %v1315_v48, %s10091_s18  ;;  %1328 = vrot.lane.b32.xlu1 %v1307_v50, %s10091_s18 }
 0x3ab   : > { %1336 = vrot.lane.b32.xlu0 %v1311_v51, %s10091_s18 }
 0x3af   : > { %v1285_v52 = vpop.permute.xlu1 %1284  ;;  %v1275_v53 = vpop.permute.xlu0 %1274 }
 0x3b0   : > { %v1283_v54 = vpop.permute.xlu2 %1282  ;;  %v1309_v55 = vadd.f32 %v1285_v52, %v1261_v15  ;;  %v1304_v57 = vadd.f32 %v1275_v53, %v1256_v14  ;;  %v1376_v52 = vld [vmem:[%s10076_s11 + $0x50] sm:$0xff]  ;;  %v1377_v53 = vld [vmem:[%s10076_s11 + $0x58] sm:$0xff] }
 0x3b1   : > { %v1308_v58 = vadd.f32 %v1283_v54, %v1260_v27  ;;  %v1378_v54 = vld [vmem:[%s10076_s11 + $0x60] sm:$0xff] }
 0x3b2   : > { %1332 = vrot.lane.b32.xlu2 %v1309_v55, %s10091_s18  ;;  %1322 = vrot.lane.b32.xlu1 %v1304_v57, %s10091_s18 }
 0x3b3   : > { %1330 = vrot.lane.b32.xlu0 %v1308_v58, %s10091_s18 }
 0x3b7   : > { %v1279_v59 = vpop.permute.xlu1 %1278 }
 0x3b8   : > { %v1277_v60 = vpop.permute.xlu2 %1276  ;;  %v1306_v61 = vadd.f32 %v1279_v59, %v1258_v18 }
 0x3b9   : > { %v1305_v62 = vadd.f32 %v1277_v60, %v1257_v29 }
 0x3ba   : > { %1326 = vrot.lane.b32.xlu2 %v1306_v61, %s10091_s18 }
 0x3bb   : > { %1324 = vrot.lane.b32.xlu0 %v1305_v62, %s10091_s18 }
 0x3bf   : > { %v1273_v63 = vpop.permute.xlu1 %1272 }
 0x3c0   : > { %v1271_v0 = vpop.permute.xlu2 %1270  ;;  %v1303_v1 = vadd.f32 %v1273_v63, %v1255_v24 }
 0x3c1   : > { %v1302_v3 = vadd.f32 %v1271_v0, %v1254_v31 }
 0x3c2   : > { %1320 = vrot.lane.b32.xlu2 %v1303_v1, %s10091_s18 }
 0x3c3   : > { %1318 = vrot.lane.b32.xlu0 %v1302_v3, %s10091_s18 }
 0x3d4   : > { %v1339_v5 = vpop.permute.xlu2 %1338 }
 0x3d5   : > { %v1360_v21 = vadd.f32 %v1339_v5, %v1312_v35  ;;  %v6591_v5 = vld [vmem:[%s10067_s2 + $0x1e4] sm:$0xf] }
 0x3dc   : > { %v1341_v4 = vpop.permute.xlu1 %1340 }
 0x3dd   : > { %v1361_v20 = vadd.f32 %v1341_v4, %v7655_v33  ;;  %v6593_v4 = vld [vmem:[%s10067_s2 + $0x1ec] sm:$0xf0] }
 0x3fc   : > { %v1343_v6 = vpop.permute.xlu0 %1342 }
 0x3fd   : > { %v1362_v17 = vadd.f32 %v1343_v6, %v1314_v37 }
 0x404   : > { %v1345_v8 = vpop.permute.xlu2 %1344 }
 0x405   : > { %v1363_v15 = vadd.f32 %v1345_v8, %v1315_v48  ;;  %v1373_v48 = vld [vmem:[%s10076_s11 + $0x38] sm:$0xff]  ;;  %v5520_v8 = vld [vmem:[%s10067_s2 + $0x1e8] sm:$0xf] }
 0x40c   : > { %v1347_v7 = vpop.permute.xlu1 %1346  ;;  %v1333_v16 = vpop.permute.xlu2 %1332 }
 0x40d   : > { %v1364_v13 = vadd.f32 %v1347_v7, %v1316_v39  ;;  %v1357_v28 = vadd.f32 %v1333_v16, %v1309_v55  ;;  %v1379_v55 = vld [vmem:[%s10076_s11 + $0x68] sm:$0xff]  ;;  %v5514_v7 = vld [vmem:[%s10067_s2 + $0x1f0] sm:$0xf0] }
 0x414   : > { %v1335_v14 = vpop.permute.xlu1 %1334  ;;  %v1327_v26 = vpop.permute.xlu2 %1326 }
 0x415   : > { %v1349_v10 = vpop.permute.xlu0 %1348  ;;  %v1358_v25 = vadd.f32 %v1335_v14, %v1310_v42  ;;  %v1354_v31 = vadd.f32 %v1327_v26, %v1306_v61  ;;  %v1368_v42 = vld [vmem:[%s10076_s11 + $0x10] sm:$0xff]  ;;  %v5496_v14 = vld [vmem:[%s10067_s2 + $0x1c0] sm:$0xf] }
 0x416   : > { %v1365_v12 = vadd.f32 %v1349_v10, %v1317_v44  ;;  %v1369_v44 = vld [vmem:[%s10076_s11 + $0x18] sm:$0xff]  ;;  %v5480_v26 = vld [vmem:[%s10067_s2 + $0x1a0] sm:$0xf] }
 0x417   : > { %v6594_v10 = vld [vmem:[%s10067_s2 + $0x1f4] sm:$0xf0] }
 0x418   : > { %1382 = vmatpush.msrb.mxu0 %v1365_v12  ;;  %v5517_v12 = vor.u32 %v6591_v5, %v5514_v7  ;;  %v6573_v5 = vld [vmem:[%s10067_s2 + $0x14c] sm:$0xf0] }
 0x41a   : > { %1383 = vmatpush.msrb.mxu0 %v1364_v13  ;;  %v5521_v13 = vor.u32 %v6594_v10, %v5520_v8  ;;  %1845 = vmatpush.bf16.msra.mxu2 %v5517_v12  ;;  %v5434_v10 = vld [vmem:[%s10067_s2 + $0x150] sm:$0xf0]  ;;  %v5440_v12 = vld [vmem:[%s10067_s2 + $0x148] sm:$0xf] }
 0x41c   : > { %1384 = vmatpush.msrb.mxu0 %v1363_v15  ;;  %v1329_v24 = vpop.permute.xlu1 %1328  ;;  %v1321_v35 = vpop.permute.xlu2 %1320  ;;  %1874 = vmatpush.bf16.msrb.mxu3 %v5521_v13  ;;  %v6589_v15 = vld [vmem:[%s10067_s2 + $0x1cc] sm:$0xf0]  ;;  %v6574_v13 = vld [vmem:[%s10067_s2 + $0x154] sm:$0xf0] }
 0x41d   : > { %v1337_v18 = vpop.permute.xlu0 %1336  ;;  %v1355_v30 = vadd.f32 %v1329_v24, %v1307_v50  ;;  %v1351_v37 = vadd.f32 %v1321_v35, %v1303_v1  ;;  %v1374_v50 = vld [vmem:[%s10076_s11 + $0x40] sm:$0xff]  ;;  %v5497_v16 = vor.u32 %v6589_v15, %v5496_v14  ;;  %v6590_v24 = vld [vmem:[%s10067_s2 + $0x1d4] sm:$0xf0] }
 0x41e   : > { %1385 = vmatpush.msrb.mxu0 %v1362_v17  ;;  %v1359_v23 = vadd.f32 %v1337_v18, %v1311_v51  ;;  %v1375_v51 = vld [vmem:[%s10076_s11 + $0x48] sm:$0xff]  ;;  %v6587_v17 = vld [vmem:[%s10067_s2 + $0x1c4] sm:$0xf]  ;;  %v5498_v18 = vld [vmem:[%s10067_s2 + $0x1d0] sm:$0xf0] }
 0x41f   : > { %v5464_v35 = vld [vmem:[%s10067_s2 + $0x180] sm:$0xf] }
 0x420   : > { %1386 = vmatpush.msrb.mxu0 %v1361_v20  ;;  %v5504_v20 = vld [vmem:[%s10067_s2 + $0x1c8] sm:$0xf] }
 0x422   : > { %1387 = vmatpush.msrb.mxu0 %v1360_v21 }
 0x424   : > { %1388 = vmatpush.msrb.mxu0 %v1359_v23  ;;  %v1323_v32 = vpop.permute.xlu1 %1322  ;;  %v5501_v23 = vor.u32 %v6587_v17, %v5498_v18  ;;  %v5416_v18 = vld [vmem:[%s10067_s2 + $0x120] sm:$0xf] }
 0x425   : > { %v1331_v27 = vpop.permute.xlu0 %1330  ;;  %v1352_v36 = vadd.f32 %v1323_v32, %v1304_v57  ;;  %v1380_v57 = vld [vmem:[%s10076_s11 + $0x70] sm:$0xff]  ;;  %v6586_v32 = vld [vmem:[%s10067_s2 + $0x1b4] sm:$0xf0] }
 0x426   : > { %1389 = vmatpush.msrb.mxu0 %v1358_v25  ;;  %v1356_v29 = vadd.f32 %v1331_v27, %v1308_v58  ;;  %v1381_v58 = vld [vmem:[%s10076_s11 + $0x78] sm:$0xff]  ;;  %v5505_v25 = vor.u32 %v6590_v24, %v5504_v20  ;;  %1846 = vmatpush.bf16.msra.mxu2 %v5501_v23  ;;  %v6585_v27 = vld [vmem:[%s10067_s2 + $0x1ac] sm:$0xf0]  ;;  %v6567_v23 = vld [vmem:[%s10067_s2 + $0x124] sm:$0xf] }
 0x427   : > { %v6569_v20 = vld [vmem:[%s10067_s2 + $0x12c] sm:$0xf0] }
 0x428   : > { %1390 = vmatpush.msrb.mxu0 %v1357_v28  ;;  %v6583_v28 = vld [vmem:[%s10067_s2 + $0x1a4] sm:$0xf]  ;;  %1875 = vmatpush.bf16.msrb.mxu3 %v5505_v25 }
 0x42a   : > { %1391 = vmatpush.msrb.mxu0 %v1356_v29  ;;  %v5481_v29 = vor.u32 %v6585_v27, %v5480_v26  ;;  %v5417_v26 = vor.u32 %v6569_v20, %v5416_v18  ;;  %v5418_v27 = vld [vmem:[%s10067_s2 + $0x130] sm:$0xf0] }
 0x42c   : > { %1392 = vmatpush.msrb.mxu0 %v1355_v30  ;;  %v5482_v30 = vld [vmem:[%s10067_s2 + $0x1b0] sm:$0xf0] }
 0x42d   : > { %v1325_v33 = vpop.permute.xlu0 %1324 }
 0x42e   : > { %v1353_v34 = vadd.f32 %v1325_v33, %v1305_v62  ;;  %1393 = vmatpush.msrb.mxu0 %v1354_v31  ;;  %v5488_v31 = vld [vmem:[%s10067_s2 + $0x1a8] sm:$0xf]  ;;  %v5485_v33 = vor.u32 %v6583_v28, %v5482_v30  ;;  %v5421_v30 = vor.u32 %v6567_v23, %v5418_v27 }
 0x42f   : > { %v5424_v28 = vld [vmem:[%s10067_s2 + $0x128] sm:$0xf] }
 0x430   : > { %1394 = vmatpush.msrb.mxu0 %v1353_v34  ;;  %v5489_v34 = vor.u32 %v6586_v32, %v5488_v31  ;;  %1847 = vmatpush.bf16.msra.mxu2 %v5485_v33  ;;  %v6570_v31 = vld [vmem:[%s10067_s2 + $0x134] sm:$0xf0] }
 0x431   : > { %v5425_v32 = vor.u32 %v6570_v31, %v5424_v28 }
 0x432   : > { %1395 = vmatpush.msrb.mxu0 %v1352_v36  ;;  %v6581_v36 = vld [vmem:[%s10067_s2 + $0x18c] sm:$0xf0]  ;;  %1876 = vmatpush.bf16.msrb.mxu3 %v5489_v34  ;;  %v5400_v34 = vld [vmem:[%s10067_s2 + $0x100] sm:$0xf] }
 0x434   : > { %1396 = vmatpush.msrb.mxu0 %v1351_v37  ;;  %v6579_v37 = vld [vmem:[%s10067_s2 + $0x184] sm:$0xf] }
 0x435   : > { %v1319_v38 = vpop.permute.xlu0 %1318 }
 0x436   : > { %v1350_v39 = vadd.f32 %v1319_v38, %v1302_v3  ;;  %v5512_v3 = vld [vmem:[%s10067_s2 + $0x1e0] sm:$0xf] }
 0x437   : > { %v5513_v6 = vor.u32 %v6593_v4, %v5512_v3  ;;  %v5432_v4 = vld [vmem:[%s10067_s2 + $0x140] sm:$0xf] }
 0x438   : > { %1397 = vmatpush.msrb.mxu0 %v1350_v39  ;;  %v5465_v39 = vor.u32 %v6581_v36, %v5464_v35  ;;  %v5433_v8 = vor.u32 %v6573_v5, %v5432_v4  ;;  %v6565_v35 = vld [vmem:[%s10067_s2 + $0x10c] sm:$0xf0]  ;;  %v6563_v36 = vld [vmem:[%s10067_s2 + $0x104] sm:$0xf] }
 0x439   : > { %1398 = vmatmul.f32.vlgmr.msrb.gmra.mxu0 %v1366_v40  ;;  %1816 = vmatpush.bf16.msra.mxu1 %v5513_v6  ;;  %v5466_v40 = vld [vmem:[%s10067_s2 + $0x190] sm:$0xf0]  ;;  %v6571_v6 = vld [vmem:[%s10067_s2 + $0x144] sm:$0xf] }
 0x43a   : > { %v5437_v15 = vor.u32 %v6571_v6, %v5434_v10 }
 0x43d   : > { %1817 = vmatpush.bf16.msra.mxu1 %v5497_v16  ;;  %v5441_v16 = vor.u32 %v6574_v13, %v5440_v12 }
 0x441   : > { %1401 = vmatmul.f32.gmra.mxu0 %v1367_v41  ;;  %1818 = vmatpush.bf16.msra.mxu1 %v5481_v29  ;;  %v5472_v41 = vld [vmem:[%s10067_s2 + $0x188] sm:$0xf] }
 0x445   : > { %1819 = vmatpush.bf16.msra.mxu1 %v5465_v39  ;;  %v5402_v39 = vld [vmem:[%s10067_s2 + $0x110] sm:$0xf0] }
 0x449   : > { %1404 = vmatmul.f32.gmra.mxu0 %v1368_v42  ;;  %v6582_v42 = vld [vmem:[%s10067_s2 + $0x194] sm:$0xf0] }
 0x451   : > { %1407 = vmatmul.f32.gmra.mxu0 %v1369_v44 }
 0x459   : > { %1410 = vmatmul.f32.gmra.mxu0 %v1370_v45  ;;  %v5469_v45 = vor.u32 %v6579_v37, %v5466_v40  ;;  %v5408_v40 = vld [vmem:[%s10067_s2 + $0x108] sm:$0xf] }
 0x45b   : > { %1848 = vmatpush.bf16.msra.mxu2 %v5469_v45  ;;  %v5405_v45 = vor.u32 %v6563_v36, %v5402_v39 }
 0x461   : > { %1413 = vmatmul.f32.gmra.mxu0 %v1371_v46  ;;  %v5473_v46 = vor.u32 %v6582_v42, %v5472_v41  ;;  %v6566_v41 = vld [vmem:[%s10067_s2 + $0x114] sm:$0xf0] }
 0x463   : > { %1877 = vmatpush.bf16.msrb.mxu3 %v5473_v46  ;;  %v5409_v46 = vor.u32 %v6566_v41, %v5408_v40 }
 0x469   : > { %1416 = vmatmul.f32.gmra.mxu0 %v1372_v47 }
 0x471   : > { %1419 = vmatmul.f32.gmra.mxu0 %v1373_v48  ;;  %v5448_v48 = vld [vmem:[%s10067_s2 + $0x160] sm:$0xf] }
 0x479   : > { %1422 = vmatmul.f32.gmra.mxu0 %v1374_v50  ;;  %v6577_v50 = vld [vmem:[%s10067_s2 + $0x16c] sm:$0xf0] }
 0x481   : > { %1425 = vmatmul.f32.gmra.mxu0 %v1375_v51  ;;  %v6575_v51 = vld [vmem:[%s10067_s2 + $0x164] sm:$0xf] }
 0x489   : > { %1428 = vmatmul.f32.gmra.mxu0 %v1376_v52 }
 0x491   : > { %1431 = vmatmul.f32.gmra.mxu0 %v1377_v53  ;;  %v5449_v53 = vor.u32 %v6577_v50, %v5448_v48 }
 0x493   : > { %1820 = vmatpush.bf16.msra.mxu1 %v5449_v53 }
 0x497   : > { %1821 = vmatpush.bf16.msra.mxu1 %v5433_v8 }
 0x499   : > { %1434 = vmatmul.f32.gmra.mxu0 %v1378_v54  ;;  %v5450_v54 = vld [vmem:[%s10067_s2 + $0x170] sm:$0xf0] }
 0x49b   : > { %1822 = vmatpush.bf16.msra.mxu1 %v5417_v26 }
 0x4a1   : > { %1437 = vmatmul.f32.gmra.mxu0 %v1379_v55  ;;  %v5456_v55 = vld [vmem:[%s10067_s2 + $0x168] sm:$0xf] }
 0x4a9   : > { %1440 = vmatmul.f32.gmra.mxu0 %v1380_v57  ;;  %v5453_v57 = vor.u32 %v6575_v51, %v5450_v54  ;;  %v7896_v51 = vld [vmem:[%s10079_s14] ss:$0 sm:$0xff] }
 0x4ab   : > { %1849 = vmatpush.bf16.msra.mxu2 %v5453_v57 }
 0x4af   : > { %1850 = vmatpush.bf16.msra.mxu2 %v5437_v15 }
 0x4b1   : > { %1443 = vmatmul.f32.gmra.mxu0 %v1381_v58  ;;  %v6578_v58 = vld [vmem:[%s10067_s2 + $0x174] sm:$0xf0] }
 0x4b2   : > { %v5457_v3 = vor.u32 %v6578_v58, %v5456_v55 }
 0x4b3   : > { %1851 = vmatpush.bf16.msra.mxu2 %v5421_v30 }
 0x4b4   : > { %1878 = vmatpush.bf16.msrb.mxu3 %v5457_v3 }
 0x4b6   : > { %v7723_v59 = vpop.f32.mrf.mxu0 }
 0x4b7   : > { %v1447_v38 = vmul.f32 %v7723_v59, %v7723_v59  ;;  %1852 = vmatpush.bf16.msra.mxu2 %v5405_v45  ;;  %v1465_v3 = vsub.f32 %v7579_v9, %v7723_v59 }
 0x4b8   : > { %1879 = vmatpush.bf16.msrb.mxu3 %v5441_v16 }
 0x4bc   : > { %1880 = vmatpush.bf16.msrb.mxu3 %v5425_v32 }
 0x4be   : > { %v7725_v60 = vpop.f32.mrf.mxu0 }
 0x4bf   : > { %v1448_v7 = vmul.f32 %v7725_v60, %v7725_v60  ;;  %v1466_v18 = vsub.f32 %v7598_v22, %v7725_v60 }
 0x4c0   : > { %1881 = vmatpush.bf16.msrb.mxu3 %v5409_v46 }
 0x4c6   : > { %v7727_v61 = vpop.f32.mrf.mxu0 }
 0x4c7   : > { %v1449_v37 = vmul.f32 %v7727_v61, %v7727_v61  ;;  %v1467_v39 = vsub.f32 %v7559_v43, %v7727_v61 }
 0x4ce   : > { %v7729_v62 = vpop.f32.mrf.mxu0 }
 0x4cf   : > { %v1450_v4 = vmul.f32 %v7729_v62, %v7729_v62 }
 0x4d6   : > { %v7731_v63 = vpop.f32.mrf.mxu0 }
 0x4d7   : > { %v1451_v23 = vmul.f32 %v7731_v63, %v7731_v63 }
 0x4de   : > { %v7733_v0 = vpop.f32.mrf.mxu0 }
 0x4df   : > { %v1452_v40 = vmul.f32 %v7733_v0, %v7733_v0 }
 0x4e6   : > { %v7735_v1 = vpop.f32.mrf.mxu0 }
 0x4ee   : > { %v7770_v21 = vpop.f32.mrf.mxu0 }
 0x4f6   : > { %v1423_v44 = vpop.f32.mrf.mxu0 }
 0x4f7   : > { %v1455_v47 = vsub.f32 %v1423_v44, %v1447_v38  ;;  %v5401_v38 = vor.u32 %v6565_v35, %v5400_v34 }
 0x4f9   : > { %v7822_v52 = vadd.f32 1e-05, %v1455_v47  ;;  %1823 = vmatpush.bf16.msra.mxu1 %v5401_v38  ;;  %v1604_v38 = vld [vmem:[%s7921_s23 + $0x8] sm:$0xff] }
 0x4fb   : > { %6858 = vrsqrt.f32 %v7822_v52  ;;  %vm1487_vm1 = vweird.f32 %v7822_v52 }
 0x4fe   : > { %v1426_v14 = vpop.f32.mrf.mxu0 }
 0x4ff   : > { %v1456_v17 = vsub.f32 %v1426_v14, %v1448_v7 }
 0x501   : > { %v6859_v24 = vpop.eup %6858  ;;  %v1474_v25 = vadd.f32 1e-05, %v1456_v17 }
 0x502   : > { %v1482_v29 = vmul.f32 %v6859_v24, %v7822_v52  ;;  %vm1488_vm0 = vweird.f32 %v6859_v24  ;;  %v7908_v52 = vld [vmem:[%s10079_s14 + $0x1] ss:$0 sm:$0xff] }
 0x503   : > { %6860 = vrsqrt.f32 %v1474_v25  ;;  %vm1489_vm2 = vmor %vm1487_vm1, %vm1488_vm0  ;;  %vm1497_vm4 = vweird.f32 %v1474_v25 }
 0x504   : > { %v1483_v33 = vmul.f32 %v6859_v24, %v1482_v29 }
 0x506   : > { %v1484_v42 = vmul.f32 0.5, %v1483_v33  ;;  %v1429_v44 = vpop.f32.mrf.mxu0 }
 0x507   : > { %v1457_v47 = vsub.f32 %v1429_v44, %v1449_v37  ;;  %v1603_v37 = vld [vmem:[%s7921_s23] sm:$0xff] }
 0x508   : > { %v1485_v48 = vsub.f32 1.5, %v1484_v42 }
 0x509   : > { %v6861_v50 = vpop.eup %6860  ;;  %v1475_v53 = vadd.f32 1e-05, %v1457_v47 }
 0x50a   : > { %v1486_v54 = vmul.f32 %v6859_v24, %v1485_v48  ;;  %v1492_v55 = vmul.f32 %v6861_v50, %v1474_v25  ;;  %vm1498_vm3 = vweird.f32 %v6861_v50 }
 0x50b   : > { %6862 = vrsqrt.f32 %v1475_v53  ;;  %vm1499_vm5 = vmor %vm1497_vm4, %vm1498_vm3  ;;  %vm1507_vm7 = vweird.f32 %v1475_v53 }
 0x50c   : > { %v1490_v57 = vsel %vm1489_vm2, %v6859_v24, %v1486_v54  ;;  %v1493_v58 = vmul.f32 %v6861_v50, %v1492_v55 }
 0x50d   : > { %v1562_v5 = vmul.f32 %v7896_v51, %v1490_v57 }
 0x50e   : > { %v1494_v6 = vmul.f32 0.5, %v1493_v58  ;;  %v1432_v7 = vpop.f32.mrf.mxu0 }
 0x50f   : > { %v1570_v8 = vmul.f32 %v1562_v5, %v1465_v3  ;;  %v1458_v10 = vsub.f32 %v1432_v7, %v1450_v4  ;;  %v1468_v5 = vsub.f32 %v7564_v49, %v7729_v62  ;;  %v1453_v7 = vmul.f32 %v7735_v1, %v7735_v1  ;;  %v6588_v49 = vld [vmem:[%s10067_s2 + $0x1cc] sm:$0xf] }
 0x510   : > { %v1495_v12 = vsub.f32 1.5, %v1494_v6 }
 0x511   : > { %v6863_v13 = vpop.eup %6862  ;;  %v1476_v14 = vadd.f32 1e-05, %v1458_v10  ;;  %v1579_v15 = vadd.f32 %v7908_v52, %v1570_v8 }
 0x512   : > { %v1496_v9 = vmul.f32 %v6861_v50, %v1495_v12  ;;  %v1502_v59 = vmul.f32 %v6863_v13, %v1475_v53  ;;  %vm1508_vm6 = vweird.f32 %v6863_v13 }
 0x513   : > { %6864 = vrsqrt.f32 %v1476_v14  ;;  %v1587_v28 = vmul.f32 0.2, %v1579_v15  ;;  %vm1509_vm8 = vmor %vm1507_vm7, %vm1508_vm6  ;;  %vm1517_vm10 = vweird.f32 %v1476_v14 }
 0x514   : > { %v1500_v16 = vsel %vm1499_vm5, %v6861_v50, %v1496_v9  ;;  %v1503_v17 = vmul.f32 %v6863_v13, %v1502_v59  ;;  %v6592_v9 = vld [vmem:[%s10067_s2 + $0x1ec] sm:$0xf]  ;;  %v5522_v59 = vld [vmem:[%s10067_s2 + $0x1f8] sm:$0xf0] }
 0x515   : > { %v1563_v20 = vmul.f32 %v7896_v51, %v1500_v16  ;;  %v1595_v34 = vmax.f32 %v1579_v15, %v1587_v28  ;;  %v5525_v15 = vor.u32 %v6592_v9, %v5522_v59  ;;  %v5506_v16 = vld [vmem:[%s10067_s2 + $0x1d8] sm:$0xf0]  ;;  %v6584_v28 = vld [vmem:[%s10067_s2 + $0x1ac] sm:$0xf] }
 0x516   : > { %v1504_v24 = vmul.f32 0.5, %v1503_v17  ;;  %v1435_v26 = vpop.f32.mrf.mxu0 }
 0x517   : > { %v1571_v25 = vmul.f32 %v1563_v20, %v1466_v18  ;;  %v1459_v27 = vsub.f32 %v1435_v26, %v1451_v23  ;;  %v1611_v48 = vadd.f32 %v1603_v37, %v1595_v34  ;;  %1903 = vmatpush.bf16.msrb.mxu1 %v5525_v15  ;;  %v5509_v26 = vor.u32 %v6588_v49, %v5506_v16  ;;  %v6568_v15 = vld [vmem:[%s10067_s2 + $0x12c] sm:$0xf]  ;;  %v5426_v16 = vld [vmem:[%s10067_s2 + $0x138] sm:$0xf0] }
 0x518   : > { %v1505_v29 = vsub.f32 1.5, %v1504_v24 }
 0x519   : > { %v6865_v30 = vpop.eup %6864  ;;  %v7916_v31 = vadd.f32 1e-05, %v1459_v27  ;;  %v1580_v22 = vadd.f32 %v7908_v52, %v1571_v25 }
 0x51a   : > { %v1506_v60 = vmul.f32 %v6863_v13, %v1505_v29  ;;  %v1512_v32 = vmul.f32 %v6865_v30, %v1476_v14  ;;  %vm1518_vm9 = vweird.f32 %v6865_v30  ;;  %v5490_v29 = vld [vmem:[%s10067_s2 + $0x1b8] sm:$0xf0] }
 0x51b   : > { %6866 = vrsqrt.f32 %v7916_v31  ;;  %v1588_v33 = vmul.f32 0.2, %v1580_v22  ;;  %vm1519_vm11 = vmor %vm1517_vm10, %vm1518_vm9  ;;  %vm1527_vm13 = vweird.f32 %v7916_v31  ;;  %1904 = vmatpush.bf16.msrb.mxu1 %v5509_v26 }
 0x51c   : > { %v1510_v35 = vsel %vm1509_vm8, %v6863_v13, %v1506_v60  ;;  %v1513_v36 = vmul.f32 %v6865_v30, %v1512_v32  ;;  %v1606_v60 = vld [vmem:[%s7921_s23 + $0x18] sm:$0xff]  ;;  %v1469_v32 = vsub.f32 %v7569_v56, %v7731_v63  ;;  %vm2082_vm8 = vcmask 523264  }
 0x51d   : > { %v1564_v41 = vmul.f32 %v7896_v51, %v1510_v35  ;;  %v1596_v42 = vmax.f32 %v1580_v22, %v1588_v33  ;;  %v1454_v33 = vmul.f32 %v7770_v21, %v7770_v21  ;;  %v5474_v56 = vld [vmem:[%s10067_s2 + $0x198] sm:$0xf0] }
 0x51e   : > { %v1514_v44 = vmul.f32 0.5, %v1513_v36  ;;  %v1438_v45 = vpop.f32.mrf.mxu0 }
 0x51f   : > { %v1572_v46 = vmul.f32 %v1564_v41, %v1467_v39  ;;  %v1460_v47 = vsub.f32 %v1438_v45, %v1452_v40  ;;  %v1612_v50 = vadd.f32 %v1604_v38, %v1596_v42  ;;  %v5493_v38 = vor.u32 %v6584_v28, %v5490_v29 }
 0x520   : > { %v1515_v53 = vsub.f32 1.5, %v1514_v44  ;;  %v6580_v44 = vld [vmem:[%s10067_s2 + $0x18c] sm:$0xf]  ;;  %v5429_v28 = vor.u32 %v6568_v15, %v5426_v16  ;;  %v1932_v15 = vld [vmem:[%s10116_s4] sm:$0xff] }
 0x521   : > { %v6867_v54 = vpop.eup %6866  ;;  %v7932_v55 = vadd.f32 1e-05, %v1460_v47  ;;  %v7934_v57 = vpack.c.bf16 %v1612_v50, %v1611_v48  ;;  %v1581_v58 = vadd.f32 %v7908_v52, %v1572_v46  ;;  %1905 = vmatpush.bf16.msrb.mxu1 %v5493_v38 }
 0x522   : > { %v1516_v43 = vmul.f32 %v6865_v30, %v1515_v53  ;;  %v1522_v61 = vmul.f32 %v6867_v54, %v7916_v31  ;;  %vm1528_vm12 = vweird.f32 %v6867_v54  ;;  %v1605_v31 = vld [vmem:[%s7921_s23 + $0x10] sm:$0xff]  ;;  %v5477_v53 = vor.u32 %v6580_v44, %v5474_v56  ;;  %v1610_v56 = vld [vmem:[%s7921_s23 + $0x38] sm:$0xff] }
 0x523   : > { %6868 = vrsqrt.f32 %v7932_v55  ;;  %1824 = vmatmul.bf16.vlgmr.msra.gmra.mxu1 %v7934_v57  ;;  %1853 = vmatmul.bf16.vlgmr.msra.gmra.mxu2 %v7934_v57  ;;  %v1589_v12 = vmul.f32 0.2, %v1581_v58  ;;  %vm1529_vm14 = vmor %vm1527_vm13, %vm1528_vm12  ;;  %vm1537_vm0 = vweird.f32 %v7932_v55  ;;  %v1609_v44 = vld [vmem:[%s7921_s23 + $0x30] sm:$0xff] }
 0x524   : > { %v1520_v3 = vsel %vm1519_vm11, %v6865_v30, %v1516_v43  ;;  %v1523_v4 = vmul.f32 %v6867_v54, %v1522_v61  ;;  %1882 = vmatmul.bf16.vlgmr.msrb.gmra.mxu3 %v7934_v57 }
 0x525   : > { %v1565_v6 = vmul.f32 %v7896_v51, %v1520_v3  ;;  %v1597_v27 = vmax.f32 %v1581_v58, %v1589_v12  ;;  %v5458_v58 = vld [vmem:[%s10067_s2 + $0x178] sm:$0xf0]  ;;  %v1470_v3 = vsub.f32 %v7574_v2, %v7733_v0  ;;  %1906 = vmatpush.bf16.msrb.mxu1 %v5477_v53 }
 0x526   : > { %v1524_v8 = vmul.f32 0.5, %v1523_v4  ;;  %v1441_v10 = vpop.f32.mrf.mxu0  ;;  %v5442_v12 = vld [vmem:[%s10067_s2 + $0x158] sm:$0xf0] }
 0x527   : > { %v1573_v13 = vmul.f32 %v1565_v6, %v1468_v5  ;;  %v1461_v14 = vsub.f32 %v1441_v10, %v1453_v7  ;;  %v1613_v41 = vadd.f32 %v1605_v31, %v1597_v27  ;;  %v6572_v10 = vld [vmem:[%s10067_s2 + $0x14c] sm:$0xf] }
 0x528   : > { %v1525_v62 = vsub.f32 1.5, %v1524_v8  ;;  %v5445_v59 = vor.u32 %v6572_v10, %v5442_v12  ;;  %v6564_v31 = vld [vmem:[%s10067_s2 + $0x10c] sm:$0xf] }
 0x529   : > { %v6869_v17 = vpop.eup %6868  ;;  %v7959_v18 = vadd.f32 1e-05, %v1461_v14  ;;  %v1582_v20 = vadd.f32 %v7908_v52, %v1573_v13 }
 0x52a   : > { %v1526_v23 = vmul.f32 %v6867_v54, %v1525_v62  ;;  %v1532_v24 = vmul.f32 %v6869_v17, %v7932_v55  ;;  %vm1538_vm15 = vweird.f32 %v6869_v17  ;;  %v6576_v55 = vld [vmem:[%s10067_s2 + $0x16c] sm:$0xf] }
 0x52b   : > { %6870 = vrsqrt.f32 %v7959_v18  ;;  %v1590_v25 = vmul.f32 0.2, %v1582_v20  ;;  %vm1539_vm1 = vmor %vm1537_vm0, %vm1538_vm15  ;;  %v5461_v6 = vor.u32 %v6576_v55, %v5458_v58  ;;  %vm1547_vm3 = vweird.f32 %v7959_v18 }
 0x52c   : > { %v1530_v30 = vsel %vm1529_vm14, %v6867_v54, %v1526_v23  ;;  %v1533_v22 = vmul.f32 %v6869_v17, %v1532_v24  ;;  %v1607_v23 = vld [vmem:[%s7921_s23 + $0x20] sm:$0xff]  ;;  %v1608_v24 = vld [vmem:[%s7921_s23 + $0x28] sm:$0xff]  ;;  %s10123_s23 = sand.u32 1, %s7000_s22  }
 0x52d   : > { %v1566_v34 = vmul.f32 %v7896_v51, %v1530_v30  ;;  %v1598_v35 = vmax.f32 %v1582_v20, %v1590_v25  ;;  %1907 = vmatpush.bf16.msrb.mxu1 %v5461_v6  ;;  %s5112_s24 = scalar_lea.sflag [#allocation3], %s10123_s23 }
 0x52e   : > { %v1534_v36 = vmul.f32 0.5, %v1533_v22  ;;  %v1444_v37 = vpop.f32.mrf.mxu0 }
 0x52f   : > { %v1574_v39 = vmul.f32 %v1566_v34, %v1469_v32  ;;  %v1462_v40 = vsub.f32 %v1444_v37, %v1454_v33  ;;  %v1614_v42 = vadd.f32 %v1606_v60, %v1598_v35  ;;  %v5410_v60 = vld [vmem:[%s10067_s2 + $0x118] sm:$0xf0] }
 0x530   : > { %v1535_v63 = vsub.f32 1.5, %v1534_v36  ;;  %v5413_v33 = vor.u32 %v6564_v31, %v5410_v60  ;;  %v1472_v36 = vsub.f32 %v7589_v19, %v7770_v21 }
 0x531   : > { %v6871_v45 = vpop.eup %6870  ;;  %v1480_v46 = vadd.f32 1e-05, %v1462_v40  ;;  %v7984_v47 = vpack.c.bf16 %v1614_v42, %v1613_v41  ;;  %v1583_v54 = vadd.f32 %v7908_v52, %v1574_v39  ;;  %1908 = vmatpush.bf16.msrb.mxu1 %v5445_v59 }
 0x532   : > { %v1536_v48 = vmul.f32 %v6869_v17, %v1535_v63  ;;  %v1542_v50 = vmul.f32 %v6871_v45, %v7959_v18  ;;  %vm1548_vm2 = vweird.f32 %v6871_v45  ;;  %v1471_v18 = vsub.f32 %v7581_v11, %v7735_v1 }
 0x533   : > { %6872 = vrsqrt.f32 %v1480_v46  ;;  %1829 = vmatmul.bf16.gmra.mxu1 %v7984_v47  ;;  %1858 = vmatmul.bf16.gmra.mxu2 %v7984_v47  ;;  %v1591_v8 = vmul.f32 0.2, %v1583_v54  ;;  %vm1549_vm4 = vmor %vm1547_vm3, %vm1548_vm2  ;;  %vm1557_vm6 = vweird.f32 %v1480_v46 }
 0x534   : > { %v1540_v43 = vsel %vm1539_vm1, %v6869_v17, %v1536_v48  ;;  %v1543_v61 = vmul.f32 %v6871_v45, %v1542_v50  ;;  %1887 = vmatmul.bf16.gmra.mxu3 %v7984_v47 }
 0x535   : > { %v1567_v4 = vmul.f32 %v7896_v51, %v1540_v43  ;;  %v1599_v62 = vmax.f32 %v1583_v54, %v1591_v8  ;;  %1909 = vmatpush.bf16.msrb.mxu1 %v5429_v28  ;;  %v1939_v28 = vld [vmem:[%s10116_s4 + $0x38] sm:$0xff] }
 0x536   : > { %v1544_v5 = vmul.f32 0.5, %v1543_v61 }
 0x537   : > { %v1575_v7 = vmul.f32 %v1567_v4, %v1470_v3  ;;  %v1615_v30 = vadd.f32 %v1607_v23, %v1599_v62  ;;  %v1936_v23 = vld [vmem:[%s10116_s4 + $0x20] sm:$0xff] }
 0x538   : > { %v1545_v13 = vsub.f32 1.5, %v1544_v5 }
 0x539   : > { %v6873_v2 = vpop.eup %6872  ;;  %v1584_v0 = vadd.f32 %v7908_v52, %v1575_v7  ;;  %1910 = vmatpush.bf16.msrb.mxu1 %v5413_v33 }
 0x53a   : > { %v1546_v14 = vmul.f32 %v6871_v45, %v1545_v13  ;;  %v1552_v9 = vmul.f32 %v6873_v2, %v1480_v46  ;;  %vm1558_vm5 = vweird.f32 %v6873_v2 }
 0x53b   : > { %v1592_v49 = vmul.f32 0.2, %v1584_v0  ;;  %vm1559_vm7 = vmor %vm1557_vm6, %vm1558_vm5  ;;  %vm2555_vm5 = vcmask 261120  }
 0x53c   : > { %v1550_v17 = vsel %vm1549_vm4, %v6871_v45, %v1546_v14  ;;  %v1553_v20 = vmul.f32 %v6873_v2, %v1552_v9 }
 0x53d   : > { %v1568_v26 = vmul.f32 %v7896_v51, %v1550_v17  ;;  %v1600_v25 = vmax.f32 %v1584_v0, %v1592_v49  ;;  %v1934_v17 = vld [vmem:[%s10116_s4 + $0x10] sm:$0xff] }
 0x53e   : > { %v1554_v27 = vmul.f32 0.5, %v1553_v20 }
 0x53f   : > { %v1576_v29 = vmul.f32 %v1568_v26, %v1471_v18  ;;  %v1616_v22 = vadd.f32 %v1608_v24, %v1600_v25  ;;  %v1938_v18 = vld [vmem:[%s10116_s4 + $0x30] sm:$0xff]  ;;  %v1933_v26 = vld [vmem:[%s10116_s4 + $0x8] sm:$0xff]  ;;  %v1935_v25 = vld [vmem:[%s10116_s4 + $0x18] sm:$0xff] }
 0x540   : > { %v1555_v32 = vsub.f32 1.5, %v1554_v27  ;;  %v1937_v27 = vld [vmem:[%s10116_s4 + $0x28] sm:$0xff]  ;;  %s10097_s4 = sand.u32 1, %s7000_s22  }
 0x541   : > { %v1621_v11 = vpack.c.bf16 %v1616_v22, %v1615_v30  ;;  %v1585_v34 = vadd.f32 %v7908_v52, %v1576_v29  ;;  %s8851_s19 = sshll.u32 %s10097_s4, 2 }
 0x542   : > { %v1556_v1 = vmul.f32 %v6873_v2, %v1555_v32  ;;  %s10098_s26 = scalar_lea.vmem [#allocation2], %s8851_s19  ;;  %s10122_s4 = scalar_lea.vmem [#allocation2], %s8851_s19 }
 0x543   : > { %1834 = vmatmul.bf16.gmra.mxu1 %v1621_v11  ;;  %1863 = vmatmul.bf16.gmra.mxu2 %v1621_v11  ;;  %v1593_v39 = vmul.f32 0.2, %v1585_v34  ;;  %s5128_s18 = sshll.u32 %s10122_s4, 4  ;;  %s5129_s18 = int_to_ptr.vmem [resolvable:$true] %s5128_s18 }
 0x544   : > { %v1560_v35 = vsel %vm1559_vm7, %v6873_v2, %v1556_v1  ;;  %1892 = vmatmul.bf16.gmra.mxu3 %v1621_v11 }
 0x545   : > { %v1569_v37 = vmul.f32 %v7896_v51, %v1560_v35  ;;  %v1601_v42 = vmax.f32 %v1585_v34, %v1593_v39 }
 0x547   : > { %v1577_v38 = vmul.f32 %v1569_v37, %v1472_v36  ;;  %v1617_v45 = vadd.f32 %v1609_v44, %v1601_v42 }
 0x549   : > { %v1586_v40 = vadd.f32 %v7908_v52, %v1577_v38 }
 0x54b   : > { %v1594_v41 = vmul.f32 0.2, %v1586_v40 }
 0x54d   : > { %v1602_v63 = vmax.f32 %v1586_v40, %v1594_v41 }
 0x54f   : > { %v1618_v46 = vadd.f32 %v1610_v56, %v1602_v63 }
 0x551   : > { %v1622_v48 = vpack.c.bf16 %v1618_v46, %v1617_v45 }
 0x553   : > { %1839 = vmatmul.bf16.gmra.mxu1 %v1622_v48  ;;  %1868 = vmatmul.bf16.gmra.mxu2 %v1622_v48 }
 0x554   : > { %1897 = vmatmul.bf16.gmra.mxu3 %v1622_v48 }
 0x563   : > { %1911 = vmatmul.bf16.vlgmr.msrb.gmra.mxu1 %v7934_v57 }
 0x573   : > { %1916 = vmatmul.bf16.gmra.mxu1 %v7984_v47 }
 0x583   : > { %1921 = vmatmul.bf16.gmra.mxu1 %v1621_v11 }
 0x593   : > { %1926 = vmatmul.bf16.gmra.mxu1 %v1622_v48 }
 0x5a0   : > { %v1825_v19 = vpop.f32.mrf.mxu1 }
 0x5a6   : > { %v1854_v21 = vpop.f32.mrf.mxu2 }
 0x5a7   : > { %v1883_v7 = vpop.f32.mrf.mxu3 }
 0x5a8   : > { %v1827_v51 = vpop.f32.mrf.mxu1 }
 0x5ae   : > { %v1856_v52 = vpop.f32.mrf.mxu2 }
 0x5af   : > { %v1885_v10 = vpop.f32.mrf.mxu3 }
 0x5b0   : > { %v1830_v50 = vpop.f32.mrf.mxu1 }
 0x5b6   : > { %v1859_v53 = vpop.f32.mrf.mxu2 }
 0x5b7   : > { %v1888_v13 = vpop.f32.mrf.mxu3 }
 0x5b8   : > { %v1832_v54 = vpop.f32.mrf.mxu1 }
 0x5be   : > { %v1861_v43 = vpop.f32.mrf.mxu2 }
 0x5bf   : > { %v1890_v0 = vpop.f32.mrf.mxu3 }
 0x5c0   : > { %v1835_v61 = vpop.f32.mrf.mxu1 }
 0x5c6   : > { %v1864_v55 = vpop.f32.mrf.mxu2 }
 0x5c7   : > { %v1893_v59 = vpop.f32.mrf.mxu3 }
 0x5c8   : > { %v1837_v58 = vpop.f32.mrf.mxu1 }
 0x5ce   : > { %v1866_v3 = vpop.f32.mrf.mxu2 }
 0x5cf   : > { %v1895_v62 = vpop.f32.mrf.mxu3 }
 0x5d0   : > { %v1840_v4 = vpop.f32.mrf.mxu1 }
 0x5d6   : > { %v1869_v5 = vpop.f32.mrf.mxu2 }
 0x5d7   : > { %v1898_v20 = vpop.f32.mrf.mxu3 }
 0x5d8   : > { %v1842_v6 = vpop.f32.mrf.mxu1 }
 0x5de   : > { %v1871_v57 = vpop.f32.mrf.mxu2 }
 0x5df   : > { %1940 = vmatpush.msrb.mxu2 %v1871_v57  ;;  %v1900_v24 = vpop.f32.mrf.mxu3 }
 0x5e0   : > { %v1912_v47 = vpop.f32.mrf.mxu1 }
 0x5e1   : > { %1941 = vmatpush.msrb.mxu2 %v1869_v5 }
 0x5e3   : > { %1942 = vmatpush.msrb.mxu2 %v1866_v3 }
 0x5e5   : > { %1943 = vmatpush.msrb.mxu2 %v1864_v55 }
 0x5e7   : > { %1944 = vmatpush.msrb.mxu2 %v1861_v43 }
 0x5e8   : > { %v1914_v8 = vpop.f32.mrf.mxu1 }
 0x5e9   : > { %1945 = vmatpush.msrb.mxu2 %v1859_v53 }
 0x5eb   : > { %1946 = vmatpush.msrb.mxu2 %v1856_v52 }
 0x5ed   : > { %1947 = vmatpush.msrb.mxu2 %v1854_v21 }
 0x5ef   : > { %1948 = vmatpush.msrb.mxu2 %v1842_v6 }
 0x5f0   : > { %v1917_v12 = vpop.f32.mrf.mxu1 }
 0x5f1   : > { %1949 = vmatpush.msrb.mxu2 %v1840_v4 }
 0x5f3   : > { %1950 = vmatpush.msrb.mxu2 %v1837_v58 }
 0x5f5   : > { %1951 = vmatpush.msrb.mxu2 %v1835_v61 }
 0x5f7   : > { %1952 = vmatpush.msrb.mxu2 %v1832_v54 }
 0x5f8   : > { %v1919_v2 = vpop.f32.mrf.mxu1 }
 0x5f9   : > { %1953 = vmatpush.msrb.mxu2 %v1830_v50 }
 0x5fb   : > { %1954 = vmatpush.msrb.mxu2 %v1827_v51 }
 0x5fd   : > { %1955 = vmatpush.msrb.mxu2 %v1825_v19 }
 0x5fe   : > { %1956 = vmatmul.f32.vlgmr.msrb.gmra.mxu2 %v1932_v15 }
 0x600   : > { %v1922_v14 = vpop.f32.mrf.mxu1 }
 0x606   : > { %1959 = vmatmul.f32.gmra.mxu2 %v1934_v17 }
 0x608   : > { %v1924_v9 = vpop.f32.mrf.mxu1 }
 0x60e   : > { %1962 = vmatmul.f32.gmra.mxu2 %v1936_v23 }
 0x610   : > { %v1927_v49 = vpop.f32.mrf.mxu1 }
 0x616   : > { %1965 = vmatmul.f32.gmra.mxu2 %v1938_v18 }
 0x618   : > { %v1929_v16 = vpop.f32.mrf.mxu1 }
 0x619   : > { %1969 = vmatpush.msra.mxu3 %v1929_v16 }
 0x61b   : > { %1970 = vmatpush.msra.mxu3 %v1927_v49 }
 0x61d   : > { %1971 = vmatpush.msra.mxu3 %v1924_v9 }
 0x61f   : > { %1972 = vmatpush.msra.mxu3 %v1922_v14 }
 0x621   : > { %1973 = vmatpush.msra.mxu3 %v1919_v2 }
 0x623   : > { %1974 = vmatpush.msra.mxu3 %v1917_v12 }
 0x625   : > { %1975 = vmatpush.msra.mxu3 %v1914_v8 }
 0x627   : > { %1976 = vmatpush.msra.mxu3 %v1912_v47 }
 0x629   : > { %1977 = vmatpush.msra.mxu3 %v1900_v24 }
 0x62b   : > { %1978 = vmatpush.msra.mxu3 %v1898_v20 }
 0x62d   : > { %1979 = vmatpush.msra.mxu3 %v1895_v62 }
 0x62f   : > { %1980 = vmatpush.msra.mxu3 %v1893_v59 }
 0x631   : > { %1981 = vmatpush.msra.mxu3 %v1890_v0 }
 0x633   : > { %1982 = vmatpush.msra.mxu3 %v1888_v13 }
 0x635   : > { %1983 = vmatpush.msra.mxu3 %v1885_v10 }
 0x637   : > { %1984 = vmatpush.msra.mxu3 %v1883_v7 }
 0x638   : > { %1985 = vmatmul.f32.vlgmr.msra.gmra.mxu3 %v1933_v26 }
 0x640   : > { %1988 = vmatmul.f32.gmra.mxu3 %v1935_v25 }
 0x648   : > { %1991 = vmatmul.f32.gmra.mxu3 %v1937_v27 }
 0x650   : > { %1994 = vmatmul.f32.gmra.mxu3 %v1939_v28 }
 0x681   : > { %v1957_v29 = vpop.f32.mrf.mxu2 }
 0x689   : > { %v1960_v22 = vpop.f32.mrf.mxu2 }
 0x691   : > { %v1963_v11 = vpop.f32.mrf.mxu2 }
 0x699   : > { %v1966_v35 = vpop.f32.mrf.mxu2 }
 0x6bb   : > { %v1986_v30 = vpop.f32.mrf.mxu3 }
 0x6bc   : > { %v8078_v39 = vadd.f32 %v1986_v30, %v1957_v29  ;;  %v2074_v29 = vld [vmem:[%s10077_s12] sm:$0xff]  ;;  %v2075_v30 = vld [vmem:[%s10077_s12 + $0x8] sm:$0xff] }
 0x6be   : > { %v1998_v40 = vmul.f32 %v8078_v39, %v8078_v39 }
 0x6c3   : > { %v1989_v31 = vpop.f32.mrf.mxu3 }
 0x6c4   : > { %v8059_v60 = vadd.f32 %v1989_v31, %v1960_v22  ;;  %v2076_v22 = vld [vmem:[%s10077_s12 + $0x10] sm:$0xff]  ;;  %v2077_v31 = vld [vmem:[%s10077_s12 + $0x18] sm:$0xff] }
 0x6c6   : > { %v1999_v32 = vmul.f32 %v8059_v60, %v8059_v60 }
 0x6c8   : > { %2012 = vrot.lane.b32.xlu0 %v1999_v32, %s10117_s20 }
 0x6cb   : > { %v1992_v1 = vpop.f32.mrf.mxu3 }
 0x6cc   : > { %v8064_v33 = vadd.f32 %v1992_v1, %v1963_v11  ;;  %v2079_v11 = vld [vmem:[%s10077_s12 + $0x28] sm:$0xff]  ;;  %v2080_v1 = vld [vmem:[%s10077_s12 + $0x30] sm:$0xff] }
 0x6ce   : > { %v2000_v34 = vmul.f32 %v8064_v33, %v8064_v33 }
 0x6d0   : > { %2014 = vrot.lane.b32.xlu2 %v2000_v34, %s10117_s20  ;;  %2006 = vrot.lane.b32.xlu0 %v8064_v33, %s10117_s20 }
 0x6d3   : > { %v1995_v36 = vpop.f32.mrf.mxu3 }
 0x6d4   : > { %v8071_v37 = vadd.f32 %v1995_v36, %v1966_v35 }
 0x6d6   : > { %v2001_v38 = vmul.f32 %v8071_v37, %v8071_v37 }
 0x6d8   : > { %2016 = vrot.lane.b32.xlu1 %v2001_v38, %s10117_s20  ;;  %2008 = vrot.lane.b32.xlu2 %v8071_v37, %s10117_s20 }
 0x6e0   : > { %2002 = vrot.lane.b32.xlu2 %v8078_v39, %s10117_s20  ;;  %2010 = vrot.lane.b32.xlu1 %v1998_v40, %s10117_s20 }
 0x6e8   : > { %2004 = vrot.lane.b32.xlu1 %v8059_v60, %s10117_s20 }
 0x72a   : > { %v2015_v41 = vpop.permute.xlu2 %2014 }
 0x72b   : > { %v2024_v42 = vadd.f32 %v2015_v41, %v2000_v34  ;;  %v2081_v34 = vld [vmem:[%s10077_s12 + $0x38] sm:$0xff]  ;;  %v6625_v41 = vld [vmem:[%s10067_s2 + $0x2ec] sm:$0xf0] }
 0x72d   : > { %2038 = vrot.lane.b32.xlu1 %v2024_v42, %s10118_s27 }
 0x732   : > { %v2009_v44 = vpop.permute.xlu2 %2008 }
 0x733   : > { %v2021_v56 = vadd.f32 %v2009_v44, %v8071_v37 }
 0x735   : > { %2032 = vrot.lane.b32.xlu1 %v2021_v56, %s10118_s27 }
 0x73a   : > { %v2013_v63 = vpop.permute.xlu0 %2012  ;;  %v2003_v45 = vpop.permute.xlu2 %2002 }
 0x73b   : > { %v2023_v46 = vadd.f32 %v2013_v63, %v1999_v32  ;;  %v2018_v48 = vadd.f32 %v2003_v45, %v8078_v39  ;;  %v2078_v32 = vld [vmem:[%s10077_s12 + $0x20] sm:$0xff]  ;;  %v5690_v63 = vld [vmem:[%s10067_s2 + $0x2e8] sm:$0xf]  ;;  %v6626_v45 = vld [vmem:[%s10067_s2 + $0x2f4] sm:$0xf0] }
 0x73d   : > { %2036 = vrot.lane.b32.xlu2 %v2023_v46, %s10118_s27  ;;  %2026 = vrot.lane.b32.xlu1 %v2018_v48, %s10118_s27 }
 0x742   : > { %v2007_v19 = vpop.permute.xlu0 %2006 }
 0x743   : > { %v2020_v21 = vadd.f32 %v2007_v19, %v8064_v33  ;;  %v5666_v19 = vld [vmem:[%s10067_s2 + $0x2c0] sm:$0xf] }
 0x745   : > { %2030 = vrot.lane.b32.xlu2 %v2020_v21, %s10118_s27 }
 0x74a   : > { %v2017_v51 = vpop.permute.xlu1 %2016 }
 0x74b   : > { %v2025_v52 = vadd.f32 %v2017_v51, %v2001_v38  ;;  %v6619_v51 = vld [vmem:[%s10067_s2 + $0x2c4] sm:$0xf] }
 0x74d   : > { %2040 = vrot.lane.b32.xlu0 %v2025_v52, %s10118_s27 }
 0x752   : > { %v2011_v50 = vpop.permute.xlu1 %2010 }
 0x753   : > { %v2022_v53 = vadd.f32 %v2011_v50, %v1998_v40  ;;  %v5682_v40 = vld [vmem:[%s10067_s2 + $0x2e0] sm:$0xf]  ;;  %v5668_v50 = vld [vmem:[%s10067_s2 + $0x2d0] sm:$0xf0] }
 0x754   : > { %v5683_v44 = vor.u32 %v6625_v41, %v5682_v40 }
 0x755   : > { %2034 = vrot.lane.b32.xlu0 %v2022_v53, %s10118_s27 }
 0x756   : > { %2424 = vmatpush.bf16.msrb.mxu3 %v5683_v44 }
 0x75a   : > { %v2005_v54 = vpop.permute.xlu1 %2004 }
 0x75b   : > { %v2019_v43 = vadd.f32 %v2005_v54, %v8059_v60  ;;  %v6622_v54 = vld [vmem:[%s10067_s2 + $0x2d4] sm:$0xf0] }
 0x75d   : > { %2028 = vrot.lane.b32.xlu0 %v2019_v43, %s10118_s27 }
 0x797   : > { %v2037_v61 = vpop.permute.xlu2 %2036 }
 0x798   : > { %v2047_v55 = vadd.f32 %v2037_v61, %v2023_v46 }
 0x79a   : > { %2060 = vrot.lane.b32.xlu1 %v2047_v55, %s10119_s30 }
 0x79f   : > { %v2031_v58 = vpop.permute.xlu2 %2030  ;;  %v2039_v3 = vpop.permute.xlu1 %2038 }
 0x7a0   : > { %v2044_v4 = vadd.f32 %v2031_v58, %v2020_v21  ;;  %v2048_v5 = vadd.f32 %v2039_v3, %v2024_v42  ;;  %v6623_v42 = vld [vmem:[%s10067_s2 + $0x2e4] sm:$0xf]  ;;  %v6621_v21 = vld [vmem:[%s10067_s2 + $0x2cc] sm:$0xf0]  ;;  %v5650_v58 = vld [vmem:[%s10067_s2 + $0x2a0] sm:$0xf] }
 0x7a1   : > { %v6617_v3 = vld [vmem:[%s10067_s2 + $0x2ac] sm:$0xf0] }
 0x7a2   : > { %2054 = vrot.lane.b32.xlu1 %v2044_v4, %s10119_s30  ;;  %2062 = vrot.lane.b32.xlu0 %v2048_v5, %s10119_s30 }
 0x7a7   : > { %v2033_v6 = vpop.permute.xlu1 %2032 }
 0x7a8   : > { %v2045_v57 = vadd.f32 %v2033_v6, %v2021_v56  ;;  %v5684_v56 = vld [vmem:[%s10067_s2 + $0x2f0] sm:$0xf0] }
 0x7a9   : > { %v5687_v46 = vor.u32 %v6623_v42, %v5684_v56  ;;  %v5652_v6 = vld [vmem:[%s10067_s2 + $0x2b0] sm:$0xf0]  ;;  %v5586_v56 = vld [vmem:[%s10067_s2 + $0x220] sm:$0xf] }
 0x7aa   : > { %2056 = vrot.lane.b32.xlu0 %v2045_v57, %s10119_s30 }
 0x7ab   : > { %2443 = vmatpush.bf16.msra.mxu0 %v5687_v46 }
 0x7af   : > { %v2027_v47 = vpop.permute.xlu1 %2026 }
 0x7b0   : > { %v2042_v7 = vadd.f32 %v2027_v47, %v2018_v48  ;;  %v5691_v48 = vor.u32 %v6626_v45, %v5690_v63  ;;  %v6601_v63 = vld [vmem:[%s10067_s2 + $0x22c] sm:$0xf0]  ;;  %v6599_v45 = vld [vmem:[%s10067_s2 + $0x224] sm:$0xf] }
 0x7b2   : > { %2050 = vrot.lane.b32.xlu0 %v2042_v7, %s10119_s30  ;;  %2462 = vmatpush.bf16.msra.mxu1 %v5691_v48  ;;  %v5587_v48 = vor.u32 %v6601_v63, %v5586_v56 }
 0x7bf   : > { %v2041_v8 = vpop.permute.xlu0 %2040 }
 0x7c0   : > { %v2049_v10 = vadd.f32 %v2041_v8, %v2025_v52  ;;  %v5667_v52 = vor.u32 %v6621_v21, %v5666_v19  ;;  %v5588_v19 = vld [vmem:[%s10067_s2 + $0x230] sm:$0xf0]  ;;  %v5594_v21 = vld [vmem:[%s10067_s2 + $0x228] sm:$0xf] }
 0x7c2   : > { %2064 = vrot.lane.b32.xlu2 %v2049_v10, %s10119_s30  ;;  %2425 = vmatpush.bf16.msrb.mxu3 %v5667_v52  ;;  %v5591_v52 = vor.u32 %v6599_v45, %v5588_v19 }
 0x7c7   : > { %v2035_v12 = vpop.permute.xlu0 %2034 }
 0x7c8   : > { %v2046_v13 = vadd.f32 %v2035_v12, %v2022_v53  ;;  %v5674_v53 = vld [vmem:[%s10067_s2 + $0x2c8] sm:$0xf]  ;;  %v6613_v12 = vld [vmem:[%s10067_s2 + $0x28c] sm:$0xf0] }
 0x7c9   : > { %v5675_v61 = vor.u32 %v6622_v54, %v5674_v53 }
 0x7ca   : > { %2058 = vrot.lane.b32.xlu2 %v2046_v13, %s10119_s30 }
 0x7cb   : > { %2463 = vmatpush.bf16.msra.mxu1 %v5675_v61  ;;  %v5570_v61 = vld [vmem:[%s10067_s2 + $0x200] sm:$0xf] }
 0x7cf   : > { %v2029_v2 = vpop.permute.xlu0 %2028 }
 0x7d0   : > { %v2043_v0 = vadd.f32 %v2029_v2, %v2019_v43  ;;  %v5671_v43 = vor.u32 %v6619_v51, %v5668_v50  ;;  %v6602_v51 = vld [vmem:[%s10067_s2 + $0x234] sm:$0xf0] }
 0x7d1   : > { %v5595_v50 = vor.u32 %v6602_v51, %v5594_v21 }
 0x7d2   : > { %2052 = vrot.lane.b32.xlu2 %v2043_v0, %s10119_s30  ;;  %2444 = vmatpush.bf16.msra.mxu0 %v5671_v43 }
 0x80c   : > { %v2061_v9 = vpop.permute.xlu1 %2060 }
 0x80d   : > { %v2071_v15 = vadd.f32 %v2061_v9, %v2047_v55  ;;  %v6614_v9 = vld [vmem:[%s10067_s2 + $0x294] sm:$0xf0] }
 0x814   : > { %v2063_v14 = vpop.permute.xlu0 %2062  ;;  %v2055_v23 = vpop.permute.xlu1 %2054 }
 0x815   : > { %v2072_v62 = vadd.f32 %v2063_v14, %v2048_v5  ;;  %v2068_v18 = vadd.f32 %v2055_v23, %v2044_v4  ;;  %v6615_v4 = vld [vmem:[%s10067_s2 + $0x2a4] sm:$0xf]  ;;  %v5651_v5 = vor.u32 %v6617_v3, %v5650_v58  ;;  %v5642_v14 = vld [vmem:[%s10067_s2 + $0x288] sm:$0xf]  ;;  %v6597_v58 = vld [vmem:[%s10067_s2 + $0x20c] sm:$0xf0] }
 0x816   : > { %v5655_v47 = vor.u32 %v6615_v4, %v5652_v6  ;;  %v6595_v3 = vld [vmem:[%s10067_s2 + $0x204] sm:$0xf]  ;;  %v5571_v4 = vor.u32 %v6597_v58, %v5570_v61  ;;  %v5578_v6 = vld [vmem:[%s10067_s2 + $0x208] sm:$0xf] }
 0x817   : > { %2426 = vmatpush.bf16.msrb.mxu3 %v5651_v5  ;;  %v5572_v5 = vld [vmem:[%s10067_s2 + $0x210] sm:$0xf0] }
 0x818   : > { %2445 = vmatpush.bf16.msra.mxu0 %v5655_v47  ;;  %v5575_v47 = vor.u32 %v6595_v3, %v5572_v5 }
 0x81c   : > { %v2065_v59 = vpop.permute.xlu2 %2064  ;;  %v2057_v16 = vpop.permute.xlu0 %2056 }
 0x81d   : > { %v2073_v49 = vadd.f32 %v2065_v59, %v2049_v10  ;;  %v2069_v24 = vadd.f32 %v2057_v16, %v2045_v57  ;;  %v5658_v57 = vld [vmem:[%s10067_s2 + $0x2a8] sm:$0xf]  ;;  %v5634_v10 = vld [vmem:[%s10067_s2 + $0x280] sm:$0xf] }
 0x81e   : > { %v5635_v2 = vor.u32 %v6613_v12, %v5634_v10  ;;  %v5618_v16 = vld [vmem:[%s10067_s2 + $0x260] sm:$0xf] }
 0x81f   : > { %2115 = vmatpush.msra.mxu2 %v2073_v49  ;;  %v5643_v49 = vor.u32 %v6614_v9, %v5642_v14 }
 0x820   : > { %2427 = vmatpush.bf16.msrb.mxu3 %v5635_v2  ;;  %v6624_v2 = vld [vmem:[%s10067_s2 + $0x2ec] sm:$0xf] }
 0x821   : > { %2116 = vmatpush.msra.mxu2 %v2072_v62 }
 0x823   : > { %2117 = vmatpush.msra.mxu2 %v2071_v15 }
 0x824   : > { %v2059_v17 = vpop.permute.xlu2 %2058  ;;  %v2051_v26 = vpop.permute.xlu0 %2050 }
 0x825   : > { %v2070_v20 = vadd.f32 %v2059_v17, %v2046_v13  ;;  %v2066_v28 = vadd.f32 %v2051_v26, %v2042_v7  ;;  %v6618_v7 = vld [vmem:[%s10067_s2 + $0x2b4] sm:$0xf0]  ;;  %v6611_v13 = vld [vmem:[%s10067_s2 + $0x284] sm:$0xf]  ;;  %v6609_v17 = vld [vmem:[%s10067_s2 + $0x26c] sm:$0xf0] }
 0x826   : > { %v5659_v8 = vor.u32 %v6618_v7, %v5658_v57  ;;  %v5626_v26 = vld [vmem:[%s10067_s2 + $0x268] sm:$0xf]  ;;  %v6598_v7 = vld [vmem:[%s10067_s2 + $0x214] sm:$0xf0] }
 0x827   : > { %2118 = vmatpush.msra.mxu2 %v2070_v20  ;;  %v6607_v20 = vld [vmem:[%s10067_s2 + $0x264] sm:$0xf]  ;;  %v5579_v10 = vor.u32 %v6598_v7, %v5578_v6  ;;  %v5596_v7 = vld [vmem:[%s10067_s2 + $0x238] sm:$0xf0] }
 0x828   : > { %2464 = vmatpush.bf16.msra.mxu1 %v5659_v8 }
 0x829   : > { %2119 = vmatpush.msra.mxu2 %v2069_v24  ;;  %v5619_v24 = vor.u32 %v6609_v17, %v5618_v16  ;;  %v8319_v16 = vld [vmem:[%s10079_s14 + $0x2] ss:$0 sm:$0xff] }
 0x82b   : > { %2120 = vmatpush.msra.mxu2 %v2068_v18  ;;  %v5620_v18 = vld [vmem:[%s10067_s2 + $0x270] sm:$0xf0]  ;;  %2428 = vmatpush.bf16.msrb.mxu3 %v5619_v24 }
 0x82c   : > { %v2053_v25 = vpop.permute.xlu2 %2052  ;;  %2465 = vmatpush.bf16.msra.mxu1 %v5643_v49  ;;  %v5676_v49 = vld [vmem:[%s10067_s2 + $0x2d8] sm:$0xf0] }
 0x82d   : > { %v2067_v27 = vadd.f32 %v2053_v25, %v2043_v0  ;;  %v5636_v0 = vld [vmem:[%s10067_s2 + $0x290] sm:$0xf0]  ;;  %v6610_v25 = vld [vmem:[%s10067_s2 + $0x274] sm:$0xf0] }
 0x82e   : > { %v5639_v59 = vor.u32 %v6611_v13, %v5636_v0  ;;  %v5692_v0 = vld [vmem:[%s10067_s2 + $0x2f8] sm:$0xf0] }
 0x82f   : > { %2121 = vmatpush.msra.mxu2 %v2067_v27  ;;  %v5623_v27 = vor.u32 %v6607_v20, %v5620_v18  ;;  %v5695_v9 = vor.u32 %v6624_v2, %v5692_v0  ;;  %v6616_v18 = vld [vmem:[%s10067_s2 + $0x2ac] sm:$0xf] }
 0x830   : > { %2446 = vmatpush.bf16.msra.mxu0 %v5639_v59  ;;  %v6620_v59 = vld [vmem:[%s10067_s2 + $0x2cc] sm:$0xf] }
 0x831   : > { %2122 = vmatpush.msra.mxu2 %v2066_v28  ;;  %v5627_v28 = vor.u32 %v6610_v25, %v5626_v26  ;;  %v5679_v20 = vor.u32 %v6620_v59, %v5676_v49  ;;  %v5660_v26 = vld [vmem:[%s10067_s2 + $0x2b8] sm:$0xf0]  ;;  %v6596_v49 = vld [vmem:[%s10067_s2 + $0x20c] sm:$0xf] }
 0x832   : > { %5526 = vmatmul.msk.f32.vlgmr.msra.gmra.mxu2 %vm2082_vm8, %v2074_v29 }
 0x833   : > { %2466 = vmatpush.bf16.msra.mxu1 %v5627_v28 }
 0x834   : > { %2447 = vmatpush.bf16.msra.mxu0 %v5623_v27 }
 0x83a   : > { %5527 = vmatmul.msk.f32.gmra.mxu2 %vm2082_vm8, %v2075_v30  ;;  %v5602_v30 = vld [vmem:[%s10067_s2 + $0x240] sm:$0xf] }
 0x842   : > { %5528 = vmatmul.msk.f32.gmra.mxu2 %vm2082_vm8, %v2076_v22  ;;  %v6605_v22 = vld [vmem:[%s10067_s2 + $0x24c] sm:$0xf0] }
 0x84a   : > { %5529 = vmatmul.msk.f32.gmra.mxu2 %vm2082_vm8, %v2077_v31  ;;  %v6603_v31 = vld [vmem:[%s10067_s2 + $0x244] sm:$0xf] }
 0x852   : > { %5530 = vmatmul.msk.f32.gmra.mxu2 %vm2082_vm8, %v2078_v32  ;;  %v5603_v32 = vor.u32 %v6605_v22, %v5602_v30 }
 0x854   : > { %2429 = vmatpush.bf16.msrb.mxu3 %v5603_v32  ;;  %v6612_v32 = vld [vmem:[%s10067_s2 + $0x28c] sm:$0xf] }
 0x858   : > { %2430 = vmatpush.bf16.msrb.mxu3 %v5587_v48 }
 0x85a   : > { %5531 = vmatmul.msk.f32.gmra.mxu2 %vm2082_vm8, %v2079_v11  ;;  %v5604_v11 = vld [vmem:[%s10067_s2 + $0x250] sm:$0xf0] }
 0x85b   : > { %v5607_v40 = vor.u32 %v6603_v31, %v5604_v11  ;;  %v5644_v11 = vld [vmem:[%s10067_s2 + $0x298] sm:$0xf0] }
 0x85c   : > { %2431 = vmatpush.bf16.msrb.mxu3 %v5571_v4  ;;  %v5647_v63 = vor.u32 %v6612_v32, %v5644_v11 }
 0x85d   : > { %2448 = vmatpush.bf16.msra.mxu0 %v5607_v40 }
 0x860   : > { %2481 = vmatpush.bf16.msra.mxu3 %v5695_v9 }
 0x861   : > { %2449 = vmatpush.bf16.msra.mxu0 %v5591_v52 }
 0x862   : > { %5532 = vmatmul.msk.f32.gmra.mxu2 %vm2082_vm8, %v2080_v1  ;;  %v5610_v1 = vld [vmem:[%s10067_s2 + $0x248] sm:$0xf] }
 0x864   : > { %2482 = vmatpush.bf16.msra.mxu3 %v5679_v20 }
 0x865   : > { %2450 = vmatpush.bf16.msra.mxu0 %v5575_v47  ;;  %v6600_v47 = vld [vmem:[%s10067_s2 + $0x22c] sm:$0xf] }
 0x86a   : > { %5533 = vmatmul.msk.f32.gmra.mxu2 %vm2082_vm8, %v2081_v34  ;;  %v6606_v34 = vld [vmem:[%s10067_s2 + $0x254] sm:$0xf0] }
 0x86b   : > { %v5611_v41 = vor.u32 %v6606_v34, %v5610_v1 }
 0x86d   : > { %2467 = vmatpush.bf16.msra.mxu1 %v5611_v41 }
 0x871   : > { %2468 = vmatpush.bf16.msra.mxu1 %v5595_v50 }
 0x875   : > { %2469 = vmatpush.bf16.msra.mxu1 %v5579_v10 }
 0x8b5   : > { %v8139_v35 = vpop.f32.mrf.mxu2 }
 0x8b6   : > { %v2148_v62 = vmul.f32 %v8139_v35, %v8139_v35  ;;  %v2159_v1 = vsub.f32 %v8078_v39, %v8139_v35  ;;  %v6608_v39 = vld [vmem:[%s10067_s2 + $0x26c] sm:$0xf]  ;;  %v5628_v35 = vld [vmem:[%s10067_s2 + $0x278] sm:$0xf0] }
 0x8b7   : > { %v5631_v50 = vor.u32 %v6608_v39, %v5628_v35  ;;  %v2500_v39 = vld [vmem:[%s10120_s5] sm:$0xff]  ;;  %v2501_v35 = vld [vmem:[%s10120_s5 + $0x8] sm:$0xff] }
 0x8bd   : > { %v8141_v36 = vpop.f32.mrf.mxu2 }
 0x8be   : > { %v2149_v42 = vmul.f32 %v8141_v36, %v8141_v36  ;;  %v2160_v21 = vsub.f32 %v8059_v60, %v8141_v36 }
 0x8c5   : > { %v8143_v38 = vpop.f32.mrf.mxu2 }
 0x8c6   : > { %v2150_v8 = vmul.f32 %v8143_v38, %v8143_v38  ;;  %v2161_v9 = vsub.f32 %v8064_v33, %v8143_v38 }
 0x8cd   : > { %v8181_v55 = vpop.f32.mrf.mxu2 }
 0x8ce   : > { %v2151_v30 = vmul.f32 %v8181_v55, %v8181_v55  ;;  %v2162_v38 = vsub.f32 %v8071_v37, %v8181_v55 }
 0x8d5   : > { %v2136_v15 = vpop.f32.mrf.mxu2 }
 0x8d6   : > { %v2152_v23 = vsub.f32 %v2136_v15, %v2148_v62 }
 0x8d8   : > { %v8239_v29 = vadd.f32 1e-05, %v2152_v23 }
 0x8da   : > { %6874 = vrsqrt.f32 %v8239_v29  ;;  %vm2173_vm10 = vweird.f32 %v8239_v29 }
 0x8dd   : > { %v2139_v44 = vpop.f32.mrf.mxu2 }
 0x8de   : > { %v2153_v46 = vsub.f32 %v2139_v44, %v2149_v42  ;;  %v8343_v44 = vld [vmem:[%s10079_s14 + $0x3] ss:$0 sm:$0xff] }
 0x8e0   : > { %v6875_v53 = vpop.eup %6874  ;;  %v8280_v54 = vadd.f32 1e-05, %v2153_v46 }
 0x8e1   : > { %v2168_v43 = vmul.f32 %v6875_v53, %v8239_v29  ;;  %vm2174_vm9 = vweird.f32 %v6875_v53  ;;  %v5663_v29 = vor.u32 %v6616_v18, %v5660_v26 }
 0x8e2   : > { %6876 = vrsqrt.f32 %v8280_v54  ;;  %vm2175_vm11 = vmor %vm2173_vm10, %vm2174_vm9  ;;  %vm2183_vm13 = vweird.f32 %v8280_v54 }
 0x8e3   : > { %v2169_v57 = vmul.f32 %v6875_v53, %v2168_v43  ;;  %2483 = vmatpush.bf16.msra.mxu3 %v5663_v29  ;;  %v5612_v43 = vld [vmem:[%s10067_s2 + $0x258] sm:$0xf0] }
 0x8e5   : > { %v2170_v12 = vmul.f32 0.5, %v2169_v57  ;;  %v2142_v13 = vpop.f32.mrf.mxu2 }
 0x8e6   : > { %v2154_v14 = vsub.f32 %v2142_v13, %v2150_v8 }
 0x8e7   : > { %v2171_v62 = vsub.f32 1.5, %v2170_v12  ;;  %2484 = vmatpush.bf16.msra.mxu3 %v5647_v63 }
 0x8e8   : > { %v6877_v15 = vpop.eup %6876  ;;  %v2165_v17 = vadd.f32 1e-05, %v2154_v14  ;;  %v5599_v14 = vor.u32 %v6600_v47, %v5596_v7 }
 0x8e9   : > { %v2172_v23 = vmul.f32 %v6875_v53, %v2171_v62  ;;  %v2178_v24 = vmul.f32 %v6877_v15, %v8280_v54  ;;  %vm2184_vm12 = vweird.f32 %v6877_v15  ;;  %v6604_v54 = vld [vmem:[%s10067_s2 + $0x24c] sm:$0xf]  ;;  %v5580_v62 = vld [vmem:[%s10067_s2 + $0x218] sm:$0xf0] }
 0x8ea   : > { %6878 = vrsqrt.f32 %v2165_v17  ;;  %vm2185_vm14 = vmor %vm2183_vm13, %vm2184_vm12  ;;  %v5615_v4 = vor.u32 %v6604_v54, %v5612_v43  ;;  %vm2193_vm0 = vweird.f32 %v2165_v17  ;;  %vm3167_vm13 = vcmask 1043456  }
 0x8eb   : > { %v2176_v25 = vsel %vm2175_vm11, %v6875_v53, %v2172_v23  ;;  %v2179_v27 = vmul.f32 %v6877_v15, %v2178_v24  ;;  %2485 = vmatpush.bf16.msra.mxu3 %v5631_v50  ;;  %v5583_v23 = vor.u32 %v6596_v49, %v5580_v62  ;;  %v5850_v49 = vld [vmem:[%s10067_s2 + $0x3f0] sm:$0xf0]  ;;  %v5856_v62 = vld [vmem:[%s10067_s2 + $0x3e8] sm:$0xf] }
 0x8ec   : > { %v2208_v28 = vmul.f32 %v8319_v16, %v2176_v25 }
 0x8ed   : > { %v2180_v22 = vmul.f32 0.5, %v2179_v27  ;;  %v2145_v31 = vpop.f32.mrf.mxu2 }
 0x8ee   : > { %v2155_v34 = vsub.f32 %v2145_v31, %v2151_v30  ;;  %v2212_v42 = vmul.f32 %v2208_v28, %v2159_v1 }
 0x8ef   : > { %v2181_v40 = vsub.f32 1.5, %v2180_v22  ;;  %2486 = vmatpush.bf16.msra.mxu3 %v5615_v4 }
 0x8f0   : > { %v6879_v41 = vpop.eup %6878  ;;  %v2166_v56 = vadd.f32 1e-05, %v2155_v34  ;;  %v2217_v51 = vadd.f32 %v8343_v44, %v2212_v42 }
 0x8f1   : > { %v2182_v45 = vmul.f32 %v6877_v15, %v2181_v40  ;;  %v2188_v46 = vmul.f32 %v6879_v41, %v2165_v17  ;;  %vm2194_vm15 = vweird.f32 %v6879_v41 }
 0x8f2   : > { %6880 = vrsqrt.f32 %v2166_v56  ;;  %v2221_v36 = vmul.f32 0.2, %v2217_v51  ;;  %vm2195_vm1 = vmor %vm2193_vm0, %vm2194_vm15  ;;  %vm2203_vm3 = vweird.f32 %v2166_v56 }
 0x8f3   : > { %v2186_v48 = vsel %vm2185_vm14, %v6877_v15, %v2182_v45  ;;  %v2189_v19 = vmul.f32 %v6879_v41, %v2188_v46  ;;  %2487 = vmatpush.bf16.msra.mxu3 %v5599_v14  ;;  %v6657_v14 = vld [vmem:[%s10067_s2 + $0x3ec] sm:$0xf0]  ;;  %vm3172_vm14 = vcmask 130048  }
 0x8f4   : > { %v2209_v52 = vmul.f32 %v8319_v16, %v2186_v48  ;;  %v2225_v13 = vmax.f32 %v2217_v51, %v2221_v36 }
 0x8f5   : > { %v2190_v53 = vmul.f32 0.5, %v2189_v19 }
 0x8f6   : > { %v2213_v61 = vmul.f32 %v2209_v52, %v2160_v21 }
 0x8f7   : > { %v2191_v58 = vsub.f32 1.5, %v2190_v53  ;;  %2488 = vmatpush.bf16.msra.mxu3 %v5583_v23  ;;  %v6656_v23 = vld [vmem:[%s10067_s2 + $0x3ec] sm:$0xf] }
 0x8f8   : > { %v6881_v3 = vpop.eup %6880  ;;  %v2218_v60 = vadd.f32 %v8343_v44, %v2213_v61 }
 0x8f9   : > { %v2192_v5 = vmul.f32 %v6879_v41, %v2191_v58  ;;  %v2198_v6 = vmul.f32 %v6881_v3, %v2166_v56  ;;  %vm2204_vm2 = vweird.f32 %v6881_v3 }
 0x8fa   : > { %v2222_v57 = vmul.f32 0.2, %v2218_v60  ;;  %vm2205_vm4 = vmor %vm2203_vm3, %vm2204_vm2 }
 0x8fb   : > { %v2196_v8 = vsel %vm2195_vm1, %v6879_v41, %v2192_v5  ;;  %v2199_v10 = vmul.f32 %v6881_v3, %v2198_v6 }
 0x8fc   : > { %v2210_v12 = vmul.f32 %v8319_v16, %v2196_v8  ;;  %v2226_v2 = vmax.f32 %v2218_v60, %v2222_v57  ;;  %v8412_v8 = vld [vmem:[%s10078_s13] sm:$0xff] }
 0x8fd   : > { %v2200_v0 = vmul.f32 0.5, %v2199_v10  ;;  %v8419_v10 = vld [vmem:[%s10078_s13 + $0x8] sm:$0xff] }
 0x8fe   : > { %v2229_v59 = vpack.c.bf16 %v2226_v2, %v2225_v13  ;;  %v2214_v17 = vmul.f32 %v2210_v12, %v2161_v9  ;;  %v8426_v12 = vld [vmem:[%s10078_s13 + $0x10] sm:$0xff]  ;;  %v8433_v13 = vld [vmem:[%s10078_s13 + $0x18] sm:$0xff]  ;;  %v6655_v9 = vld [vmem:[%s10067_s2 + $0x3e4] sm:$0xf] }
 0x8ff   : > { %v2201_v15 = vsub.f32 1.5, %v2200_v0  ;;  %v5848_v0 = vld [vmem:[%s10067_s2 + $0x3e0] sm:$0xf] }
 0x900   : > { %2432 = vmatmul.bf16.vlgmr.msrb.gmra.mxu3 %v2229_v59  ;;  %2451 = vmatmul.bf16.vlgmr.msra.gmra.mxu0 %v2229_v59  ;;  %v2219_v18 = vadd.f32 %v8343_v44, %v2214_v17  ;;  %v5853_v17 = vor.u32 %v6655_v9, %v5850_v49  ;;  %v6640_v49 = vld [vmem:[%s10067_s2 + $0x36c] sm:$0xf] }
 0x901   : > { %v2202_v20 = vmul.f32 %v6881_v3, %v2201_v15  ;;  %2470 = vmatmul.bf16.vlgmr.msra.gmra.mxu1 %v2229_v59  ;;  %v6658_v15 = vld [vmem:[%s10067_s2 + $0x3f4] sm:$0xf0] }
 0x902   : > { %v2223_v27 = vmul.f32 0.2, %v2219_v18  ;;  %2848 = vmatpush.bf16.msrb.mxu3 %v5853_v17 }
 0x903   : > { %v2206_v33 = vsel %vm2205_vm4, %v6881_v3, %v2202_v20  ;;  %v5857_v20 = vor.u32 %v6658_v15, %v5856_v62  ;;  %v5794_v62 = vld [vmem:[%s10067_s2 + $0x378] sm:$0xf0] }
 0x904   : > { %v2211_v24 = vmul.f32 %v8319_v16, %v2206_v33  ;;  %v2227_v30 = vmax.f32 %v2219_v18, %v2223_v27  ;;  %v5858_v33 = vld [vmem:[%s10067_s2 + $0x3f8] sm:$0xf0]  ;;  %v6653_v18 = vld [vmem:[%s10067_s2 + $0x3cc] sm:$0xf0]  ;;  %v5834_v27 = vld [vmem:[%s10067_s2 + $0x3d0] sm:$0xf0]  ;;  %v5797_v17 = vor.u32 %v6640_v49, %v5794_v62 }
 0x906   : > { %v2215_v26 = vmul.f32 %v2211_v24, %v2162_v38  ;;  %v5861_v38 = vor.u32 %v6656_v23, %v5858_v33  ;;  %v5832_v24 = vld [vmem:[%s10067_s2 + $0x3c0] sm:$0xf]  ;;  %v6637_v23 = vld [vmem:[%s10067_s2 + $0x34c] sm:$0xf0] }
 0x908   : > { %v2220_v25 = vadd.f32 %v8343_v44, %v2215_v26  ;;  %v6651_v26 = vld [vmem:[%s10067_s2 + $0x3c4] sm:$0xf] }
 0x90a   : > { %v2224_v28 = vmul.f32 0.2, %v2220_v25 }
 0x90c   : > { %v2228_v29 = vmax.f32 %v2220_v25, %v2224_v28  ;;  %v5833_v25 = vor.u32 %v6653_v18, %v5832_v24  ;;  %v5840_v28 = vld [vmem:[%s10067_s2 + $0x3c8] sm:$0xf]  ;;  %v5770_v24 = vld [vmem:[%s10067_s2 + $0x350] sm:$0xf0] }
 0x90d   : > { %v5776_v18 = vld [vmem:[%s10067_s2 + $0x348] sm:$0xf] }
 0x90e   : > { %v2230_v22 = vpack.c.bf16 %v2228_v29, %v2227_v30  ;;  %v6654_v30 = vld [vmem:[%s10067_s2 + $0x3d4] sm:$0xf0]  ;;  %v5837_v29 = vor.u32 %v6651_v26, %v5834_v27  ;;  %v6636_v27 = vld [vmem:[%s10067_s2 + $0x34c] sm:$0xf] }
 0x910   : > { %2437 = vmatmul.bf16.gmra.mxu3 %v2230_v22  ;;  %2456 = vmatmul.bf16.gmra.mxu0 %v2230_v22 }
 0x911   : > { %2475 = vmatmul.bf16.gmra.mxu1 %v2230_v22  ;;  %2849 = vmatpush.bf16.msrb.mxu3 %v5837_v29 }
 0x920   : > { %2489 = vmatmul.bf16.vlgmr.msra.gmra.mxu3 %v2229_v59  ;;  %v5849_v59 = vor.u32 %v6657_v14, %v5848_v0  ;;  %v5792_v0 = vld [vmem:[%s10067_s2 + $0x368] sm:$0xf]  ;;  %v6642_v14 = vld [vmem:[%s10067_s2 + $0x374] sm:$0xf0] }
 0x922   : > { %2834 = vmatpush.bf16.msrb.mxu2 %v5849_v59  ;;  %v5793_v59 = vor.u32 %v6642_v14, %v5792_v0 }
 0x926   : > { %2835 = vmatpush.bf16.msrb.mxu2 %v5833_v25  ;;  %v6638_v25 = vld [vmem:[%s10067_s2 + $0x354] sm:$0xf0] }
 0x930   : > { %2494 = vmatmul.bf16.gmra.mxu3 %v2230_v22  ;;  %v5841_v22 = vor.u32 %v6654_v30, %v5840_v28  ;;  %v5778_v28 = vld [vmem:[%s10067_s2 + $0x358] sm:$0xf0]  ;;  %v5777_v30 = vor.u32 %v6638_v25, %v5776_v18 }
 0x931   : > { %v5781_v29 = vor.u32 %v6636_v27, %v5778_v28 }
 0x97d   : > { %v2452_v34 = vpop.f32.mrf.mxu0 }
 0x97e   : > { %v2471_v11 = vpop.f32.mrf.mxu1 }
 0x983   : > { %v2433_v31 = vpop.f32.mrf.mxu3 }
 0x985   : > { %v2454_v42 = vpop.f32.mrf.mxu0 }
 0x986   : > { %v2473_v40 = vpop.f32.mrf.mxu1 }
 0x98b   : > { %v2435_v37 = vpop.f32.mrf.mxu3 }
 0x98d   : > { %v2457_v63 = vpop.f32.mrf.mxu0 }
 0x98e   : > { %v2476_v44 = vpop.f32.mrf.mxu1 }
 0x993   : > { %v2438_v55 = vpop.f32.mrf.mxu3 }
 0x995   : > { %v2459_v46 = vpop.f32.mrf.mxu0 }
 0x996   : > { %v2478_v45 = vpop.f32.mrf.mxu1 }
 0x99b   : > { %v2440_v16 = vpop.f32.mrf.mxu3 }
 0x9a3   : > { %v2490_v32 = vpop.f32.mrf.mxu3 }
 0x9ab   : > { %v2492_v1 = vpop.f32.mrf.mxu3 }
 0x9b3   : > { %v2495_v41 = vpop.f32.mrf.mxu3 }
 0x9bb   : > { %v2497_v56 = vpop.f32.mrf.mxu3 }
 0x9bc   : > { %2502 = vmatpush.msrb.mxu0 %v2497_v56  ;;  %v6648_v56 = vld [vmem:[%s10067_s2 + $0x3ac] sm:$0xf] }
 0x9be   : > { %2503 = vmatpush.msrb.mxu0 %v2495_v41  ;;  %v5824_v41 = vld [vmem:[%s10067_s2 + $0x3a8] sm:$0xf] }
 0x9c0   : > { %2504 = vmatpush.msrb.mxu0 %v2492_v1  ;;  %v6647_v1 = vld [vmem:[%s10067_s2 + $0x3a4] sm:$0xf] }
 0x9c2   : > { %2505 = vmatpush.msrb.mxu0 %v2490_v32  ;;  %v5816_v32 = vld [vmem:[%s10067_s2 + $0x3a0] sm:$0xf] }
 0x9c4   : > { %2506 = vmatpush.msrb.mxu0 %v2478_v45 }
 0x9c6   : > { %2507 = vmatpush.msrb.mxu0 %v2476_v44  ;;  %v6650_v44 = vld [vmem:[%s10067_s2 + $0x3b4] sm:$0xf0] }
 0x9c7   : > { %v5825_v45 = vor.u32 %v6650_v44, %v5824_v41  ;;  %v5762_v44 = vld [vmem:[%s10067_s2 + $0x338] sm:$0xf0] }
 0x9c8   : > { %2508 = vmatpush.msrb.mxu0 %v2473_v40  ;;  %v5818_v40 = vld [vmem:[%s10067_s2 + $0x3b0] sm:$0xf0] }
 0x9ca   : > { %2509 = vmatpush.msrb.mxu0 %v2471_v11  ;;  %v6649_v11 = vld [vmem:[%s10067_s2 + $0x3ac] sm:$0xf0] }
 0x9cc   : > { %2510 = vmatpush.msrb.mxu0 %v2459_v46 }
 0x9ce   : > { %2511 = vmatpush.msrb.mxu0 %v2457_v63  ;;  %v5826_v63 = vld [vmem:[%s10067_s2 + $0x3b8] sm:$0xf0] }
 0x9cf   : > { %v5829_v46 = vor.u32 %v6648_v56, %v5826_v63  ;;  %v5736_v56 = vld [vmem:[%s10067_s2 + $0x300] sm:$0xf] }
 0x9d0   : > { %2512 = vmatpush.msrb.mxu0 %v2454_v42  ;;  %v5821_v42 = vor.u32 %v6647_v1, %v5818_v40  ;;  %v5760_v1 = vld [vmem:[%s10067_s2 + $0x328] sm:$0xf] }
 0x9d2   : > { %2513 = vmatpush.msrb.mxu0 %v2452_v34  ;;  %v5817_v34 = vor.u32 %v6649_v11, %v5816_v32  ;;  %2850 = vmatpush.bf16.msrb.mxu3 %v5821_v42  ;;  %v5754_v11 = vld [vmem:[%s10067_s2 + $0x330] sm:$0xf0]  ;;  %v6632_v42 = vld [vmem:[%s10067_s2 + $0x32c] sm:$0xf] }
 0x9d4   : > { %2514 = vmatpush.msrb.mxu0 %v2440_v16  ;;  %2836 = vmatpush.bf16.msrb.mxu2 %v5817_v34  ;;  %v6634_v34 = vld [vmem:[%s10067_s2 + $0x334] sm:$0xf0] }
 0x9d6   : > { %2515 = vmatpush.msrb.mxu0 %v2438_v55 }
 0x9d8   : > { %2516 = vmatpush.msrb.mxu0 %v2435_v37  ;;  %v5842_v37 = vld [vmem:[%s10067_s2 + $0x3d8] sm:$0xf0] }
 0x9da   : > { %2517 = vmatpush.msrb.mxu0 %v2433_v31  ;;  %v6652_v31 = vld [vmem:[%s10067_s2 + $0x3cc] sm:$0xf] }
 0x9db   : > { %2518 = vmatmul.f32.vlgmr.msrb.gmra.mxu0 %v2500_v39  ;;  %v5845_v55 = vor.u32 %v6652_v31, %v5842_v37  ;;  %v5800_v39 = vld [vmem:[%s10067_s2 + $0x380] sm:$0xf]  ;;  %v6633_v31 = vld [vmem:[%s10067_s2 + $0x32c] sm:$0xf0]  ;;  %v6631_v37 = vld [vmem:[%s10067_s2 + $0x324] sm:$0xf] }
 0x9dc   : > { %2862 = vmatpush.bf16.msra.mxu0 %v5857_v20  ;;  %v5768_v20 = vld [vmem:[%s10067_s2 + $0x340] sm:$0xf]  ;;  %v5757_v41 = vor.u32 %v6631_v37, %v5754_v11  ;;  %v6017_v11 = vld [vmem:[%s10067_s2 + $0x4e8] sm:$0xf] }
 0x9dd   : > { %v5769_v33 = vor.u32 %v6637_v23, %v5768_v20  ;;  %v6851_v23 = vld [vmem:[%s10079_s14 + $0x5] ss:$0 sm:$0xff]  ;;  %v5993_v37 = vld [vmem:[%s10067_s2 + $0x4c0] sm:$0xf] }
 0x9e0   : > { %2863 = vmatpush.bf16.msra.mxu0 %v5841_v22  ;;  %v5752_v22 = vld [vmem:[%s10067_s2 + $0x320] sm:$0xf] }
 0x9e1   : > { %v5753_v32 = vor.u32 %v6633_v31, %v5752_v22  ;;  %v6688_v22 = vld [vmem:[%s10067_s2 + $0x4ec] sm:$0xf]  ;;  %v6019_v31 = vld [vmem:[%s10067_s2 + $0x4f8] sm:$0xf0] }
 0x9e3   : > { %2521 = vmatmul.f32.gmra.mxu0 %v2501_v35  ;;  %v6645_v35 = vld [vmem:[%s10067_s2 + $0x38c] sm:$0xf0] }
 0x9e4   : > { %2864 = vmatpush.bf16.msra.mxu0 %v5825_v45  ;;  %v5761_v45 = vor.u32 %v6634_v34, %v5760_v1  ;;  %v6690_v1 = vld [vmem:[%s10067_s2 + $0x4f4] sm:$0xf0] }
 0xa58   : > { %v8389_v48 = vpop.f32.mrf.mxu0 }
 0xa59   : > { %v2525_v19 = vmul.f32 %v8389_v48, %v8389_v48 }
 0xa5b   : > { %2531 = vrot.lane.b32.xlu2 %v2525_v19, %s10118_s27 }
 0xa60   : > { %v8394_v21 = vpop.f32.mrf.mxu0 }
 0xa61   : > { %2529 = vrot.lane.b32.xlu0 %v8394_v21, %s10118_s27  ;;  %v2526_v51 = vmul.f32 %v8394_v21, %v8394_v21 }
 0xa63   : > { %2533 = vrot.lane.b32.xlu1 %v2526_v51, %s10118_s27 }
 0xa6b   : > { %2527 = vrot.lane.b32.xlu1 %v8389_v48, %s10118_s27 }
 0xab5   : > { %v2532_v52 = vpop.permute.xlu2 %2531 }
 0xab6   : > { %v2537_v50 = vadd.f32 %v2532_v52, %v2525_v19  ;;  %v6643_v19 = vld [vmem:[%s10067_s2 + $0x384] sm:$0xf]  ;;  %v5802_v52 = vld [vmem:[%s10067_s2 + $0x390] sm:$0xf0] }
 0xab8   : > { %2543 = vrot.lane.b32.xlu0 %v2537_v50, %s10119_s30 }
 0xad3   : > { %v2530_v53 = vpop.permute.xlu0 %2529 }
 0xad4   : > { %v2536_v54 = vadd.f32 %v2530_v53, %v8394_v21  ;;  %v6646_v53 = vld [vmem:[%s10067_s2 + $0x394] sm:$0xf0] }
 0xad5   : > { %v2534_v43 = vpop.permute.xlu1 %2533 }
 0xad6   : > { %v2538_v61 = vadd.f32 %v2534_v43, %v2526_v51  ;;  %2541 = vrot.lane.b32.xlu1 %v2536_v54, %s10119_s30  ;;  %v5801_v51 = vor.u32 %v6645_v35, %v5800_v39  ;;  %v6629_v39 = vld [vmem:[%s10067_s2 + $0x30c] sm:$0xf0]  ;;  %v6627_v35 = vld [vmem:[%s10067_s2 + $0x304] sm:$0xf] }
 0xad8   : > { %2545 = vrot.lane.b32.xlu2 %v2538_v61, %s10119_s30  ;;  %2837 = vmatpush.bf16.msrb.mxu2 %v5801_v51  ;;  %v5744_v51 = vld [vmem:[%s10067_s2 + $0x308] sm:$0xf] }
 0xadd   : > { %v2528_v58 = vpop.permute.xlu1 %2527 }
 0xade   : > { %v2535_v3 = vadd.f32 %v2528_v58, %v8389_v48  ;;  %v5810_v58 = vld [vmem:[%s10067_s2 + $0x398] sm:$0xf0] }
 0xae0   : > { %2539 = vrot.lane.b32.xlu2 %v2535_v3, %s10119_s30 }
 0xb2a   : > { %v2544_v60 = vpop.permute.xlu0 %2543 }
 0xb2b   : > { %v2549_v5 = vadd.f32 %v2544_v60, %v2537_v50  ;;  %v5808_v50 = vld [vmem:[%s10067_s2 + $0x388] sm:$0xf] }
 0xb2c   : > { %v5809_v43 = vor.u32 %v6646_v53, %v5808_v50  ;;  %v6628_v50 = vld [vmem:[%s10067_s2 + $0x30c] sm:$0xf] }
 0xb2e   : > { %2865 = vmatpush.bf16.msra.mxu0 %v5809_v43  ;;  %v5737_v43 = vor.u32 %v6629_v39, %v5736_v56  ;;  %v5977_v56 = vld [vmem:[%s10067_s2 + $0x4a0] sm:$0xf]  ;;  %v6001_v39 = vld [vmem:[%s10067_s2 + $0x4c8] sm:$0xf] }
 0xb32   : > { %v2546_v36 = vpop.permute.xlu2 %2545  ;;  %2866 = vmatpush.bf16.msra.mxu0 %v5793_v59 }
 0xb33   : > { %v2550_v4 = vadd.f32 %v2546_v36, %v2538_v61  ;;  %v6644_v61 = vld [vmem:[%s10067_s2 + $0x38c] sm:$0xf] }
 0xb34   : > { %v5813_v60 = vor.u32 %v6644_v61, %v5810_v58  ;;  %v5746_v61 = vld [vmem:[%s10067_s2 + $0x318] sm:$0xf0] }
 0xb35   : > { %2580 = vmatpush.msrb.mxu1 %v2550_v4  ;;  %v5784_v4 = vld [vmem:[%s10067_s2 + $0x360] sm:$0xf] }
 0xb36   : > { %2867 = vmatpush.bf16.msra.mxu0 %v5777_v30 }
 0xb37   : > { %2581 = vmatpush.msrb.mxu1 %v2549_v5  ;;  %v6641_v5 = vld [vmem:[%s10067_s2 + $0x36c] sm:$0xf0] }
 0xb3a   : > { %v2540_v6 = vpop.permute.xlu2 %2539  ;;  %2868 = vmatpush.bf16.msra.mxu0 %v5761_v45 }
 0xb3b   : > { %v2547_v7 = vadd.f32 %v2540_v6, %v2535_v3  ;;  %v6639_v6 = vld [vmem:[%s10067_s2 + $0x364] sm:$0xf] }
 0xb48   : > { %v2542_v57 = vpop.permute.xlu1 %2541 }
 0xb49   : > { %v2548_v47 = vadd.f32 %v2542_v57, %v2536_v54  ;;  %v5805_v54 = vor.u32 %v6643_v19, %v5802_v52  ;;  %v5738_v19 = vld [vmem:[%s10067_s2 + $0x310] sm:$0xf0]  ;;  %v6630_v52 = vld [vmem:[%s10067_s2 + $0x314] sm:$0xf0] }
 0xb4b   : > { %2582 = vmatpush.msrb.mxu1 %v2548_v47  ;;  %2851 = vmatpush.bf16.msrb.mxu3 %v5805_v54  ;;  %v5785_v47 = vor.u32 %v6641_v5, %v5784_v4 }
 0xb4d   : > { %2583 = vmatpush.msrb.mxu1 %v2547_v7  ;;  %v5786_v7 = vld [vmem:[%s10067_s2 + $0x370] sm:$0xf0]  ;;  %2838 = vmatpush.bf16.msrb.mxu2 %v5785_v47  ;;  %v6850_v47 = vld [vmem:[%s10079_s14 + $0x4] ss:$0 sm:$0xff] }
 0xb4e   : > { %5696 = vmatmul.msk.f32.vlgmr.msrb.gmra.mxu1 %vm2555_vm5, %v8412_v8  ;;  %v5789_v9 = vor.u32 %v6639_v6, %v5786_v7 }
 0xb4f   : > { %2876 = vmatpush.bf16.msra.mxu1 %v5861_v38  ;;  %v6635_v38 = vld [vmem:[%s10067_s2 + $0x344] sm:$0xf] }
 0xb50   : > { %2852 = vmatpush.bf16.msrb.mxu3 %v5789_v9  ;;  %v5773_v26 = vor.u32 %v6635_v38, %v5770_v24 }
 0xb51   : > { %2839 = vmatpush.bf16.msrb.mxu2 %v5769_v33 }
 0xb53   : > { %2877 = vmatpush.bf16.msra.mxu1 %v5845_v55 }
 0xb54   : > { %2853 = vmatpush.bf16.msrb.mxu3 %v5773_v26 }
 0xb55   : > { %2840 = vmatpush.bf16.msrb.mxu2 %v5753_v32  ;;  %v6685_v32 = vld [vmem:[%s10067_s2 + $0x4cc] sm:$0xf0] }
 0xb56   : > { %5697 = vmatmul.msk.f32.gmra.mxu1 %vm2555_vm5, %v8419_v10  ;;  %v5994_v34 = vor.u32 %v6685_v32, %v5993_v37  ;;  %v2890_v32 = vld [vmem:[%s10071_s6] sm:$0xf] }
 0xb57   : > { %2878 = vmatpush.bf16.msra.mxu1 %v5829_v46  ;;  %v5765_v46 = vor.u32 %v6632_v42, %v5762_v44  ;;  %v6684_v42 = vld [vmem:[%s10067_s2 + $0x4cc] sm:$0xf]  ;;  %v6003_v44 = vld [vmem:[%s10067_s2 + $0x4d8] sm:$0xf0] }
 0xb58   : > { %2854 = vmatpush.bf16.msrb.mxu3 %v5757_v41  ;;  %v6006_v45 = vor.u32 %v6684_v42, %v6003_v44  ;;  %v5979_v42 = vld [vmem:[%s10067_s2 + $0x4b0] sm:$0xf0] }
 0xb59   : > { %2841 = vmatpush.bf16.msrb.mxu2 %v5737_v43 }
 0xb5b   : > { %2879 = vmatpush.bf16.msra.mxu1 %v5813_v60  ;;  %v5745_v60 = vor.u32 %v6630_v52, %v5744_v51  ;;  %v6680_v52 = vld [vmem:[%s10067_s2 + $0x4ac] sm:$0xf] }
 0xb5d   : > { %2869 = vmatpush.bf16.msra.mxu0 %v5745_v60 }
 0xb5e   : > { %5698 = vmatmul.msk.f32.gmra.mxu1 %vm2555_vm5, %v8426_v12 }
 0xb5f   : > { %2880 = vmatpush.bf16.msra.mxu1 %v5797_v17 }
 0xb63   : > { %2881 = vmatpush.bf16.msra.mxu1 %v5781_v29  ;;  %v6009_v29 = vld [vmem:[%s10067_s2 + $0x4e0] sm:$0xf] }
 0xb66   : > { %5699 = vmatmul.msk.f32.gmra.mxu1 %vm2555_vm5, %v8433_v13 }
 0xb67   : > { %2882 = vmatpush.bf16.msra.mxu1 %v5765_v46  ;;  %v6681_v46 = vld [vmem:[%s10067_s2 + $0x4ac] sm:$0xf0] }
 0xbcb   : > { %v8437_v2 = vpop.f32.mrf.mxu1 }
 0xbcc   : > { %v2597_v3 = vmul.f32 %v8437_v2, %v8437_v2  ;;  %v2604_v62 = vsub.f32 %v8389_v48, %v8437_v2 }
 0xbd3   : > { %v8487_v16 = vpop.f32.mrf.mxu1 }
 0xbd4   : > { %v2598_v55 = vmul.f32 %v8487_v16, %v8487_v16  ;;  %v2605_v38 = vsub.f32 %v8394_v21, %v8487_v16  ;;  %v6689_v21 = vld [vmem:[%s10067_s2 + $0x4ec] sm:$0xf0] }
 0xbd5   : > { %v6010_v16 = vor.u32 %v6689_v21, %v6009_v29  ;;  %v6665_v21 = vld [vmem:[%s10067_s2 + $0x42c] sm:$0xf0] }
 0xbdb   : > { %v2591_v36 = vpop.f32.mrf.mxu1 }
 0xbdc   : > { %v2599_v57 = vsub.f32 %v2591_v36, %v2597_v3  ;;  %v5741_v3 = vor.u32 %v6627_v35, %v5738_v19  ;;  %v5749_v36 = vor.u32 %v6628_v50, %v5746_v61  ;;  %v6686_v35 = vld [vmem:[%s10067_s2 + $0x4d4] sm:$0xf0]  ;;  %v5978_v19 = vor.u32 %v6681_v46, %v5977_v56  ;;  %v5987_v50 = vld [vmem:[%s10067_s2 + $0x4b8] sm:$0xf0]  ;;  %v6677_v61 = vld [vmem:[%s10067_s2 + $0x48c] sm:$0xf0] }
 0xbdd   : > { %v6002_v51 = vor.u32 %v6686_v35, %v6001_v39  ;;  %v5990_v43 = vor.u32 %v6680_v52, %v5987_v50  ;;  %v6675_v56 = vld [vmem:[%s10067_s2 + $0x484] sm:$0xf]  ;;  %v5947_v39 = vld [vmem:[%s10067_s2 + $0x470] sm:$0xf0] }
 0xbde   : > { %v8563_v15 = vadd.f32 1e-05, %v2599_v57  ;;  %2855 = vmatpush.bf16.msrb.mxu3 %v5741_v3  ;;  %2883 = vmatpush.bf16.msra.mxu1 %v5749_v36  ;;  %v6682_v3 = vld [vmem:[%s10067_s2 + $0x4b4] sm:$0xf0]  ;;  %v6671_v46 = vld [vmem:[%s10067_s2 + $0x464] sm:$0xf] }
 0xbdf   : > { %v5950_v35 = vor.u32 %v6671_v46, %v5947_v39  ;;  %v6663_v50 = vld [vmem:[%s10067_s2 + $0x424] sm:$0xf] }
 0xbe0   : > { %6882 = vrsqrt.f32 %v8563_v15  ;;  %vm2614_vm7 = vweird.f32 %v8563_v15 }
 0xbe2   : > { %3109 = vmatpush.bf16.msra.mxu3 %v6010_v16  ;;  %v5937_v16 = vld [vmem:[%s10067_s2 + $0x448] sm:$0xf] }
 0xbe3   : > { %v2594_v40 = vpop.f32.mrf.mxu1 }
 0xbe4   : > { %v2600_v63 = vsub.f32 %v2594_v40, %v2598_v55  ;;  %v6022_v55 = vor.u32 %v6688_v22, %v6019_v31  ;;  %v6018_v40 = vor.u32 %v6690_v1, %v6017_v11  ;;  %v6670_v22 = vld [vmem:[%s10067_s2 + $0x454] sm:$0xf0]  ;;  %v6683_v1 = vld [vmem:[%s10067_s2 + $0x4c4] sm:$0xf] }
 0xbe5   : > { %v5938_v37 = vor.u32 %v6670_v22, %v5937_v16 }
 0xbe6   : > { %v6883_v53 = vpop.eup %6882  ;;  %v2607_v54 = vadd.f32 1e-05, %v2600_v63  ;;  %3148 = vmatpush.bf16.msrb.mxu1 %v6022_v55  ;;  %3110 = vmatpush.bf16.msra.mxu3 %v5994_v34  ;;  %v5995_v34 = vld [vmem:[%s10067_s2 + $0x4d0] sm:$0xf0] }
 0xbe7   : > { %v2609_v58 = vmul.f32 %v6883_v53, %v8563_v15  ;;  %vm2615_vm6 = vweird.f32 %v6883_v53  ;;  %3135 = vmatpush.bf16.msrb.mxu0 %v6018_v40  ;;  %v5998_v40 = vor.u32 %v6683_v1, %v5995_v34 }
 0xbe8   : > { %6884 = vrsqrt.f32 %v2607_v54  ;;  %vm2616_vm9 = vmor %vm2614_vm7, %vm2615_vm6  ;;  %vm2624_vm11 = vweird.f32 %v2607_v54 }
 0xbe9   : > { %v2610_v4 = vmul.f32 %v6883_v53, %v2609_v58  ;;  %v5985_v58 = vld [vmem:[%s10067_s2 + $0x4a8] sm:$0xf] }
 0xbea   : > { %3149 = vmatpush.bf16.msrb.mxu1 %v6006_v45  ;;  %3111 = vmatpush.bf16.msra.mxu3 %v5978_v19  ;;  %v5986_v36 = vor.u32 %v6682_v3, %v5985_v58  ;;  %v6667_v19 = vld [vmem:[%s10067_s2 + $0x444] sm:$0xf]  ;;  %v5921_v58 = vld [vmem:[%s10067_s2 + $0x428] sm:$0xf] }
 0xbeb   : > { %v2611_v5 = vmul.f32 0.5, %v2610_v4  ;;  %3136 = vmatpush.bf16.msrb.mxu0 %v6002_v51  ;;  %v5931_v51 = vld [vmem:[%s10067_s2 + $0x450] sm:$0xf0] }
 0xbec   : > { %v5934_v52 = vor.u32 %v6667_v19, %v5931_v51  ;;  %v6177_v19 = vld [vmem:[%s10067_s2 + $0x5e0] sm:$0xf]  ;;  %v6721_v51 = vld [vmem:[%s10067_s2 + $0x5ec] sm:$0xf0] }
 0xbed   : > { %v2612_v6 = vsub.f32 1.5, %v2611_v5  ;;  %v6676_v5 = vld [vmem:[%s10067_s2 + $0x48c] sm:$0xf] }
 0xbee   : > { %v6885_v57 = vpop.eup %6884  ;;  %3150 = vmatpush.bf16.msrb.mxu1 %v5990_v43  ;;  %v6664_v43 = vld [vmem:[%s10067_s2 + $0x42c] sm:$0xf] }
 0xbef   : > { %v2613_v7 = vmul.f32 %v6883_v53, %v2612_v6  ;;  %v2619_v0 = vmul.f32 %v6885_v57, %v2607_v54  ;;  %vm2625_vm10 = vweird.f32 %v6885_v57  ;;  %v5971_v6 = vld [vmem:[%s10067_s2 + $0x498] sm:$0xf0]  ;;  %3137 = vmatpush.bf16.msrb.mxu0 %v5986_v36  ;;  %v6659_v36 = vld [vmem:[%s10067_s2 + $0x404] sm:$0xf] }
 0xbf0   : > { %vm2626_vm12 = vmor %vm2624_vm11, %vm2625_vm10 }
 0xbf1   : > { %v2617_v14 = vsel %vm2616_vm9, %v6883_v53, %v2613_v7  ;;  %v2620_v9 = vmul.f32 %v6885_v57, %v2619_v0  ;;  %v5961_v53 = vld [vmem:[%s10067_s2 + $0x480] sm:$0xf]  ;;  %v5974_v7 = vor.u32 %v6676_v5, %v5971_v6  ;;  %v6673_v0 = vld [vmem:[%s10067_s2 + $0x46c] sm:$0xf0] }
 0xbf2   : > { %v2629_v59 = vmul.f32 %v6850_v47, %v2617_v14  ;;  %v5962_v60 = vor.u32 %v6677_v61, %v5961_v53  ;;  %v5969_v14 = vld [vmem:[%s10067_s2 + $0x488] sm:$0xf]  ;;  %v5915_v53 = vld [vmem:[%s10067_s2 + $0x430] sm:$0xf0]  ;;  %v5923_v61 = vld [vmem:[%s10067_s2 + $0x438] sm:$0xf0] }
 0xbf3   : > { %v2621_v49 = vmul.f32 0.5, %v2620_v9  ;;  %v6678_v9 = vld [vmem:[%s10067_s2 + $0x494] sm:$0xf0]  ;;  %3151 = vmatpush.bf16.msrb.mxu1 %v5974_v7  ;;  %v5926_v3 = vor.u32 %v6664_v43, %v5923_v61  ;;  %v5897_v5 = vld [vmem:[%s10067_s2 + $0x400] sm:$0xf] }
 0xbf4   : > { %v2631_v20 = vmul.f32 %v2629_v59, %v2604_v62  ;;  %3112 = vmatpush.bf16.msra.mxu3 %v5962_v60  ;;  %v6666_v60 = vld [vmem:[%s10067_s2 + $0x434] sm:$0xf0]  ;;  %v6720_v43 = vld [vmem:[%s10067_s2 + $0x5ec] sm:$0xf]  ;;  %v6187_v61 = vld [vmem:[%s10067_s2 + $0x5f8] sm:$0xf0] }
 0xbf5   : > { %v2622_v17 = vsub.f32 1.5, %v2621_v49  ;;  %v5970_v49 = vor.u32 %v6678_v9, %v5969_v14  ;;  %v5922_v6 = vor.u32 %v6666_v60, %v5921_v58  ;;  %v5907_v14 = vld [vmem:[%s10067_s2 + $0x418] sm:$0xf0]  ;;  %v5905_v9 = vld [vmem:[%s10067_s2 + $0x408] sm:$0xf]  ;;  %v6190_v58 = vor.u32 %v6720_v43, %v6187_v61 }
 0xbf6   : > { %v2634_v24 = vadd.f32 %v6851_v23, %v2631_v20  ;;  %v5955_v20 = vld [vmem:[%s10067_s2 + $0x478] sm:$0xf0]  ;;  %v6717_v60 = vld [vmem:[%s10067_s2 + $0x5cc] sm:$0xf0]  ;;  %v6105_v43 = vld [vmem:[%s10067_s2 + $0x548] sm:$0xf] }
 0xbf7   : > { %v2623_v33 = vmul.f32 %v6885_v57, %v2622_v17  ;;  %v6672_v17 = vld [vmem:[%s10067_s2 + $0x46c] sm:$0xf]  ;;  %3138 = vmatpush.bf16.msrb.mxu0 %v5970_v49  ;;  %v6662_v49 = vld [vmem:[%s10067_s2 + $0x414] sm:$0xf0] }
 0xbf8   : > { %v2636_v27 = vmul.f32 0.2, %v2634_v24 }
 0xbf9   : > { %v2627_v15 = vsel %vm2626_vm12, %v6885_v57, %v2623_v33  ;;  %v5945_v57 = vld [vmem:[%s10067_s2 + $0x460] sm:$0xf]  ;;  %v5958_v33 = vor.u32 %v6672_v17, %v5955_v20 }
 0xbfa   : > { %v2630_v18 = vmul.f32 %v6850_v47, %v2627_v15  ;;  %v2638_v2 = vmax.f32 %v2634_v24, %v2636_v27  ;;  %v5946_v59 = vor.u32 %v6673_v0, %v5945_v57  ;;  %v6669_v15 = vld [vmem:[%s10067_s2 + $0x44c] sm:$0xf0]  ;;  %v6674_v24 = vld [vmem:[%s10067_s2 + $0x474] sm:$0xf0]  ;;  %v6687_v27 = vld [vmem:[%s10067_s2 + $0x4e4] sm:$0xf] }
 0xbfb   : > { %3152 = vmatpush.bf16.msrb.mxu1 %v5958_v33  ;;  %v6660_v0 = vld [vmem:[%s10067_s2 + $0x40c] sm:$0xf] }
 0xbfc   : > { %v2632_v26 = vmul.f32 %v2630_v18, %v2605_v38  ;;  %3113 = vmatpush.bf16.msra.mxu3 %v5946_v59  ;;  %v5953_v38 = vld [vmem:[%s10067_s2 + $0x468] sm:$0xf]  ;;  %v5910_v59 = vor.u32 %v6660_v0, %v5907_v14  ;;  %v6716_v0 = vld [vmem:[%s10067_s2 + $0x5cc] sm:$0xf]  ;;  %v6171_v14 = vld [vmem:[%s10067_s2 + $0x5d8] sm:$0xf0] }
 0xbfe   : > { %v2635_v25 = vadd.f32 %v6851_v23, %v2632_v26  ;;  %v5929_v23 = vld [vmem:[%s10067_s2 + $0x440] sm:$0xf]  ;;  %v5954_v26 = vor.u32 %v6674_v24, %v5953_v38 }
 0xbff   : > { %v5930_v18 = vor.u32 %v6669_v15, %v5929_v23 }
 0xc00   : > { %v2637_v48 = vmul.f32 0.2, %v2635_v25  ;;  %3139 = vmatpush.bf16.msrb.mxu0 %v5954_v26 }
 0xc01   : > { %3114 = vmatpush.bf16.msra.mxu3 %v5930_v18 }
 0xc02   : > { %v2639_v28 = vmax.f32 %v2635_v25, %v2637_v48  ;;  %v6011_v48 = vld [vmem:[%s10067_s2 + $0x4f0] sm:$0xf0] }
 0xc03   : > { %v6014_v11 = vor.u32 %v6687_v27, %v6011_v48 }
 0xc04   : > { %v2640_v30 = vpack.c.bf16 %v2639_v28, %v2638_v2  ;;  %v6668_v2 = vld [vmem:[%s10067_s2 + $0x44c] sm:$0xf]  ;;  %v5939_v28 = vld [vmem:[%s10067_s2 + $0x458] sm:$0xf0]  ;;  %3140 = vmatpush.bf16.msrb.mxu0 %v5938_v37 }
 0xc05   : > { %v5942_v29 = vor.u32 %v6668_v2, %v5939_v28 }
 0xc06   : > { %2842 = vmatmul.bf16.vlgmr.msrb.gmra.mxu2 %v2640_v30  ;;  %2856 = vmatmul.bf16.vlgmr.msrb.gmra.mxu3 %v2640_v30 }
 0xc07   : > { %2870 = vmatmul.bf16.vlgmr.msra.gmra.mxu0 %v2640_v30  ;;  %2884 = vmatmul.bf16.vlgmr.msra.gmra.mxu1 %v2640_v30  ;;  %v5913_v30 = vld [vmem:[%s10067_s2 + $0x420] sm:$0xf] }
 0xc08   : > { %v5914_v31 = vor.u32 %v6665_v21, %v5913_v30  ;;  %3153 = vmatpush.bf16.msrb.mxu1 %v5942_v29  ;;  %3141 = vmatpush.bf16.msrb.mxu0 %v5922_v6  ;;  %v3171_v29 = vld [vmem:[%s10072_s7 + $0x8] sm:$0xff] }
 0xc09   : > { %v6169_v6 = vld [vmem:[%s10067_s2 + $0x5c8] sm:$0xf] }
 0xc0a   : > { %3115 = vmatpush.bf16.msra.mxu3 %v5914_v31 }
 0xc0c   : > { %3154 = vmatpush.bf16.msrb.mxu1 %v5926_v3  ;;  %v6161_v3 = vld [vmem:[%s10067_s2 + $0x5c0] sm:$0xf] }
 0xc10   : > { %3155 = vmatpush.bf16.msrb.mxu1 %v5910_v59  ;;  %v6145_v59 = vld [vmem:[%s10067_s2 + $0x5a0] sm:$0xf] }
 0xc84   : > { %v2885_v41 = vpop.f32.mrf.mxu1  ;;  %v2871_v63 = vpop.f32.mrf.mxu0 }
 0xc89   : > { %v2857_v54 = vpop.f32.mrf.mxu3  ;;  %v2843_v47 = vpop.f32.mrf.mxu2 }
 0xc8c   : > { %v2887_v4 = vpop.f32.mrf.mxu1  ;;  %v2873_v62 = vpop.f32.mrf.mxu0 }
 0xc8d   : > { %2902 = vmatpush.msra.mxu2 %v2887_v4  ;;  %v5899_v4 = vld [vmem:[%s10067_s2 + $0x410] sm:$0xf0] }
 0xc8e   : > { %v5902_v57 = vor.u32 %v6659_v36, %v5899_v4  ;;  %v6715_v36 = vld [vmem:[%s10067_s2 + $0x5c4] sm:$0xf]  ;;  %v6162_v4 = vor.u32 %v6717_v60, %v6161_v3  ;;  %v6700_v3 = vld [vmem:[%s10067_s2 + $0x54c] sm:$0xf]  ;;  %v6107_v60 = vld [vmem:[%s10067_s2 + $0x558] sm:$0xf0] }
 0xc8f   : > { %2903 = vmatpush.msra.mxu2 %v2885_v41  ;;  %v6679_v41 = vld [vmem:[%s10067_s2 + $0x4a4] sm:$0xf] }
 0xc90   : > { %v5982_v44 = vor.u32 %v6679_v41, %v5979_v42 }
 0xc91   : > { %2904 = vmatpush.msra.mxu2 %v2873_v62  ;;  %v2859_v25 = vpop.f32.mrf.mxu3  ;;  %v2845_v55 = vpop.f32.mrf.mxu2  ;;  %v5906_v62 = vor.u32 %v6662_v49, %v5905_v9  ;;  %v6174_v9 = vor.u32 %v6716_v0, %v6171_v14  ;;  %v6713_v49 = vld [vmem:[%s10067_s2 + $0x5ac] sm:$0xf0]  ;;  %v6083_v0 = vld [vmem:[%s10067_s2 + $0x530] sm:$0xf0]  ;;  %v6089_v14 = vld [vmem:[%s10067_s2 + $0x528] sm:$0xf] }
 0xc93   : > { %2905 = vmatpush.msra.mxu2 %v2871_v63  ;;  %v5963_v63 = vld [vmem:[%s10067_s2 + $0x490] sm:$0xf0]  ;;  %3142 = vmatpush.bf16.msrb.mxu0 %v5906_v62  ;;  %v6711_v62 = vld [vmem:[%s10067_s2 + $0x5a4] sm:$0xf] }
 0xc94   : > { %v5966_v45 = vor.u32 %v6675_v56, %v5963_v63 }
 0xc95   : > { %2906 = vmatpush.msra.mxu2 %v2859_v25  ;;  %v3170_v25 = vld [vmem:[%s10072_s7] sm:$0xff] }
 0xc97   : > { %2907 = vmatpush.msra.mxu2 %v2857_v54  ;;  %v5918_v54 = vor.u32 %v6663_v50, %v5915_v53  ;;  %v6722_v50 = vld [vmem:[%s10067_s2 + $0x5f4] sm:$0xf0] }
 0xc99   : > { %2908 = vmatpush.msra.mxu2 %v2845_v55 }
 0xc9b   : > { %2909 = vmatpush.msra.mxu2 %v2843_v47  ;;  %v6661_v47 = vld [vmem:[%s10067_s2 + $0x40c] sm:$0xf0] }
 0xc9c   : > { %5862 = vmatmul.msk.f32.vlgmr.msra.gmra.mxu2 %vm2082_vm8, %v2890_v32  ;;  %v5898_v7 = vor.u32 %v6661_v47, %v5897_v5  ;;  %v6163_v5 = vld [vmem:[%s10067_s2 + $0x5d0] sm:$0xf0] }
 0xc9d   : > { %3122 = vmatpush.bf16.msrb.mxu2 %v6014_v11  ;;  %v6166_v47 = vor.u32 %v6715_v36, %v6163_v5  ;;  %v6081_v5 = vld [vmem:[%s10067_s2 + $0x520] sm:$0xf] }
 0xc9e   : > { %3116 = vmatpush.bf16.msra.mxu3 %v5898_v7 }
 0xca1   : > { %3123 = vmatpush.bf16.msrb.mxu2 %v5998_v40 }
 0xca5   : > { %3124 = vmatpush.bf16.msrb.mxu2 %v5982_v44 }
 0xca9   : > { %3125 = vmatpush.bf16.msrb.mxu2 %v5966_v45 }
 0xcad   : > { %3126 = vmatpush.bf16.msrb.mxu2 %v5950_v35 }
 0xcb1   : > { %3127 = vmatpush.bf16.msrb.mxu2 %v5934_v52 }
 0xcb5   : > { %3128 = vmatpush.bf16.msrb.mxu2 %v5918_v54 }
 0xcb9   : > { %3129 = vmatpush.bf16.msrb.mxu2 %v5902_v57  ;;  %v6718_v57 = vld [vmem:[%s10067_s2 + $0x5d4] sm:$0xf0] }
 0xcba   : > { %v6170_v7 = vor.u32 %v6718_v57, %v6169_v6  ;;  %v6697_v6 = vld [vmem:[%s10067_s2 + $0x52c] sm:$0xf0]  ;;  %v6695_v57 = vld [vmem:[%s10067_s2 + $0x524] sm:$0xf] }
 0xd1f   : > { %v2911_v17 = vpop.f32.mrf.mxu2 }
 0xd20   : > { %v2915_v20 = vpack.c.bf16 %v2911_v17, %v2911_v17  ;;  %2914 = vst [vmem:[%s10098_s26] sm:$0xf] %v2911_v17  ;;  %s6528_s26 = sshll.u32 %s7120_s25, 2 }
 0xd21   : > { %s5126_s17 = scalar_lea.hbm %s10081_s16, %s6528_s26 }
 0xd22   : > { %3130 = vmatmul.bf16.vlgmr.msrb.gmra.mxu2 %v2915_v20  ;;  %3117 = vmatmul.bf16.vlgmr.msra.gmra.mxu3 %v2915_v20  ;;  %s5130_s21 = sshll.u32 %s5126_s17, 4  ;;  %s5131_s21 = int_to_ptr.hbm [resolvable:$true] %s5130_s21 }
 0xd23   : > { %3156 = vmatmul.bf16.vlgmr.msrb.gmra.mxu1 %v2915_v20  ;;  %3143 = vmatmul.bf16.vlgmr.msrb.gmra.mxu0 %v2915_v20  ;;  %v6146_v20 = vor.u32 %v6713_v49, %v6145_v59  ;;  %v6086_v49 = vor.u32 %v6695_v57, %v6083_v0  ;;  %v3567_v57 = vld [vmem:[%s10073_s8 + $0x8] sm:$0xff] }
 0xda0   : > { %v3157_v23 = vpop.f32.mrf.mxu1  ;;  %v3144_v33 = vpop.f32.mrf.mxu0 }
 0xda1   : > { %v3165_v15 = vrot.slane %v3157_v23, 4  ;;  %v6147_v23 = vld [vmem:[%s10067_s2 + $0x5b0] sm:$0xf0] }
 0xda3   : > { %v3169_v38 = vsel %vm3167_vm13, %v3144_v33, %v3165_v15  ;;  %v6153_v33 = vld [vmem:[%s10067_s2 + $0x5a8] sm:$0xf]  ;;  %v6714_v15 = vld [vmem:[%s10067_s2 + $0x5b4] sm:$0xf0] }
 0xda4   : > { %3193 = vmatpush.msrb.mxu3 %v3169_v38  ;;  %v6150_v38 = vor.u32 %v6711_v62, %v6147_v23  ;;  %v6091_v23 = vld [vmem:[%s10067_s2 + $0x538] sm:$0xf0] }
 0xda5   : > { %v3131_v24 = vpop.f32.mrf.mxu2  ;;  %v3118_v18 = vpop.f32.mrf.mxu3 }
 0xda6   : > { %v3162_v26 = vrot.slane %v3131_v24, 4  ;;  %v6154_v24 = vor.u32 %v6714_v15, %v6153_v33  ;;  %v6065_v33 = vld [vmem:[%s10067_s2 + $0x500] sm:$0xf] }
 0xda8   : > { %v3168_v27 = vsel %vm3167_vm13, %v3118_v18, %v3162_v26  ;;  %v3146_v48 = vpop.f32.mrf.mxu0  ;;  %v3159_v2 = vpop.f32.mrf.mxu1  ;;  %v6712_v18 = vld [vmem:[%s10067_s2 + $0x5ac] sm:$0xf]  ;;  %v6155_v26 = vld [vmem:[%s10067_s2 + $0x5b8] sm:$0xf0] }
 0xda9   : > { %3194 = vmatpush.msrb.mxu3 %v3168_v27  ;;  %v6129_v27 = vld [vmem:[%s10067_s2 + $0x580] sm:$0xf]  ;;  %v6709_v48 = vld [vmem:[%s10067_s2 + $0x58c] sm:$0xf0]  ;;  %v6707_v2 = vld [vmem:[%s10067_s2 + $0x584] sm:$0xf] }
 0xdaa   : > { %6023 = vmatmul.msk.f32.vlgmr.msrb.gmra.mxu3 %vm3172_vm14, %v3170_v25  ;;  %v6158_v25 = vor.u32 %v6712_v18, %v6155_v26  ;;  %v6691_v18 = vld [vmem:[%s10067_s2 + $0x504] sm:$0xf]  ;;  %v6067_v26 = vld [vmem:[%s10067_s2 + $0x510] sm:$0xf0] }
 0xdad   : > { %v3120_v28 = vpop.f32.mrf.mxu3  ;;  %v3133_v30 = vpop.f32.mrf.mxu2 }
 0xdae   : > { %v6130_v28 = vor.u32 %v6709_v48, %v6129_v27  ;;  %v6131_v30 = vld [vmem:[%s10067_s2 + $0x590] sm:$0xf0]  ;;  %v6073_v27 = vld [vmem:[%s10067_s2 + $0x508] sm:$0xf]  ;;  %v6694_v48 = vld [vmem:[%s10067_s2 + $0x514] sm:$0xf0] }
 0xdb2   : > { %6024 = vmatmul.msk.f32.gmra.mxu3 %vm3172_vm14, %v3171_v29  ;;  %v6137_v29 = vld [vmem:[%s10067_s2 + $0x588] sm:$0xf] }
 0xe2d   : > { %v8862_v21 = vpop.f32.mrf.mxu3 }
 0xe2e   : > { %v3202_v16 = vmul.f32 %v8862_v21, %v8862_v21 }
 0xe30   : > { %3208 = vrot.lane.b32.xlu1 %v3202_v16, %s10118_s27 }
 0xe35   : > { %v8867_v22 = vpop.f32.mrf.mxu3 }
 0xe36   : > { %3206 = vrot.lane.b32.xlu2 %v8867_v22, %s10118_s27  ;;  %v3203_v31 = vmul.f32 %v8867_v22, %v8867_v22 }
 0xe38   : > { %3210 = vrot.lane.b32.xlu0 %v3203_v31, %s10118_s27 }
 0xe40   : > { %3204 = vrot.lane.b32.xlu0 %v8862_v21, %s10118_s27 }
 0xe90   : > { %v3207_v37 = vpop.permute.xlu2 %3206 }
 0xe91   : > { %v3213_v55 = vadd.f32 %v3207_v37, %v8867_v22 }
 0xe93   : > { %3218 = vrot.lane.b32.xlu0 %v3213_v55, %s10119_s30 }
 0xea2   : > { %v3209_v32 = vpop.permute.xlu1 %3208 }
 0xea3   : > { %v3214_v11 = vadd.f32 %v3209_v32, %v3202_v16  ;;  %v6710_v16 = vld [vmem:[%s10067_s2 + $0x594] sm:$0xf0]  ;;  %v6139_v32 = vld [vmem:[%s10067_s2 + $0x598] sm:$0xf0] }
 0xea4   : > { %v6138_v37 = vor.u32 %v6710_v16, %v6137_v29  ;;  %v6070_v29 = vor.u32 %v6691_v18, %v6067_v26  ;;  %v6075_v16 = vld [vmem:[%s10067_s2 + $0x518] sm:$0xf0] }
 0xea5   : > { %3220 = vrot.lane.b32.xlu2 %v3214_v11, %s10119_s30 }
 0xeaa   : > { %v3211_v1 = vpop.permute.xlu0 %3210 }
 0xeab   : > { %v3215_v34 = vadd.f32 %v3211_v1, %v3203_v31  ;;  %v6134_v31 = vor.u32 %v6707_v2, %v6131_v30  ;;  %v6692_v2 = vld [vmem:[%s10067_s2 + $0x50c] sm:$0xf] }
 0xead   : > { %3222 = vrot.lane.b32.xlu1 %v3215_v34, %s10119_s30 }
 0xeb2   : > { %v3205_v40 = vpop.permute.xlu0 %3204 }
 0xeb3   : > { %v3212_v41 = vadd.f32 %v3205_v40, %v8862_v21  ;;  %v6705_v40 = vld [vmem:[%s10067_s2 + $0x56c] sm:$0xf0] }
 0xeb5   : > { %3216 = vrot.lane.b32.xlu1 %v3212_v41, %s10119_s30 }
 0xeff   : > { %v3221_v42 = vpop.permute.xlu2 %3220 }
 0xf00   : > { %v3226_v45 = vadd.f32 %v3221_v42, %v3214_v11 }
 0xf05   : > { %v3219_v63 = vpop.permute.xlu0 %3218 }
 0xf06   : > { %v3225_v46 = vadd.f32 %v3219_v63, %v3213_v55  ;;  %v6708_v55 = vld [vmem:[%s10067_s2 + $0x58c] sm:$0xf]  ;;  %v6121_v63 = vld [vmem:[%s10067_s2 + $0x568] sm:$0xf] }
 0xf07   : > { %v6142_v11 = vor.u32 %v6708_v55, %v6139_v32  ;;  %v6078_v55 = vor.u32 %v6692_v2, %v6075_v16 }
 0xf1f   : > { %v3223_v44 = vpop.permute.xlu1 %3222 }
 0xf20   : > { %v3227_v56 = vadd.f32 %v3223_v44, %v3215_v34  ;;  %v6113_v34 = vld [vmem:[%s10067_s2 + $0x560] sm:$0xf] }
 0xf21   : > { %v6114_v44 = vor.u32 %v6705_v40, %v6113_v34  ;;  %v6852_v40 = vld [vmem:[%s10079_s14 + $0x6] ss:$0 sm:$0xff] }
 0xf22   : > { %3256 = vmatpush.msra.mxu2 %v3227_v56  ;;  %v6115_v56 = vld [vmem:[%s10067_s2 + $0x570] sm:$0xf0] }
 0xf24   : > { %3257 = vmatpush.msra.mxu2 %v3226_v45  ;;  %v6706_v45 = vld [vmem:[%s10067_s2 + $0x574] sm:$0xf0] }
 0xf26   : > { %3258 = vmatpush.msra.mxu2 %v3225_v46 }
 0xf27   : > { %v3217_v39 = vpop.permute.xlu1 %3216 }
 0xf28   : > { %v3224_v35 = vadd.f32 %v3217_v39, %v3212_v41  ;;  %v6703_v41 = vld [vmem:[%s10067_s2 + $0x564] sm:$0xf] }
 0xf29   : > { %v6118_v39 = vor.u32 %v6703_v41, %v6115_v56 }
 0xf2a   : > { %3259 = vmatpush.msra.mxu2 %v3224_v35  ;;  %v6122_v35 = vor.u32 %v6706_v45, %v6121_v63 }
 0xf2b   : > { %6025 = vmatmul.msk.f32.vlgmr.msra.gmra.mxu2 %vm2555_vm5, %v8412_v8  ;;  %v6719_v8 = vld [vmem:[%s10067_s2 + $0x5e4] sm:$0xf] }
 0xf2c   : > { %3552 = vmatpush.bf16.msrb.mxu2 %v6190_v58  ;;  %v6702_v58 = vld [vmem:[%s10067_s2 + $0x554] sm:$0xf0] }
 0xf2d   : > { %v6106_v36 = vor.u32 %v6702_v58, %v6105_v43 }
 0xf30   : > { %3553 = vmatpush.bf16.msrb.mxu2 %v6174_v9  ;;  %v6698_v9 = vld [vmem:[%s10067_s2 + $0x534] sm:$0xf0] }
 0xf31   : > { %v6090_v62 = vor.u32 %v6698_v9, %v6089_v14 }
 0xf33   : > { %6026 = vmatmul.msk.f32.gmra.mxu2 %vm2555_vm5, %v8419_v10  ;;  %v6178_v10 = vor.u32 %v6721_v51, %v6177_v19  ;;  %v6704_v19 = vld [vmem:[%s10067_s2 + $0x56c] sm:$0xf]  ;;  %v6123_v51 = vld [vmem:[%s10067_s2 + $0x578] sm:$0xf0] }
 0xf34   : > { %3554 = vmatpush.bf16.msrb.mxu2 %v6158_v25 }
 0xf35   : > { %3510 = vmatpush.bf16.msra.mxu3 %v6178_v10 }
 0xf38   : > { %3555 = vmatpush.bf16.msrb.mxu2 %v6142_v11 }
 0xf39   : > { %3511 = vmatpush.bf16.msra.mxu3 %v6162_v4  ;;  %v6110_v4 = vor.u32 %v6700_v3, %v6107_v60 }
 0xf3b   : > { %6027 = vmatmul.msk.f32.gmra.mxu2 %vm2555_vm5, %v8426_v12  ;;  %v6179_v12 = vld [vmem:[%s10067_s2 + $0x5f0] sm:$0xf0] }
 0xf3c   : > { %v6182_v53 = vor.u32 %v6719_v8, %v6179_v12  ;;  %v6126_v8 = vor.u32 %v6704_v19, %v6123_v51  ;;  %v6097_v12 = vld [vmem:[%s10067_s2 + $0x540] sm:$0xf]  ;;  %v6853_v19 = vld [vmem:[%s10079_s14 + $0x7] ss:$0 sm:$0xff] }
 0xf3d   : > { %3512 = vmatpush.bf16.msra.mxu3 %v6146_v20  ;;  %v6696_v20 = vld [vmem:[%s10067_s2 + $0x52c] sm:$0xf] }
 0xf3e   : > { %3524 = vmatpush.bf16.msra.mxu0 %v6182_v53  ;;  %3556 = vmatpush.bf16.msrb.mxu2 %v6126_v8  ;;  %v6699_v53 = vld [vmem:[%s10067_s2 + $0x544] sm:$0xf] }
 0xf41   : > { %3513 = vmatpush.bf16.msra.mxu3 %v6130_v28 }
 0xf42   : > { %3525 = vmatpush.bf16.msra.mxu0 %v6166_v47  ;;  %3557 = vmatpush.bf16.msrb.mxu2 %v6110_v4 }
 0xf43   : > { %6028 = vmatmul.msk.f32.gmra.mxu2 %vm2555_vm5, %v8433_v13  ;;  %v6185_v13 = vld [vmem:[%s10067_s2 + $0x5e8] sm:$0xf] }
 0xf44   : > { %v6186_v54 = vor.u32 %v6722_v50, %v6185_v13  ;;  %v6701_v13 = vld [vmem:[%s10067_s2 + $0x54c] sm:$0xf0] }
 0xf45   : > { %3514 = vmatpush.bf16.msra.mxu3 %v6114_v44  ;;  %v6098_v50 = vor.u32 %v6701_v13, %v6097_v12 }
 0xf46   : > { %3538 = vmatpush.bf16.msra.mxu1 %v6186_v54  ;;  %3526 = vmatpush.bf16.msra.mxu0 %v6150_v38  ;;  %v6099_v54 = vld [vmem:[%s10067_s2 + $0x550] sm:$0xf0]  ;;  %v6094_v38 = vor.u32 %v6696_v20, %v6091_v23 }
 0xf47   : > { %v6102_v61 = vor.u32 %v6699_v53, %v6099_v54 }
 0xf48   : > { %3558 = vmatpush.bf16.msrb.mxu2 %v6094_v38 }
 0xf49   : > { %3515 = vmatpush.bf16.msra.mxu3 %v6098_v50 }
 0xf4a   : > { %3539 = vmatpush.bf16.msra.mxu1 %v6170_v7  ;;  %3527 = vmatpush.bf16.msra.mxu0 %v6134_v31  ;;  %v6082_v7 = vor.u32 %v6697_v6, %v6081_v5  ;;  %v3566_v6 = vld [vmem:[%s10073_s8] sm:$0xff] }
 0xf4c   : > { %3559 = vmatpush.bf16.msrb.mxu2 %v6078_v55 }
 0xf4d   : > { %3516 = vmatpush.bf16.msra.mxu3 %v6082_v7  ;;  %v3569_v7 = vld [vmem:[%s10073_s8 + $0x18] sm:$0xff] }
 0xf4e   : > { %3540 = vmatpush.bf16.msra.mxu1 %v6154_v24  ;;  %3528 = vmatpush.bf16.msra.mxu0 %v6118_v39  ;;  %v6693_v24 = vld [vmem:[%s10067_s2 + $0x50c] sm:$0xf0] }
 0xf4f   : > { %v6066_v25 = vor.u32 %v6693_v24, %v6065_v33 }
 0xf51   : > { %3517 = vmatpush.bf16.msra.mxu3 %v6066_v25 }
 0xf52   : > { %3541 = vmatpush.bf16.msra.mxu1 %v6138_v37  ;;  %3529 = vmatpush.bf16.msra.mxu0 %v6102_v61  ;;  %v6074_v37 = vor.u32 %v6694_v48, %v6073_v27 }
 0xf56   : > { %3542 = vmatpush.bf16.msra.mxu1 %v6122_v35  ;;  %3530 = vmatpush.bf16.msra.mxu0 %v6086_v49 }
 0xf5a   : > { %3543 = vmatpush.bf16.msra.mxu1 %v6106_v36  ;;  %3531 = vmatpush.bf16.msra.mxu0 %v6070_v29 }
 0xf5e   : > { %3544 = vmatpush.bf16.msra.mxu1 %v6090_v62 }
 0xf62   : > { %3545 = vmatpush.bf16.msra.mxu1 %v6074_v37 }
 0xfae   : > { %v8899_v52 = vpop.f32.mrf.mxu2 }
 0xfaf   : > { %v3273_v1 = vmul.f32 %v8899_v52, %v8899_v52 }
 0xfb6   : > { %v8949_v17 = vpop.f32.mrf.mxu2 }
 0xfb7   : > { %v3274_v47 = vmul.f32 %v8949_v17, %v8949_v17 }
 0xfbe   : > { %v3267_v42 = vpop.f32.mrf.mxu2 }
 0xfbf   : > { %v3275_v46 = vsub.f32 %v3267_v42, %v3273_v1 }
 0xfc1   : > { %v9016_v10 = vadd.f32 1e-05, %v3275_v46  ;;  %v3280_v46 = vsub.f32 %v8862_v21, %v8899_v52 }
 0xfc3   : > { %6886 = vrsqrt.f32 %v9016_v10  ;;  %vm3290_vm0 = vweird.f32 %v9016_v10 }
 0xfc6   : > { %v3270_v59 = vpop.f32.mrf.mxu2 }
 0xfc7   : > { %v3276_v15 = vsub.f32 %v3270_v59, %v3274_v47  ;;  %v3568_v47 = vld [vmem:[%s10073_s8 + $0x10] sm:$0xff] }
 0xfc9   : > { %v6887_v28 = vpop.eup %6886  ;;  %v3283_v30 = vadd.f32 1e-05, %v3276_v15 }
 0xfca   : > { %v3285_v31 = vmul.f32 %v6887_v28, %v9016_v10  ;;  %vm3291_vm15 = vweird.f32 %v6887_v28  ;;  %v3281_v10 = vsub.f32 %v8867_v22, %v8949_v17 }
 0xfcb   : > { %6888 = vrsqrt.f32 %v3283_v30  ;;  %vm3292_vm1 = vmor %vm3290_vm0, %vm3291_vm15  ;;  %vm3300_vm3 = vweird.f32 %v3283_v30 }
 0xfcc   : > { %v3286_v32 = vmul.f32 %v6887_v28, %v3285_v31 }
 0xfce   : > { %v3287_v11 = vmul.f32 0.5, %v3286_v32 }
 0xfd0   : > { %v3288_v1 = vsub.f32 1.5, %v3287_v11 }
 0xfd1   : > { %v6889_v34 = vpop.eup %6888 }
 0xfd2   : > { %v3289_v41 = vmul.f32 %v6887_v28, %v3288_v1  ;;  %v3295_v42 = vmul.f32 %v6889_v34, %v3283_v30  ;;  %vm3301_vm2 = vweird.f32 %v6889_v34 }
 0xfd3   : > { %vm3302_vm4 = vmor %vm3300_vm3, %vm3301_vm2 }
 0xfd4   : > { %v3293_v44 = vsel %vm3292_vm1, %v6887_v28, %v3289_v41  ;;  %v3296_v56 = vmul.f32 %v6889_v34, %v3295_v42 }
 0xfd5   : > { %v3305_v63 = vmul.f32 %v6852_v40, %v3293_v44 }
 0xfd6   : > { %v3297_v45 = vmul.f32 0.5, %v3296_v56 }
 0xfd7   : > { %v3307_v35 = vmul.f32 %v3305_v63, %v3280_v46 }
 0xfd8   : > { %v3298_v39 = vsub.f32 1.5, %v3297_v45 }
 0xfd9   : > { %v3310_v12 = vadd.f32 %v6853_v19, %v3307_v35 }
 0xfda   : > { %v3299_v51 = vmul.f32 %v6889_v34, %v3298_v39 }
 0xfdb   : > { %v3312_v54 = vmul.f32 0.2, %v3310_v12 }
 0xfdc   : > { %v3303_v8 = vsel %vm3302_vm4, %v6889_v34, %v3299_v51 }
 0xfdd   : > { %v3306_v13 = vmul.f32 %v6852_v40, %v3303_v8  ;;  %v3314_v52 = vmax.f32 %v3310_v12, %v3312_v54 }
 0xfdf   : > { %v3308_v50 = vmul.f32 %v3306_v13, %v3281_v10 }
 0xfe1   : > { %v3311_v53 = vadd.f32 %v6853_v19, %v3308_v50 }
 0xfe3   : > { %v3313_v21 = vmul.f32 0.2, %v3311_v53 }
 0xfe5   : > { %v3315_v43 = vmax.f32 %v3311_v53, %v3313_v21 }
 0xfe7   : > { %v3316_v61 = vpack.c.bf16 %v3315_v43, %v3314_v52 }
 0xfe9   : > { %3518 = vmatmul.bf16.vlgmr.msra.gmra.mxu3 %v3316_v61  ;;  %3532 = vmatmul.bf16.vlgmr.msra.gmra.mxu0 %v3316_v61 }
 0xfea   : > { %3546 = vmatmul.bf16.vlgmr.msra.gmra.mxu1 %v3316_v61  ;;  %3560 = vmatmul.bf16.vlgmr.msrb.gmra.mxu2 %v3316_v61 }
0x1066   : > { %v3533_v60 = vpop.f32.mrf.mxu0 }
0x1067   : > { %v3547_v3 = vpop.f32.mrf.mxu1 }
0x106c   : > { %v3519_v4 = vpop.f32.mrf.mxu3 }
0x106d   : > { %v3561_v58 = vpop.f32.mrf.mxu2 }
0x106e   : > { %v3535_v17 = vpop.f32.mrf.mxu0 }
0x106f   : > { %v3549_v22 = vpop.f32.mrf.mxu1 }
0x1074   : > { %v3521_v5 = vpop.f32.mrf.mxu3 }
0x1075   : > { %v3563_v36 = vpop.f32.mrf.mxu2 }
0x1076   : > { %3590 = vmatpush.msrb.mxu3 %v3563_v36 }
0x1078   : > { %3591 = vmatpush.msrb.mxu3 %v3561_v58 }
0x107a   : > { %3592 = vmatpush.msrb.mxu3 %v3549_v22  ;;  %v3688_v22 = vld [vmem:[%s10077_s12 + $0x8] sm:$0xff] }
0x107c   : > { %3593 = vmatpush.msrb.mxu3 %v3547_v3 }
0x107e   : > { %3594 = vmatpush.msrb.mxu3 %v3535_v17  ;;  %v3689_v17 = vld [vmem:[%s10077_s12 + $0x10] sm:$0xff] }
0x1080   : > { %3595 = vmatpush.msrb.mxu3 %v3533_v60 }
0x1082   : > { %3596 = vmatpush.msrb.mxu3 %v3521_v5  ;;  %v3690_v5 = vld [vmem:[%s10077_s12 + $0x18] sm:$0xff] }
0x1084   : > { %3597 = vmatpush.msrb.mxu3 %v3519_v4  ;;  %v3687_v4 = vld [vmem:[%s10077_s12] sm:$0xff] }
0x1085   : > { %6191 = vmatmul.msk.f32.vlgmr.msrb.gmra.mxu3 %vm2082_vm8, %v3566_v6  ;;  %v3691_v6 = vld [vmem:[%s10077_s12 + $0x20] sm:$0xff] }
0x108d   : > { %6192 = vmatmul.msk.f32.gmra.mxu3 %vm2082_vm8, %v3567_v57  ;;  %v3692_v57 = vld [vmem:[%s10077_s12 + $0x28] sm:$0xff] }
0x1095   : > { %6193 = vmatmul.msk.f32.gmra.mxu3 %vm2082_vm8, %v3568_v47  ;;  %v3693_v47 = vld [vmem:[%s10077_s12 + $0x30] sm:$0xff] }
0x109d   : > { %6194 = vmatmul.msk.f32.gmra.mxu3 %vm2082_vm8, %v3569_v7  ;;  %v3694_v7 = vld [vmem:[%s10077_s12 + $0x38] sm:$0xff] }
0x1108   : > { %v9121_v0 = vpop.f32.mrf.mxu3 }
0x1109   : > { %v3611_v23 = vmul.f32 %v9121_v0, %v9121_v0 }
0x1110   : > { %v9123_v14 = vpop.f32.mrf.mxu3 }
0x1111   : > { %v3612_v9 = vmul.f32 %v9123_v14, %v9123_v14 }
0x1113   : > { %3625 = vrot.lane.b32.xlu1 %v3612_v9, %s10117_s20 }
0x1118   : > { %v9128_v59 = vpop.f32.mrf.mxu3 }
0x1119   : > { %v3613_v49 = vmul.f32 %v9128_v59, %v9128_v59 }
0x111b   : > { %3619 = vrot.lane.b32.xlu1 %v9128_v59, %s10117_s20  ;;  %3627 = vrot.lane.b32.xlu0 %v3613_v49, %s10117_s20 }
0x1120   : > { %v9135_v62 = vpop.f32.mrf.mxu3 }
0x1121   : > { %v3614_v20 = vmul.f32 %v9135_v62, %v9135_v62 }
0x1123   : > { %3621 = vrot.lane.b32.xlu0 %v9135_v62, %s10117_s20  ;;  %3629 = vrot.lane.b32.xlu2 %v3614_v20, %s10117_s20 }
0x112b   : > { %3615 = vrot.lane.b32.xlu0 %v9121_v0, %s10117_s20  ;;  %3623 = vrot.lane.b32.xlu2 %v3611_v23, %s10117_s20 }
0x1133   : > { %3617 = vrot.lane.b32.xlu2 %v9123_v14, %s10117_s20 }
0x117d   : > { %v3630_v33 = vpop.permute.xlu2 %3629 }
0x117e   : > { %v3638_v15 = vadd.f32 %v3630_v33, %v3614_v20  ;;  %v6351_v20 = vld [vmem:[%s10067_s2 + $0x6e0] sm:$0xf]  ;;  %v6751_v33 = vld [vmem:[%s10067_s2 + $0x6e4] sm:$0xf] }
0x1180   : > { %3653 = vrot.lane.b32.xlu1 %v3638_v15, %s10118_s27 }
0x1185   : > { %v3626_v38 = vpop.permute.xlu1 %3625  ;;  %v3624_v24 = vpop.permute.xlu2 %3623 }
0x1186   : > { %v3636_v18 = vadd.f32 %v3626_v38, %v3612_v9  ;;  %v3635_v26 = vadd.f32 %v3624_v24, %v3611_v23  ;;  %v6753_v23 = vld [vmem:[%s10067_s2 + $0x6ec] sm:$0xf0]  ;;  %v6353_v38 = vld [vmem:[%s10067_s2 + $0x6f0] sm:$0xf0]  ;;  %v6359_v24 = vld [vmem:[%s10067_s2 + $0x6e8] sm:$0xf] }
0x1188   : > { %3649 = vrot.lane.b32.xlu0 %v3636_v18, %s10118_s27  ;;  %3647 = vrot.lane.b32.xlu1 %v3635_v26, %s10118_s27 }
0x118d   : > { %v3620_v25 = vpop.permute.xlu1 %3619  ;;  %v3628_v27 = vpop.permute.xlu0 %3627 }
0x118e   : > { %v3633_v48 = vadd.f32 %v3620_v25, %v9128_v59  ;;  %v3637_v2 = vadd.f32 %v3628_v27, %v3613_v49  ;;  %v3618_v28 = vpop.permute.xlu2 %3617 }
0x118f   : > { %v3632_v30 = vadd.f32 %v3618_v28, %v9123_v14  ;;  %v6747_v28 = vld [vmem:[%s10067_s2 + $0x6c4] sm:$0xf] }
0x1190   : > { %3643 = vrot.lane.b32.xlu0 %v3633_v48, %s10118_s27  ;;  %3651 = vrot.lane.b32.xlu2 %v3637_v2, %s10118_s27 }
0x1191   : > { %3641 = vrot.lane.b32.xlu1 %v3632_v30, %s10118_s27 }
0x1195   : > { %v3622_v29 = vpop.permute.xlu0 %3621 }
0x1196   : > { %v3634_v16 = vadd.f32 %v3622_v29, %v9135_v62  ;;  %v6337_v29 = vld [vmem:[%s10067_s2 + $0x6d0] sm:$0xf0] }
0x1198   : > { %3645 = vrot.lane.b32.xlu2 %v3634_v16, %s10118_s27 }
0x119d   : > { %v3616_v31 = vpop.permute.xlu0 %3615 }
0x119e   : > { %v3631_v37 = vadd.f32 %v3616_v31, %v9121_v0  ;;  %v6750_v31 = vld [vmem:[%s10067_s2 + $0x6d4] sm:$0xf0] }
0x11a0   : > { %3639 = vrot.lane.b32.xlu2 %v3631_v37, %s10118_s27 }
0x11ea   : > { %v3652_v55 = vpop.permute.xlu2 %3651 }
0x11eb   : > { %v3661_v32 = vadd.f32 %v3652_v55, %v3637_v2  ;;  %v6749_v2 = vld [vmem:[%s10067_s2 + $0x6cc] sm:$0xf0] }
0x11ed   : > { %3675 = vrot.lane.b32.xlu1 %v3661_v32, %s10119_s30 }
0x11f2   : > { %v3654_v11 = vpop.permute.xlu1 %3653  ;;  %v3646_v1 = vpop.permute.xlu2 %3645 }
0x11f3   : > { %v3662_v34 = vadd.f32 %v3654_v11, %v3638_v15  ;;  %v3658_v40 = vadd.f32 %v3646_v1, %v3634_v16  ;;  %v6352_v15 = vor.u32 %v6753_v23, %v6351_v20  ;;  %v6343_v16 = vld [vmem:[%s10067_s2 + $0x6c8] sm:$0xf]  ;;  %v6745_v11 = vld [vmem:[%s10067_s2 + $0x6ac] sm:$0xf0]  ;;  %v6743_v1 = vld [vmem:[%s10067_s2 + $0x6a4] sm:$0xf] }
0x11f4   : > { %v6344_v55 = vor.u32 %v6750_v31, %v6343_v16  ;;  %v6239_v16 = vld [vmem:[%s10067_s2 + $0x600] sm:$0xf]  ;;  %v6725_v31 = vld [vmem:[%s10067_s2 + $0x60c] sm:$0xf0] }
0x11f5   : > { %3677 = vrot.lane.b32.xlu0 %v3662_v34, %s10119_s30  ;;  %3669 = vrot.lane.b32.xlu1 %v3658_v40, %s10119_s30 }
0x11f6   : > { %4036 = vmatpush.bf16.msrb.mxu1 %v6352_v15  ;;  %v6729_v15 = vld [vmem:[%s10067_s2 + $0x62c] sm:$0xf0] }
0x11fa   : > { %v3650_v41 = vpop.permute.xlu0 %3649  ;;  %v3648_v42 = vpop.permute.xlu1 %3647 }
0x11fb   : > { %v3660_v44 = vadd.f32 %v3650_v41, %v3636_v18  ;;  %v3659_v56 = vadd.f32 %v3648_v42, %v3635_v26  ;;  %v3640_v63 = vpop.permute.xlu2 %3639  ;;  %v6754_v18 = vld [vmem:[%s10067_s2 + $0x6f4] sm:$0xf0]  ;;  %v6356_v26 = vor.u32 %v6751_v33, %v6353_v38  ;;  %v6327_v41 = vld [vmem:[%s10067_s2 + $0x6a8] sm:$0xf]  ;;  %v6255_v33 = vld [vmem:[%s10067_s2 + $0x620] sm:$0xf] }
0x11fc   : > { %v3655_v45 = vadd.f32 %v3640_v63, %v3631_v37  ;;  %v6360_v25 = vor.u32 %v6754_v18, %v6359_v24  ;;  %v6340_v37 = vor.u32 %v6747_v28, %v6337_v29  ;;  %v6727_v38 = vld [vmem:[%s10067_s2 + $0x624] sm:$0xf]  ;;  %v6256_v24 = vor.u32 %v6729_v15, %v6255_v33  ;;  %v6257_v18 = vld [vmem:[%s10067_s2 + $0x630] sm:$0xf0] }
0x11fd   : > { %3673 = vrot.lane.b32.xlu2 %v3660_v44, %s10119_s30  ;;  %3671 = vrot.lane.b32.xlu0 %v3659_v56, %s10119_s30 }
0x11fe   : > { %3663 = vrot.lane.b32.xlu1 %v3655_v45, %s10119_s30  ;;  %4055 = vmatpush.bf16.msra.mxu2 %v6356_v26  ;;  %v6263_v26 = vld [vmem:[%s10067_s2 + $0x628] sm:$0xf] }
0x11ff   : > { %4074 = vmatpush.bf16.msra.mxu3 %v6360_v25  ;;  %v6730_v25 = vld [vmem:[%s10067_s2 + $0x634] sm:$0xf0] }
0x1200   : > { %v6264_v28 = vor.u32 %v6730_v25, %v6263_v26  ;;  %v6736_v25 = vld [vmem:[%s10067_s2 + $0x66c] sm:$0xf] }
0x1202   : > { %v3644_v46 = vpop.permute.xlu0 %3643  ;;  %4056 = vmatpush.bf16.msra.mxu2 %v6340_v37  ;;  %v6723_v37 = vld [vmem:[%s10067_s2 + $0x604] sm:$0xf] }
0x1203   : > { %v3657_v39 = vadd.f32 %v3644_v46, %v3633_v48  ;;  %v3642_v35 = vpop.permute.xlu1 %3641  ;;  %v6335_v48 = vld [vmem:[%s10067_s2 + $0x6c0] sm:$0xf]  ;;  %4075 = vmatpush.bf16.msra.mxu3 %v6344_v55  ;;  %v6741_v46 = vld [vmem:[%s10067_s2 + $0x68c] sm:$0xf0]  ;;  %v6240_v55 = vor.u32 %v6725_v31, %v6239_v16 }
0x1204   : > { %v3656_v19 = vadd.f32 %v3642_v35, %v3632_v30  ;;  %v6336_v30 = vor.u32 %v6749_v2, %v6335_v48  ;;  %v6739_v35 = vld [vmem:[%s10067_s2 + $0x684] sm:$0xf]  ;;  %v6260_v2 = vor.u32 %v6727_v38, %v6257_v18  ;;  %v9396_v38 = vld [vmem:[%s10079_s14 + $0x9] ss:$0 sm:$0xff] }
0x1205   : > { %3667 = vrot.lane.b32.xlu2 %v3657_v39, %s10119_s30 }
0x1206   : > { %3665 = vrot.lane.b32.xlu0 %v3656_v19, %s10119_s30  ;;  %4037 = vmatpush.bf16.msrb.mxu1 %v6336_v30 }
0x1257   : > { %v3674_v8 = vpop.permute.xlu2 %3673 }
0x1258   : > { %v3684_v50 = vadd.f32 %v3674_v8, %v3660_v44  ;;  %v6746_v44 = vld [vmem:[%s10067_s2 + $0x6b4] sm:$0xf0] }
0x1259   : > { %v6328_v63 = vor.u32 %v6746_v44, %v6327_v41 }
0x125b   : > { %4076 = vmatpush.bf16.msra.mxu3 %v6328_v63  ;;  %v6752_v63 = vld [vmem:[%s10067_s2 + $0x6ec] sm:$0xf] }
0x125f   : > { %v3676_v51 = vpop.permute.xlu1 %3675  ;;  %v3668_v52 = vpop.permute.xlu2 %3667 }
0x1260   : > { %v3685_v13 = vadd.f32 %v3676_v51, %v3661_v32  ;;  %v3681_v61 = vadd.f32 %v3668_v52, %v3657_v39  ;;  %v6319_v32 = vld [vmem:[%s10067_s2 + $0x6a0] sm:$0xf]  ;;  %v6311_v51 = vld [vmem:[%s10067_s2 + $0x688] sm:$0xf] }
0x1261   : > { %v6295_v52 = vld [vmem:[%s10067_s2 + $0x668] sm:$0xf] }
0x1267   : > { %v3678_v10 = vpop.permute.xlu0 %3677  ;;  %v3670_v53 = vpop.permute.xlu1 %3669 }
0x1268   : > { %v3686_v12 = vadd.f32 %v3678_v10, %v3662_v34  ;;  %v3682_v43 = vadd.f32 %v3670_v53, %v3658_v40  ;;  %v6320_v34 = vor.u32 %v6745_v11, %v6319_v32  ;;  %v6321_v40 = vld [vmem:[%s10067_s2 + $0x6b0] sm:$0xf0]  ;;  %v6742_v10 = vld [vmem:[%s10067_s2 + $0x694] sm:$0xf0]  ;;  %v6735_v53 = vld [vmem:[%s10067_s2 + $0x664] sm:$0xf] }
0x1269   : > { %v6324_v42 = vor.u32 %v6743_v1, %v6321_v40  ;;  %v6241_v32 = vld [vmem:[%s10067_s2 + $0x610] sm:$0xf0]  ;;  %v6247_v11 = vld [vmem:[%s10067_s2 + $0x608] sm:$0xf]  ;;  %v6726_v1 = vld [vmem:[%s10067_s2 + $0x614] sm:$0xf0] }
0x126a   : > { %3727 = vmatpush.msrb.mxu0 %v3686_v12  ;;  %4038 = vmatpush.bf16.msrb.mxu1 %v6320_v34  ;;  %v6312_v12 = vor.u32 %v6742_v10, %v6311_v51  ;;  %v6244_v41 = vor.u32 %v6723_v37, %v6241_v32  ;;  %v6748_v10 = vld [vmem:[%s10067_s2 + $0x6cc] sm:$0xf] }
0x126b   : > { %4057 = vmatpush.bf16.msra.mxu2 %v6324_v42  ;;  %v6248_v42 = vor.u32 %v6726_v1, %v6247_v11  ;;  %v6728_v11 = vld [vmem:[%s10067_s2 + $0x62c] sm:$0xf]  ;;  %v6265_v1 = vld [vmem:[%s10067_s2 + $0x638] sm:$0xf0] }
0x126c   : > { %3728 = vmatpush.msrb.mxu0 %v3685_v13  ;;  %v6287_v13 = vld [vmem:[%s10067_s2 + $0x660] sm:$0xf]  ;;  %4077 = vmatpush.bf16.msra.mxu3 %v6312_v12  ;;  %v6345_v12 = vld [vmem:[%s10067_s2 + $0x6d8] sm:$0xf0] }
0x126e   : > { %3729 = vmatpush.msrb.mxu0 %v3684_v50  ;;  %v6737_v50 = vld [vmem:[%s10067_s2 + $0x66c] sm:$0xf0] }
0x126f   : > { %v3672_v54 = vpop.permute.xlu0 %3671 }
0x1270   : > { %v3683_v21 = vadd.f32 %v3672_v54, %v3659_v56  ;;  %v3664_v58 = vpop.permute.xlu1 %3663  ;;  %v6288_v54 = vor.u32 %v6737_v50, %v6287_v13  ;;  %v6744_v13 = vld [vmem:[%s10067_s2 + $0x6ac] sm:$0xf] }
0x1271   : > { %v3679_v36 = vadd.f32 %v3664_v58, %v3655_v45  ;;  %v6303_v45 = vld [vmem:[%s10067_s2 + $0x680] sm:$0xf] }
0x1272   : > { %3730 = vmatpush.msrb.mxu0 %v3683_v21  ;;  %v6304_v39 = vor.u32 %v6741_v46, %v6303_v45  ;;  %v6289_v21 = vld [vmem:[%s10067_s2 + $0x670] sm:$0xf0]  ;;  %v6361_v45 = vld [vmem:[%s10067_s2 + $0x6f8] sm:$0xf0] }
0x1273   : > { %v6292_v58 = vor.u32 %v6735_v53, %v6289_v21  ;;  %v6348_v53 = vor.u32 %v6748_v10, %v6345_v12 }
0x1274   : > { %3731 = vmatpush.msrb.mxu0 %v3682_v43  ;;  %4039 = vmatpush.bf16.msrb.mxu1 %v6304_v39  ;;  %v6738_v43 = vld [vmem:[%s10067_s2 + $0x674] sm:$0xf0]  ;;  %v6364_v39 = vor.u32 %v6752_v63, %v6361_v45  ;;  %v6724_v45 = vld [vmem:[%s10067_s2 + $0x60c] sm:$0xf] }
0x1276   : > { %3732 = vmatpush.msrb.mxu0 %v3681_v61 }
0x1278   : > { %v3666_v3 = vpop.permute.xlu0 %3665  ;;  %4040 = vmatpush.bf16.msrb.mxu1 %v6288_v54  ;;  %v6329_v54 = vld [vmem:[%s10067_s2 + $0x6b8] sm:$0xf0] }
0x1279   : > { %v3680_v60 = vadd.f32 %v3666_v3, %v3656_v19  ;;  %v6305_v19 = vld [vmem:[%s10067_s2 + $0x690] sm:$0xf0]  ;;  %v6296_v3 = vor.u32 %v6738_v43, %v6295_v52  ;;  %v9380_v52 = vld [vmem:[%s10079_s14 + $0x8] ss:$0 sm:$0xff] }
0x127a   : > { %v6308_v8 = vor.u32 %v6739_v35, %v6305_v19 }
0x127b   : > { %3733 = vmatpush.msrb.mxu0 %v3680_v60  ;;  %4078 = vmatpush.bf16.msra.mxu3 %v6296_v3  ;;  %v6332_v3 = vor.u32 %v6744_v13, %v6329_v54 }
0x127c   : > { %4058 = vmatpush.bf16.msra.mxu2 %v6308_v8 }
0x127d   : > { %3734 = vmatpush.msrb.mxu0 %v3679_v36 }
0x127e   : > { %6195 = vmatmul.msk.f32.vlgmr.msrb.gmra.mxu0 %vm2082_vm8, %v3687_v4  ;;  %v6271_v4 = vld [vmem:[%s10067_s2 + $0x640] sm:$0xf] }
0x1280   : > { %4059 = vmatpush.bf16.msra.mxu2 %v6292_v58 }
0x1286   : > { %6196 = vmatmul.msk.f32.gmra.mxu0 %vm2082_vm8, %v3688_v22  ;;  %v6733_v22 = vld [vmem:[%s10067_s2 + $0x64c] sm:$0xf0] }
0x128e   : > { %6197 = vmatmul.msk.f32.gmra.mxu0 %vm2082_vm8, %v3689_v17  ;;  %v6731_v17 = vld [vmem:[%s10067_s2 + $0x644] sm:$0xf] }
0x1296   : > { %6198 = vmatmul.msk.f32.gmra.mxu0 %vm2082_vm8, %v3690_v5  ;;  %v6272_v5 = vor.u32 %v6733_v22, %v6271_v4 }
0x1298   : > { %4041 = vmatpush.bf16.msrb.mxu1 %v6272_v5 }
0x129c   : > { %4042 = vmatpush.bf16.msrb.mxu1 %v6256_v24 }
0x129e   : > { %6199 = vmatmul.msk.f32.gmra.mxu0 %vm2082_vm8, %v3691_v6  ;;  %v6273_v6 = vld [vmem:[%s10067_s2 + $0x650] sm:$0xf0] }
0x129f   : > { %v6276_v20 = vor.u32 %v6731_v17, %v6273_v6 }
0x12a0   : > { %4043 = vmatpush.bf16.msrb.mxu1 %v6240_v55 }
0x12a1   : > { %4060 = vmatpush.bf16.msra.mxu2 %v6276_v20 }
0x12a4   : > { %4093 = vmatpush.bf16.msra.mxu1 %v6364_v39 }
0x12a5   : > { %4061 = vmatpush.bf16.msra.mxu2 %v6260_v2  ;;  %v6281_v2 = vld [vmem:[%s10067_s2 + $0x658] sm:$0xf0] }
0x12a6   : > { %6200 = vmatmul.msk.f32.gmra.mxu0 %vm2082_vm8, %v3692_v57  ;;  %v6279_v57 = vld [vmem:[%s10067_s2 + $0x648] sm:$0xf] }
0x12a8   : > { %4094 = vmatpush.bf16.msra.mxu1 %v6348_v53 }
0x12a9   : > { %4062 = vmatpush.bf16.msra.mxu2 %v6244_v41 }
0x12ac   : > { %4095 = vmatpush.bf16.msra.mxu1 %v6332_v3 }
0x12ae   : > { %6201 = vmatmul.msk.f32.gmra.mxu0 %vm2082_vm8, %v3693_v47  ;;  %v6734_v47 = vld [vmem:[%s10067_s2 + $0x654] sm:$0xf0] }
0x12af   : > { %v6280_v23 = vor.u32 %v6734_v47, %v6279_v57 }
0x12b1   : > { %4079 = vmatpush.bf16.msra.mxu3 %v6280_v23 }
0x12b5   : > { %4080 = vmatpush.bf16.msra.mxu3 %v6264_v28 }
0x12b6   : > { %6202 = vmatmul.msk.f32.gmra.mxu0 %vm2082_vm8, %v3694_v7 }
0x12b9   : > { %4081 = vmatpush.bf16.msra.mxu3 %v6248_v42 }
0x12fb   : > { %v9201_v9 = vpop.f32.mrf.mxu0 }
0x12fc   : > { %v3760_v61 = vmul.f32 %v9201_v9, %v9201_v9 }
0x1303   : > { %v9203_v49 = vpop.f32.mrf.mxu0 }
0x1304   : > { %v3761_v48 = vmul.f32 %v9203_v49, %v9203_v49 }
0x130b   : > { %v9223_v27 = vpop.f32.mrf.mxu0 }
0x130c   : > { %v3762_v35 = vmul.f32 %v9223_v27, %v9223_v27  ;;  %v3773_v13 = vsub.f32 %v9128_v59, %v9223_v27 }
0x1313   : > { %v9261_v56 = vpop.f32.mrf.mxu0 }
0x1314   : > { %v3763_v17 = vmul.f32 %v9261_v56, %v9261_v56 }
0x131b   : > { %v3748_v60 = vpop.f32.mrf.mxu0 }
0x131c   : > { %v3764_v36 = vsub.f32 %v3748_v60, %v3760_v61  ;;  %v6740_v60 = vld [vmem:[%s10067_s2 + $0x68c] sm:$0xf] }
0x131e   : > { %v3775_v7 = vadd.f32 1e-05, %v3764_v36  ;;  %v6313_v36 = vld [vmem:[%s10067_s2 + $0x698] sm:$0xf0] }
0x131f   : > { %v6316_v47 = vor.u32 %v6740_v60, %v6313_v36 }
0x1320   : > { %6890 = vrsqrt.f32 %v3775_v7  ;;  %vm3785_vm5 = vweird.f32 %v3775_v7 }
0x1321   : > { %4096 = vmatpush.bf16.msra.mxu1 %v6316_v47 }
0x1323   : > { %v3751_v30 = vpop.f32.mrf.mxu0 }
0x1324   : > { %v3765_v29 = vsub.f32 %v3751_v30, %v3761_v48  ;;  %v6732_v48 = vld [vmem:[%s10067_s2 + $0x64c] sm:$0xf] }
0x1325   : > { %v6284_v55 = vor.u32 %v6732_v48, %v6281_v2  ;;  %v4115_v48 = vld [vmem:[%s10074_s9 + $0x18] sm:$0xff]  ;;  %v4116_v2 = vld [vmem:[%s10074_s9 + $0x20] sm:$0xff] }
0x1326   : > { %v6891_v34 = vpop.eup %6890  ;;  %v3776_v40 = vadd.f32 1e-05, %v3765_v29  ;;  %v3772_v29 = vsub.f32 %v9123_v14, %v9203_v49 }
0x1327   : > { %v3780_v44 = vmul.f32 %v6891_v34, %v3775_v7  ;;  %vm3786_vm8 = vweird.f32 %v6891_v34  ;;  %v3771_v7 = vsub.f32 %v9121_v0, %v9201_v9  ;;  %v6297_v0 = vld [vmem:[%s10067_s2 + $0x678] sm:$0xf0] }
0x1328   : > { %6892 = vrsqrt.f32 %v3776_v40  ;;  %vm3787_vm6 = vmor %vm3785_vm5, %vm3786_vm8  ;;  %vm3795_vm9 = vweird.f32 %v3776_v40  ;;  %v6300_v9 = vor.u32 %v6736_v25, %v6297_v0  ;;  %v4112_v25 = vld [vmem:[%s10074_s9] sm:$0xff]  ;;  %v4113_v0 = vld [vmem:[%s10074_s9 + $0x8] sm:$0xff] }
0x1329   : > { %v3781_v46 = vmul.f32 %v6891_v34, %v3780_v44  ;;  %v6268_v44 = vor.u32 %v6728_v11, %v6265_v1 }
0x132a   : > { %4097 = vmatpush.bf16.msra.mxu1 %v6300_v9  ;;  %v4114_v9 = vld [vmem:[%s10074_s9 + $0x10] sm:$0xff] }
0x132b   : > { %v3782_v19 = vmul.f32 0.5, %v3781_v46  ;;  %v3754_v51 = vpop.f32.mrf.mxu0  ;;  %v6249_v46 = vld [vmem:[%s10067_s2 + $0x618] sm:$0xf0] }
0x132c   : > { %v3766_v8 = vsub.f32 %v3754_v51, %v3762_v35  ;;  %v6252_v12 = vor.u32 %v6724_v45, %v6249_v46 }
0x132d   : > { %v3783_v50 = vsub.f32 1.5, %v3782_v19 }
0x132e   : > { %v6893_v21 = vpop.eup %6892  ;;  %v3777_v43 = vadd.f32 1e-05, %v3766_v8  ;;  %4098 = vmatpush.bf16.msra.mxu1 %v6284_v55 }
0x132f   : > { %v3784_v61 = vmul.f32 %v6891_v34, %v3783_v50  ;;  %v3790_v58 = vmul.f32 %v6893_v21, %v3776_v40  ;;  %vm3796_vm7 = vweird.f32 %v6893_v21 }
0x1330   : > { %6894 = vrsqrt.f32 %v3777_v43  ;;  %vm3797_vm10 = vmor %vm3795_vm9, %vm3796_vm7  ;;  %vm3805_vm12 = vweird.f32 %v3777_v43 }
0x1331   : > { %v3788_v4 = vsel %vm3787_vm6, %v6891_v34, %v3784_v61  ;;  %v3791_v22 = vmul.f32 %v6893_v21, %v3790_v58  ;;  %v3774_v61 = vsub.f32 %v9135_v62, %v9261_v56 }
0x1332   : > { %v3820_v5 = vmul.f32 %v9380_v52, %v3788_v4  ;;  %4099 = vmatpush.bf16.msra.mxu1 %v6268_v44 }
0x1333   : > { %v3792_v6 = vmul.f32 0.5, %v3791_v22  ;;  %v3757_v57 = vpop.f32.mrf.mxu0 }
0x1334   : > { %v3767_v20 = vsub.f32 %v3757_v57, %v3763_v17  ;;  %v3824_v15 = vmul.f32 %v3820_v5, %v3771_v7 }
0x1335   : > { %v3793_v23 = vsub.f32 1.5, %v3792_v6 }
0x1336   : > { %v6895_v33 = vpop.eup %6894  ;;  %v3778_v24 = vadd.f32 1e-05, %v3767_v20  ;;  %v3829_v16 = vadd.f32 %v9396_v38, %v3824_v15  ;;  %4100 = vmatpush.bf16.msra.mxu1 %v6252_v12 }
0x1337   : > { %v3794_v18 = vmul.f32 %v6893_v21, %v3793_v23  ;;  %v3800_v26 = vmul.f32 %v6895_v33, %v3777_v43  ;;  %vm3806_vm11 = vweird.f32 %v6895_v33 }
0x1338   : > { %6896 = vrsqrt.f32 %v3778_v24  ;;  %v3833_v14 = vmul.f32 0.2, %v3829_v16  ;;  %vm3807_vm13 = vmor %vm3805_vm12, %vm3806_vm11  ;;  %vm3815_vm15 = vweird.f32 %v3778_v24 }
0x1339   : > { %v3798_v28 = vsel %vm3797_vm10, %v6893_v21, %v3794_v18  ;;  %v3801_v30 = vmul.f32 %v6895_v33, %v3800_v26 }
0x133a   : > { %v3821_v31 = vmul.f32 %v9380_v52, %v3798_v28  ;;  %v3837_v51 = vmax.f32 %v3829_v16, %v3833_v14  ;;  %v4117_v28 = vld [vmem:[%s10074_s9 + $0x28] sm:$0xff] }
0x133b   : > { %v3802_v37 = vmul.f32 0.5, %v3801_v30  ;;  %v4118_v30 = vld [vmem:[%s10074_s9 + $0x30] sm:$0xff] }
0x133c   : > { %v3825_v32 = vmul.f32 %v3821_v31, %v3772_v29  ;;  %v4119_v29 = vld [vmem:[%s10074_s9 + $0x38] sm:$0xff] }
0x133d   : > { %v3803_v34 = vsub.f32 1.5, %v3802_v37 }
0x133e   : > { %v6897_v40 = vpop.eup %6896  ;;  %v3830_v49 = vadd.f32 %v9396_v38, %v3825_v32 }
0x133f   : > { %v3804_v41 = vmul.f32 %v6895_v33, %v3803_v34  ;;  %v3810_v42 = vmul.f32 %v6897_v40, %v3778_v24  ;;  %vm3816_vm14 = vweird.f32 %v6897_v40 }
0x1340   : > { %v3834_v63 = vmul.f32 0.2, %v3830_v49  ;;  %vm3817_vm0 = vmor %vm3815_vm15, %vm3816_vm14 }
0x1341   : > { %v3808_v39 = vsel %vm3807_vm13, %v6895_v33, %v3804_v41  ;;  %v3811_v35 = vmul.f32 %v6897_v40, %v3810_v42 }
0x1342   : > { %v3822_v19 = vmul.f32 %v9380_v52, %v3808_v39  ;;  %v3838_v8 = vmax.f32 %v3830_v49, %v3834_v63 }
0x1343   : > { %v3812_v10 = vmul.f32 0.5, %v3811_v35 }
0x1344   : > { %v3841_v50 = vpack.c.bf16 %v3838_v8, %v3837_v51  ;;  %v3826_v54 = vmul.f32 %v3822_v19, %v3773_v13 }
0x1345   : > { %v3813_v53 = vsub.f32 1.5, %v3812_v10 }
0x1346   : > { %4044 = vmatmul.bf16.vlgmr.msrb.gmra.mxu1 %v3841_v50  ;;  %4063 = vmatmul.bf16.vlgmr.msra.gmra.mxu2 %v3841_v50  ;;  %v3831_v3 = vadd.f32 %v9396_v38, %v3826_v54 }
0x1347   : > { %v3814_v21 = vmul.f32 %v6897_v40, %v3813_v53  ;;  %4082 = vmatmul.bf16.vlgmr.msra.gmra.mxu3 %v3841_v50 }
0x1348   : > { %v3835_v60 = vmul.f32 0.2, %v3831_v3 }
0x1349   : > { %v3818_v43 = vsel %vm3817_vm0, %v6897_v40, %v3814_v21 }
0x134a   : > { %v3823_v58 = vmul.f32 %v9380_v52, %v3818_v43  ;;  %v3839_v4 = vmax.f32 %v3831_v3, %v3835_v60 }
0x134c   : > { %v3827_v59 = vmul.f32 %v3823_v58, %v3774_v61 }
0x134e   : > { %v3832_v27 = vadd.f32 %v9396_v38, %v3827_v59 }
0x1350   : > { %v3836_v36 = vmul.f32 0.2, %v3832_v27 }
0x1352   : > { %v3840_v22 = vmax.f32 %v3832_v27, %v3836_v36 }
0x1354   : > { %v3842_v17 = vpack.c.bf16 %v3840_v22, %v3839_v4 }
0x1356   : > { %4049 = vmatmul.bf16.gmra.mxu1 %v3842_v17  ;;  %4068 = vmatmul.bf16.gmra.mxu2 %v3842_v17 }
0x1357   : > { %4087 = vmatmul.bf16.gmra.mxu3 %v3842_v17 }
0x1366   : > { %4101 = vmatmul.bf16.vlgmr.msra.gmra.mxu1 %v3841_v50 }
0x1376   : > { %4106 = vmatmul.bf16.gmra.mxu1 %v3842_v17 }
0x13c3   : > { %v4045_v5 = vpop.f32.mrf.mxu1 }
0x13c9   : > { %v4064_v7 = vpop.f32.mrf.mxu2 }
0x13ca   : > { %v4083_v57 = vpop.f32.mrf.mxu3 }
0x13cb   : > { %v4047_v6 = vpop.f32.mrf.mxu1 }
0x13d1   : > { %v4066_v33 = vpop.f32.mrf.mxu2 }
0x13d2   : > { %v4085_v20 = vpop.f32.mrf.mxu3 }
0x13d3   : > { %v4050_v62 = vpop.f32.mrf.mxu1 }
0x13d9   : > { %v4069_v24 = vpop.f32.mrf.mxu2 }
0x13da   : > { %v4088_v15 = vpop.f32.mrf.mxu3 }
0x13db   : > { %v4052_v56 = vpop.f32.mrf.mxu1 }
0x13e1   : > { %v4071_v26 = vpop.f32.mrf.mxu2 }
0x13e2   : > { %v4090_v18 = vpop.f32.mrf.mxu3 }
0x13e3   : > { %v4102_v52 = vpop.f32.mrf.mxu1 }
0x13eb   : > { %v4104_v47 = vpop.f32.mrf.mxu1 }
0x13f3   : > { %v4107_v23 = vpop.f32.mrf.mxu1 }
0x13fb   : > { %v4109_v38 = vpop.f32.mrf.mxu1 }
0x13fc   : > { %4120 = vmatpush.msrb.mxu2 %v4109_v38 }
0x13fe   : > { %4121 = vmatpush.msrb.mxu2 %v4107_v23 }
0x1400   : > { %4122 = vmatpush.msrb.mxu2 %v4104_v47 }
0x1402   : > { %4123 = vmatpush.msrb.mxu2 %v4102_v52 }
0x1404   : > { %4124 = vmatpush.msrb.mxu2 %v4090_v18 }
0x1406   : > { %4125 = vmatpush.msrb.mxu2 %v4088_v15 }
0x1408   : > { %4126 = vmatpush.msrb.mxu2 %v4085_v20 }
0x140a   : > { %4127 = vmatpush.msrb.mxu2 %v4083_v57 }
0x140c   : > { %4128 = vmatpush.msrb.mxu2 %v4071_v26 }
0x140e   : > { %4129 = vmatpush.msrb.mxu2 %v4069_v24 }
0x1410   : > { %4130 = vmatpush.msrb.mxu2 %v4066_v33 }
0x1412   : > { %4131 = vmatpush.msrb.mxu2 %v4064_v7 }
0x1414   : > { %4132 = vmatpush.msrb.mxu2 %v4052_v56 }
0x1416   : > { %4133 = vmatpush.msrb.mxu2 %v4050_v62 }
0x1418   : > { %4134 = vmatpush.msrb.mxu2 %v4047_v6 }
0x141a   : > { %4135 = vmatpush.msrb.mxu2 %v4045_v5 }
0x141b   : > { %4136 = vmatmul.f32.vlgmr.msrb.gmra.mxu2 %v4112_v25 }
0x1423   : > { %4139 = vmatmul.f32.gmra.mxu2 %v4113_v0 }
0x142b   : > { %4142 = vmatmul.f32.gmra.mxu2 %v4114_v9 }
0x1433   : > { %4145 = vmatmul.f32.gmra.mxu2 %v4115_v48 }
0x143b   : > { %4148 = vmatmul.f32.gmra.mxu2 %v4116_v2 }
0x1443   : > { %4151 = vmatmul.f32.gmra.mxu2 %v4117_v28 }
0x144b   : > { %4154 = vmatmul.f32.gmra.mxu2 %v4118_v30 }
0x1453   : > { %4157 = vmatmul.f32.gmra.mxu2 %v4119_v29 }
0x149e   : > { %v9459_v16 = vpop.f32.mrf.mxu2 }
0x149f   : > { %v4161_v44 = vmul.f32 %v9459_v16, %v9459_v16 }
0x14a6   : > { %v9461_v31 = vpop.f32.mrf.mxu2 }
0x14a7   : > { %v4162_v45 = vmul.f32 %v9461_v31, %v9461_v31 }
0x14ae   : > { %v9463_v37 = vpop.f32.mrf.mxu2 }
0x14af   : > { %v4163_v55 = vmul.f32 %v9463_v37, %v9463_v37 }
0x14b1   : > { %4189 = vrot.lane.b32.xlu1 %v4163_v55, %s10121_s29 }
0x14b6   : > { %v9468_v32 = vpop.f32.mrf.mxu2 }
0x14b7   : > { %v4164_v11 = vmul.f32 %v9468_v32, %v9468_v32 }
0x14b9   : > { %4191 = vrot.lane.b32.xlu0 %v4164_v11, %s10121_s29 }
0x14be   : > { %v9473_v1 = vpop.f32.mrf.mxu2 }
0x14bf   : > { %v4165_v34 = vmul.f32 %v9473_v1, %v9473_v1 }
0x14c1   : > { %4193 = vrot.lane.b32.xlu2 %v4165_v34, %s10121_s29 }
0x14c6   : > { %v9478_v40 = vpop.f32.mrf.mxu2 }
0x14c7   : > { %v4166_v14 = vmul.f32 %v9478_v40, %v9478_v40 }
0x14c9   : > { %4195 = vrot.lane.b32.xlu1 %v4166_v14, %s10121_s29 }
0x14ce   : > { %v9483_v49 = vpop.f32.mrf.mxu2 }
0x14cf   : > { %v4167_v41 = vmul.f32 %v9483_v49, %v9483_v49 }
0x14d1   : > { %4197 = vrot.lane.b32.xlu0 %v4167_v41, %s10121_s29 }
0x14d6   : > { %v9488_v42 = vpop.f32.mrf.mxu2 }
0x14d7   : > { %4183 = vrot.lane.b32.xlu1 %v9488_v42, %s10121_s29  ;;  %v4168_v63 = vmul.f32 %v9488_v42, %v9488_v42 }
0x14d9   : > { %4185 = vrot.lane.b32.xlu0 %v4161_v44, %s10121_s29  ;;  %4199 = vrot.lane.b32.xlu2 %v4168_v63, %s10121_s29 }
0x14df   : > { %4177 = vrot.lane.b32.xlu1 %v9473_v1, %s10121_s29 }
0x14e1   : > { %4179 = vrot.lane.b32.xlu0 %v9478_v40, %s10121_s29  ;;  %4187 = vrot.lane.b32.xlu2 %v4162_v45, %s10121_s29 }
0x14e7   : > { %4171 = vrot.lane.b32.xlu1 %v9461_v31, %s10121_s29 }
0x14e9   : > { %4173 = vrot.lane.b32.xlu0 %v9463_v37, %s10121_s29  ;;  %4181 = vrot.lane.b32.xlu2 %v9483_v49, %s10121_s29 }
0x14f1   : > { %4175 = vrot.lane.b32.xlu2 %v9468_v32, %s10121_s29 }
0x14f9   : > { %4169 = vrot.lane.b32.xlu2 %v9459_v16, %s10121_s29  ;;  %s6960_s29 = sshra.s32 %s5131_s21, 4  ;;  %s6961_s29 = int_to_ptr.hbm [resolvable:$true] %s6960_s29 }
0x14fa   : > { %p6967_p1 = scmp.lt.s32.totalorder %s6961_s29, %s10081_s16 }
0x151b   : > { %v4194_v46 = vpop.permute.xlu2 %4193 }
0x151c   : > { %v4213_v39 = vadd.f32 %v4194_v46, %v4165_v34 }
0x151e   : > { %4241 = vrot.lane.b32.xlu0 %v4213_v39, %s10117_s20 }
0x1523   : > { %v4190_v35 = vpop.permute.xlu1 %4189 }
0x1524   : > { %v4211_v19 = vadd.f32 %v4190_v35, %v4163_v55 }
0x1526   : > { %4237 = vrot.lane.b32.xlu2 %v4211_v19, %s10117_s20 }
0x152b   : > { %v4192_v51 = vpop.permute.xlu0 %4191 }
0x152c   : > { %v4212_v8 = vadd.f32 %v4192_v51, %v4164_v11 }
0x152e   : > { %4239 = vrot.lane.b32.xlu1 %v4212_v8, %s10117_s20 }
0x1533   : > { %v4200_v10 = vpop.permute.xlu2 %4199 }
0x1534   : > { %v4216_v12 = vadd.f32 %v4200_v10, %v4168_v63 }
0x1536   : > { %4247 = vrot.lane.b32.xlu0 %v4216_v12, %s10117_s20 }
0x153b   : > { %v4196_v13 = vpop.permute.xlu1 %4195  ;;  %v4188_v50 = vpop.permute.xlu2 %4187 }
0x153c   : > { %v4214_v53 = vadd.f32 %v4196_v13, %v4166_v14  ;;  %v4210_v54 = vadd.f32 %v4188_v50, %v4162_v45 }
0x153e   : > { %4243 = vrot.lane.b32.xlu2 %v4214_v53, %s10117_s20  ;;  %4235 = vrot.lane.b32.xlu0 %v4210_v54, %s10117_s20 }
0x1543   : > { %v4198_v21 = vpop.permute.xlu0 %4197  ;;  %v4182_v43 = vpop.permute.xlu2 %4181 }
0x1544   : > { %v4215_v61 = vadd.f32 %v4198_v21, %v4167_v41  ;;  %v4207_v58 = vadd.f32 %v4182_v43, %v9483_v49 }
0x1546   : > { %4245 = vrot.lane.b32.xlu1 %v4215_v61, %s10117_s20  ;;  %4229 = vrot.lane.b32.xlu0 %v4207_v58, %s10117_s20 }
0x1549   : > { %v4184_v3 = vpop.permute.xlu1 %4183 }
0x154a   : > { %v4208_v59 = vadd.f32 %v4184_v3, %v9488_v42 }
0x154b   : > { %v4186_v27 = vpop.permute.xlu0 %4185  ;;  %v4176_v60 = vpop.permute.xlu2 %4175 }
0x154c   : > { %v4209_v36 = vadd.f32 %v4186_v27, %v4161_v44  ;;  %v4204_v4 = vadd.f32 %v4176_v60, %v9468_v32  ;;  %4231 = vrot.lane.b32.xlu2 %v4208_v59, %s10117_s20 }
0x154e   : > { %4233 = vrot.lane.b32.xlu1 %v4209_v36, %s10117_s20  ;;  %4223 = vrot.lane.b32.xlu0 %v4204_v4, %s10117_s20 }
0x1551   : > { %v4178_v22 = vpop.permute.xlu1 %4177 }
0x1552   : > { %v4205_v17 = vadd.f32 %v4178_v22, %v9473_v1 }
0x1553   : > { %v4180_v5 = vpop.permute.xlu0 %4179  ;;  %v4170_v6 = vpop.permute.xlu2 %4169 }
0x1554   : > { %v4206_v62 = vadd.f32 %v4180_v5, %v9478_v40  ;;  %v4201_v56 = vadd.f32 %v4170_v6, %v9459_v16  ;;  %4225 = vrot.lane.b32.xlu2 %v4205_v17, %s10117_s20 }
0x1556   : > { %4227 = vrot.lane.b32.xlu1 %v4206_v62, %s10117_s20  ;;  %4217 = vrot.lane.b32.xlu0 %v4201_v56, %s10117_s20 }
0x1559   : > { %v4172_v52 = vpop.permute.xlu1 %4171 }
0x155a   : > { %v4202_v57 = vadd.f32 %v4172_v52, %v9461_v31 }
0x155b   : > { %v4174_v47 = vpop.permute.xlu0 %4173 }
0x155c   : > { %v4203_v7 = vadd.f32 %v4174_v47, %v9463_v37  ;;  %4219 = vrot.lane.b32.xlu2 %v4202_v57, %s10117_s20 }
0x155e   : > { %4221 = vrot.lane.b32.xlu1 %v4203_v7, %s10117_s20  ;;  %s6962_s20 = scalar_lea.hbm %s6961_s29, 4 }
0x155f   : > { %p6963_p12 = scmp.ne.s32.totalorder %s6961_s29, %s6962_s20 }
0x1561   : > { %p6964_p13 = pnand %p6963_p12, %p7137_p5 }
0x1563   : > { %p6965_p0 = pneg %p6964_p13 }
0x1580   : > { %v4238_v20 = vpop.permute.xlu2 %4237 }
0x1581   : > { %v4259_v23 = vadd.f32 %v4238_v20, %v4211_v19 }
0x1583   : > { %4285 = vrot.lane.b32.xlu0 %v4259_v23, %s10118_s27 }
0x1590   : > { %v4242_v33 = vpop.permute.xlu0 %4241 }
0x1591   : > { %v4261_v15 = vadd.f32 %v4242_v33, %v4213_v39 }
0x1593   : > { %4289 = vrot.lane.b32.xlu1 %v4261_v15, %s10118_s27 }
0x1598   : > { %v4244_v38 = vpop.permute.xlu2 %4243 }
0x1599   : > { %v4262_v24 = vadd.f32 %v4244_v38, %v4214_v53 }
0x159b   : > { %4291 = vrot.lane.b32.xlu0 %v4262_v24, %s10118_s27 }
0x15a0   : > { %v4240_v18 = vpop.permute.xlu1 %4239 }
0x15a1   : > { %v4260_v26 = vadd.f32 %v4240_v18, %v4212_v8 }
0x15a3   : > { %4287 = vrot.lane.b32.xlu2 %v4260_v26, %s10118_s27 }
0x15a6   : > { %v4232_v25 = vpop.permute.xlu2 %4231 }
0x15a7   : > { %v4256_v0 = vadd.f32 %v4232_v25, %v4208_v59 }
0x15a8   : > { %v4248_v9 = vpop.permute.xlu0 %4247 }
0x15a9   : > { %v4264_v48 = vadd.f32 %v4248_v9, %v4216_v12  ;;  %4279 = vrot.lane.b32.xlu0 %v4256_v0, %s10118_s27 }
0x15ab   : > { %4295 = vrot.lane.b32.xlu1 %v4264_v48, %s10118_s27 }
0x15ae   : > { %v4226_v2 = vpop.permute.xlu2 %4225 }
0x15af   : > { %v4253_v28 = vadd.f32 %v4226_v2, %v4205_v17 }
0x15b0   : > { %v4236_v30 = vpop.permute.xlu0 %4235 }
0x15b1   : > { %v4258_v29 = vadd.f32 %v4236_v30, %v4210_v54  ;;  %4273 = vrot.lane.b32.xlu0 %v4253_v28, %s10118_s27 }
0x15b3   : > { %4283 = vrot.lane.b32.xlu1 %v4258_v29, %s10118_s27 }
0x15b6   : > { %v4220_v55 = vpop.permute.xlu2 %4219 }
0x15b7   : > { %v4250_v11 = vadd.f32 %v4220_v55, %v4202_v57 }
0x15b8   : > { %v4246_v34 = vpop.permute.xlu1 %4245  ;;  %v4230_v14 = vpop.permute.xlu0 %4229 }
0x15b9   : > { %v4263_v41 = vadd.f32 %v4246_v34, %v4215_v61  ;;  %v4255_v44 = vadd.f32 %v4230_v14, %v4207_v58  ;;  %4267 = vrot.lane.b32.xlu0 %v4250_v11, %s10118_s27 }
0x15bb   : > { %4293 = vrot.lane.b32.xlu2 %v4263_v41, %s10118_s27  ;;  %4277 = vrot.lane.b32.xlu1 %v4255_v44, %s10118_s27 }
0x15c0   : > { %v4234_v63 = vpop.permute.xlu1 %4233  ;;  %v4224_v45 = vpop.permute.xlu0 %4223 }
0x15c1   : > { %v4257_v46 = vadd.f32 %v4234_v63, %v4209_v36  ;;  %v4252_v39 = vadd.f32 %v4224_v45, %v4204_v4 }
0x15c3   : > { %4281 = vrot.lane.b32.xlu2 %v4257_v46, %s10118_s27  ;;  %4271 = vrot.lane.b32.xlu1 %v4252_v39, %s10118_s27 }
0x15c8   : > { %v4228_v35 = vpop.permute.xlu1 %4227  ;;  %v4218_v19 = vpop.permute.xlu0 %4217 }
0x15c9   : > { %v4254_v51 = vadd.f32 %v4228_v35, %v4206_v62  ;;  %v4249_v8 = vadd.f32 %v4218_v19, %v4201_v56 }
0x15cb   : > { %4275 = vrot.lane.b32.xlu2 %v4254_v51, %s10118_s27  ;;  %4265 = vrot.lane.b32.xlu1 %v4249_v8, %s10118_s27 }
0x15d0   : > { %v4222_v10 = vpop.permute.xlu1 %4221 }
0x15d1   : > { %v4251_v12 = vadd.f32 %v4222_v10, %v4203_v7 }
0x15d3   : > { %4269 = vrot.lane.b32.xlu2 %v4251_v12, %s10118_s27 }
0x15f5   : > { %v4286_v13 = vpop.permute.xlu0 %4285 }
0x15f6   : > { %v9555_v50 = vadd.f32 %v4286_v13, %v4259_v23 }
0x15f8   : > { %4333 = vrot.lane.b32.xlu1 %v9555_v50, %s10119_s30 }
0x15fd   : > { %v4288_v53 = vpop.permute.xlu2 %4287 }
0x15fe   : > { %v4308_v54 = vadd.f32 %v4288_v53, %v4260_v26 }
0x1600   : > { %4335 = vrot.lane.b32.xlu0 %v4308_v54, %s10119_s30 }
0x1605   : > { %v4290_v21 = vpop.permute.xlu1 %4289 }
0x1606   : > { %v4309_v43 = vadd.f32 %v4290_v21, %v4261_v15 }
0x1608   : > { %4337 = vrot.lane.b32.xlu2 %v4309_v43, %s10119_s30 }
0x160d   : > { %v4292_v61 = vpop.permute.xlu0 %4291 }
0x160e   : > { %v4310_v58 = vadd.f32 %v4292_v61, %v4262_v24 }
0x1610   : > { %4339 = vrot.lane.b32.xlu1 %v4310_v58, %s10119_s30 }
0x1615   : > { %v4294_v3 = vpop.permute.xlu2 %4293 }
0x1616   : > { %v4311_v59 = vadd.f32 %v4294_v3, %v4263_v41  ;;  %v4361_v3 = vld [vmem:[%s10076_s11] sm:$0xff] }
0x1618   : > { %4341 = vrot.lane.b32.xlu0 %v4311_v59, %s10119_s30 }
0x161b   : > { %v4280_v27 = vpop.permute.xlu0 %4279 }
0x161c   : > { %v4304_v60 = vadd.f32 %v4280_v27, %v4256_v0  ;;  %v4363_v27 = vld [vmem:[%s10076_s11 + $0x10] sm:$0xff] }
0x161d   : > { %v4296_v36 = vpop.permute.xlu1 %4295  ;;  %v4282_v4 = vpop.permute.xlu2 %4281 }
0x161e   : > { %v4312_v22 = vadd.f32 %v4296_v36, %v4264_v48  ;;  %v4305_v17 = vadd.f32 %v4282_v4, %v4257_v46  ;;  %4327 = vrot.lane.b32.xlu1 %v4304_v60, %s10119_s30  ;;  %v4365_v36 = vld [vmem:[%s10076_s11 + $0x20] sm:$0xff]  ;;  %v4366_v4 = vld [vmem:[%s10076_s11 + $0x28] sm:$0xff] }
0x1620   : > { %4343 = vrot.lane.b32.xlu2 %v4312_v22, %s10119_s30  ;;  %4329 = vrot.lane.b32.xlu0 %v4305_v17, %s10119_s30 }
0x1623   : > { %v4274_v5 = vpop.permute.xlu0 %4273 }
0x1624   : > { %v4301_v6 = vadd.f32 %v4274_v5, %v4253_v28  ;;  %v4369_v5 = vld [vmem:[%s10076_s11 + $0x40] sm:$0xff] }
0x1625   : > { %v4284_v62 = vpop.permute.xlu1 %4283  ;;  %v4276_v56 = vpop.permute.xlu2 %4275 }
0x1626   : > { %v4306_v52 = vadd.f32 %v4284_v62, %v4258_v29  ;;  %v4302_v57 = vadd.f32 %v4276_v56, %v4254_v51  ;;  %4321 = vrot.lane.b32.xlu1 %v4301_v6, %s10119_s30  ;;  %v4371_v62 = vld [vmem:[%s10076_s11 + $0x50] sm:$0xff]  ;;  %v4372_v56 = vld [vmem:[%s10076_s11 + $0x58] sm:$0xff] }
0x1628   : > { %4331 = vrot.lane.b32.xlu2 %v4306_v52, %s10119_s30  ;;  %4323 = vrot.lane.b32.xlu0 %v4302_v57, %s10119_s30 }
0x162b   : > { %v4268_v47 = vpop.permute.xlu0 %4267 }
0x162c   : > { %v4298_v7 = vadd.f32 %v4268_v47, %v4250_v11  ;;  %v4375_v47 = vld [vmem:[%s10076_s11 + $0x70] sm:$0xff] }
0x162d   : > { %v4278_v20 = vpop.permute.xlu1 %4277  ;;  %v4270_v23 = vpop.permute.xlu2 %4269 }
0x162e   : > { %v4303_v33 = vadd.f32 %v4278_v20, %v4255_v44  ;;  %v4299_v15 = vadd.f32 %v4270_v23, %v4251_v12  ;;  %4315 = vrot.lane.b32.xlu1 %v4298_v7, %s10119_s30 }
0x1630   : > { %4325 = vrot.lane.b32.xlu2 %v4303_v33, %s10119_s30  ;;  %4317 = vrot.lane.b32.xlu0 %v4299_v15, %s10119_s30 }
0x1635   : > { %v4272_v38 = vpop.permute.xlu1 %4271 }
0x1636   : > { %v4300_v24 = vadd.f32 %v4272_v38, %v4252_v39 }
0x1638   : > { %4319 = vrot.lane.b32.xlu2 %v4300_v24, %s10119_s30 }
0x163d   : > { %v4266_v18 = vpop.permute.xlu1 %4265 }
0x163e   : > { %v4297_v26 = vadd.f32 %v4266_v18, %v4249_v8  ;;  %v6513_v18 = vld [vmem:[%s10067_s2 + $0x7e0] sm:$0xf] }
0x1640   : > { %4313 = vrot.lane.b32.xlu2 %v4297_v26, %s10119_s30  ;;  %s6966_s30 = scalar_lea.hbm %s10081_s16, 8 }
0x1641   : > { %p6968_p2 = scmp.lt.s32.totalorder %s6966_s30, %s6962_s20 }
0x1643   : > { %p6969_p3 = por %p6968_p2, %p6967_p1 }
0x1645   : > { %p6970_p4 = pnand %p6969_p3, %p6965_p0 }
0x1662   : > { %v4338_v25 = vpop.permute.xlu2 %4337 }
0x1663   : > { %v4357_v34 = vadd.f32 %v4338_v25, %v4309_v43  ;;  %v6783_v25 = vld [vmem:[%s10067_s2 + $0x7e4] sm:$0xf] }
0x166a   : > { %v4334_v48 = vpop.permute.xlu1 %4333 }
0x166b   : > { %v4355_v45 = vadd.f32 %v4334_v48, %v9555_v50  ;;  %v6521_v48 = vld [vmem:[%s10067_s2 + $0x7e8] sm:$0xf] }
0x1672   : > { %v4336_v2 = vpop.permute.xlu0 %4335 }
0x1673   : > { %v4356_v44 = vadd.f32 %v4336_v2, %v4308_v54  ;;  %v6786_v2 = vld [vmem:[%s10067_s2 + $0x7f4] sm:$0xf0] }
0x167a   : > { %v4344_v0 = vpop.permute.xlu2 %4343 }
0x167b   : > { %v4360_v9 = vadd.f32 %v4344_v0, %v4312_v22  ;;  %v4367_v22 = vld [vmem:[%s10076_s11 + $0x30] sm:$0xff] }
0x167d   : > { %4377 = vmatpush.msrb.mxu3 %v4360_v9  ;;  %v6515_v9 = vld [vmem:[%s10067_s2 + $0x7f0] sm:$0xf0] }
0x1682   : > { %v4332_v28 = vpop.permute.xlu2 %4331  ;;  %v4340_v30 = vpop.permute.xlu1 %4339 }
0x1683   : > { %v4358_v11 = vadd.f32 %v4340_v30, %v4310_v58  ;;  %v4354_v46 = vadd.f32 %v4332_v28, %v4306_v52  ;;  %v4373_v52 = vld [vmem:[%s10076_s11 + $0x60] sm:$0xff]  ;;  %v6518_v28 = vor.u32 %v6783_v25, %v6515_v9  ;;  %v6522_v30 = vor.u32 %v6786_v2, %v6521_v48  ;;  %v6435_v9 = vld [vmem:[%s10067_s2 + $0x750] sm:$0xf0]  ;;  %v6441_v48 = vld [vmem:[%s10067_s2 + $0x748] sm:$0xf] }
0x1684   : > { %v6763_v25 = vld [vmem:[%s10067_s2 + $0x744] sm:$0xf]  ;;  %v6766_v2 = vld [vmem:[%s10067_s2 + $0x754] sm:$0xf0] }
0x1685   : > { %4825 = vmatpush.bf16.msrb.mxu1 %v6518_v28  ;;  %4854 = vmatpush.bf16.msra.mxu2 %v6522_v30  ;;  %v6438_v30 = vor.u32 %v6763_v25, %v6435_v9 }
0x168a   : > { %v4342_v29 = vpop.permute.xlu0 %4341  ;;  %v4326_v14 = vpop.permute.xlu2 %4325 }
0x168b   : > { %v4359_v55 = vadd.f32 %v4342_v29, %v4311_v59  ;;  %v4351_v10 = vadd.f32 %v4326_v14, %v4303_v33  ;;  %v4362_v59 = vld [vmem:[%s10076_s11 + $0x8] sm:$0xff] }
0x168d   : > { %4378 = vmatpush.msrb.mxu3 %v4359_v55  ;;  %v6497_v55 = vld [vmem:[%s10067_s2 + $0x7c0] sm:$0xf] }
0x168f   : > { %4379 = vmatpush.msrb.mxu3 %v4358_v11  ;;  %v6781_v11 = vld [vmem:[%s10067_s2 + $0x7cc] sm:$0xf0] }
0x1690   : > { %v4328_v41 = vpop.permute.xlu1 %4327  ;;  %v6498_v14 = vor.u32 %v6781_v11, %v6497_v55  ;;  %v6442_v55 = vor.u32 %v6766_v2, %v6441_v48  ;;  %v6417_v11 = vld [vmem:[%s10067_s2 + $0x720] sm:$0xf] }
0x1691   : > { %4380 = vmatpush.msrb.mxu3 %v4357_v34  ;;  %v4352_v19 = vadd.f32 %v4328_v41, %v4304_v60  ;;  %v4364_v60 = vld [vmem:[%s10076_s11 + $0x18] sm:$0xff]  ;;  %v6779_v34 = vld [vmem:[%s10067_s2 + $0x7c4] sm:$0xf]  ;;  %v6499_v41 = vld [vmem:[%s10067_s2 + $0x7d0] sm:$0xf0] }
0x1692   : > { %v4330_v63 = vpop.permute.xlu0 %4329  ;;  %v4320_v51 = vpop.permute.xlu2 %4319 }
0x1693   : > { %4381 = vmatpush.msrb.mxu3 %v4356_v44  ;;  %v4353_v39 = vadd.f32 %v4330_v63, %v4305_v17  ;;  %v4348_v53 = vadd.f32 %v4320_v51, %v4300_v24  ;;  %v4368_v17 = vld [vmem:[%s10076_s11 + $0x38] sm:$0xff]  ;;  %v6505_v44 = vld [vmem:[%s10067_s2 + $0x7c8] sm:$0xf] }
0x1694   : > { %v6782_v63 = vld [vmem:[%s10067_s2 + $0x7d4] sm:$0xf0] }
0x1695   : > { %4382 = vmatpush.msrb.mxu3 %v4355_v45  ;;  %v6502_v45 = vor.u32 %v6779_v34, %v6499_v41  ;;  %v6761_v34 = vld [vmem:[%s10067_s2 + $0x72c] sm:$0xf0] }
0x1696   : > { %v6418_v41 = vor.u32 %v6761_v34, %v6417_v11 }
0x1697   : > { %4383 = vmatpush.msrb.mxu3 %v4354_v46  ;;  %v6506_v46 = vor.u32 %v6782_v63, %v6505_v44  ;;  %4826 = vmatpush.bf16.msrb.mxu1 %v6502_v45  ;;  %v6419_v44 = vld [vmem:[%s10067_s2 + $0x730] sm:$0xf0]  ;;  %v6425_v63 = vld [vmem:[%s10067_s2 + $0x728] sm:$0xf]  ;;  %v6762_v45 = vld [vmem:[%s10067_s2 + $0x734] sm:$0xf0] }
0x1698   : > { %v4322_v35 = vpop.permute.xlu1 %4321 }
0x1699   : > { %4384 = vmatpush.msrb.mxu3 %v4353_v39  ;;  %v4349_v13 = vadd.f32 %v4322_v35, %v4301_v6  ;;  %v4370_v6 = vld [vmem:[%s10076_s11 + $0x48] sm:$0xff]  ;;  %4855 = vmatpush.bf16.msra.mxu2 %v6506_v46  ;;  %v6481_v39 = vld [vmem:[%s10067_s2 + $0x7a0] sm:$0xf]  ;;  %v6777_v35 = vld [vmem:[%s10067_s2 + $0x7ac] sm:$0xf0] }
0x169a   : > { %v4324_v8 = vpop.permute.xlu0 %4323  ;;  %v4314_v43 = vpop.permute.xlu2 %4313  ;;  %v6482_v51 = vor.u32 %v6777_v35, %v6481_v39  ;;  %v6426_v35 = vor.u32 %v6762_v45, %v6425_v63 }
0x169b   : > { %4385 = vmatpush.msrb.mxu3 %v4352_v19  ;;  %v4350_v12 = vadd.f32 %v4324_v8, %v4302_v57  ;;  %v4345_v58 = vadd.f32 %v4314_v43, %v4297_v26  ;;  %v4374_v57 = vld [vmem:[%s10076_s11 + $0x68] sm:$0xff]  ;;  %v6785_v26 = vld [vmem:[%s10067_s2 + $0x7ec] sm:$0xf0]  ;;  %v6775_v19 = vld [vmem:[%s10067_s2 + $0x7a4] sm:$0xf] }
0x169c   : > { %v6514_v0 = vor.u32 %v6785_v26, %v6513_v18  ;;  %v6483_v8 = vld [vmem:[%s10067_s2 + $0x7b0] sm:$0xf0]  ;;  %v6433_v18 = vld [vmem:[%s10067_s2 + $0x740] sm:$0xf]  ;;  %v6765_v26 = vld [vmem:[%s10067_s2 + $0x74c] sm:$0xf0] }
0x169d   : > { %4386 = vmatpush.msrb.mxu3 %v4351_v10  ;;  %v6489_v10 = vld [vmem:[%s10067_s2 + $0x7a8] sm:$0xf] }
0x169e   : > { %4796 = vmatpush.bf16.msra.mxu0 %v6514_v0  ;;  %v6434_v0 = vor.u32 %v6765_v26, %v6433_v18 }
0x169f   : > { %4387 = vmatpush.msrb.mxu3 %v4350_v12  ;;  %v6486_v12 = vor.u32 %v6775_v19, %v6483_v8  ;;  %v6401_v8 = vld [vmem:[%s10067_s2 + $0x700] sm:$0xf] }
0x16a0   : > { %v4316_v54 = vpop.permute.xlu1 %4315 }
0x16a1   : > { %4388 = vmatpush.msrb.mxu3 %v4349_v13  ;;  %v4346_v61 = vadd.f32 %v4316_v54, %v4298_v7  ;;  %v4376_v7 = vld [vmem:[%s10076_s11 + $0x78] sm:$0xff]  ;;  %4827 = vmatpush.bf16.msrb.mxu1 %v6486_v12  ;;  %v6755_v12 = vld [vmem:[%s10067_s2 + $0x704] sm:$0xf] }
0x16a2   : > { %v4318_v50 = vpop.permute.xlu0 %4317  ;;  %4797 = vmatpush.bf16.msra.mxu0 %v6498_v14  ;;  %v6778_v13 = vld [vmem:[%s10067_s2 + $0x7b4] sm:$0xf0]  ;;  %v6759_v14 = vld [vmem:[%s10067_s2 + $0x724] sm:$0xf] }
0x16a3   : > { %v4347_v21 = vadd.f32 %v4318_v50, %v4299_v15  ;;  %4389 = vmatpush.msrb.mxu3 %v4348_v53  ;;  %v6490_v54 = vor.u32 %v6778_v13, %v6489_v10  ;;  %v6465_v50 = vld [vmem:[%s10067_s2 + $0x780] sm:$0xf]  ;;  %v6422_v39 = vor.u32 %v6759_v14, %v6419_v44  ;;  %v6757_v10 = vld [vmem:[%s10067_s2 + $0x70c] sm:$0xf0] }
0x16a4   : > { %v6402_v13 = vor.u32 %v6757_v10, %v6401_v8 }
0x16a5   : > { %4390 = vmatpush.msrb.mxu3 %v4347_v21  ;;  %v6773_v21 = vld [vmem:[%s10067_s2 + $0x78c] sm:$0xf0]  ;;  %4856 = vmatpush.bf16.msra.mxu2 %v6490_v54  ;;  %v6403_v54 = vld [vmem:[%s10067_s2 + $0x710] sm:$0xf0] }
0x16a6   : > { %4798 = vmatpush.bf16.msra.mxu0 %v6482_v51  ;;  %v6466_v43 = vor.u32 %v6773_v21, %v6465_v50  ;;  %v6409_v50 = vld [vmem:[%s10067_s2 + $0x708] sm:$0xf]  ;;  %v6758_v21 = vld [vmem:[%s10067_s2 + $0x714] sm:$0xf0] }
0x16a7   : > { %4391 = vmatpush.msrb.mxu3 %v4346_v61  ;;  %v6771_v61 = vld [vmem:[%s10067_s2 + $0x784] sm:$0xf] }
0x16a9   : > { %4392 = vmatpush.msrb.mxu3 %v4345_v58  ;;  %v6467_v58 = vld [vmem:[%s10067_s2 + $0x790] sm:$0xf0] }
0x16aa   : > { %4393 = vmatmul.f32.vlgmr.msrb.gmra.mxu3 %v4361_v3  ;;  %v6473_v3 = vld [vmem:[%s10067_s2 + $0x788] sm:$0xf]  ;;  %4799 = vmatpush.bf16.msra.mxu0 %v6466_v43 }
0x16b2   : > { %4396 = vmatmul.f32.gmra.mxu3 %v4362_v59  ;;  %v6470_v59 = vor.u32 %v6771_v61, %v6467_v58  ;;  %v6406_v58 = vor.u32 %v6755_v12, %v6403_v54 }
0x16b4   : > { %4828 = vmatpush.bf16.msrb.mxu1 %v6470_v59 }
0x16ba   : > { %4399 = vmatmul.f32.gmra.mxu3 %v4363_v27  ;;  %v6774_v27 = vld [vmem:[%s10067_s2 + $0x794] sm:$0xf0] }
0x16c2   : > { %4402 = vmatmul.f32.gmra.mxu3 %v4364_v60  ;;  %v6474_v60 = vor.u32 %v6774_v27, %v6473_v3  ;;  %v6410_v3 = vor.u32 %v6758_v21, %v6409_v50 }
0x16c4   : > { %4857 = vmatpush.bf16.msra.mxu2 %v6474_v60 }
0x16ca   : > { %4405 = vmatmul.f32.gmra.mxu3 %v4365_v36  ;;  %v6449_v36 = vld [vmem:[%s10067_s2 + $0x760] sm:$0xf] }
0x16d2   : > { %4408 = vmatmul.f32.gmra.mxu3 %v4366_v4  ;;  %v6769_v4 = vld [vmem:[%s10067_s2 + $0x76c] sm:$0xf0] }
0x16da   : > { %4411 = vmatmul.f32.gmra.mxu3 %v4367_v22  ;;  %v6767_v22 = vld [vmem:[%s10067_s2 + $0x764] sm:$0xf] }
0x16e2   : > { %4414 = vmatmul.f32.gmra.mxu3 %v4368_v17  ;;  %v6450_v17 = vor.u32 %v6769_v4, %v6449_v36 }
0x16e4   : > { %4800 = vmatpush.bf16.msra.mxu0 %v6450_v17 }
0x16e8   : > { %4801 = vmatpush.bf16.msra.mxu0 %v6434_v0 }
0x16ea   : > { %4417 = vmatmul.f32.gmra.mxu3 %v4369_v5  ;;  %v6451_v5 = vld [vmem:[%s10067_s2 + $0x770] sm:$0xf0] }
0x16ec   : > { %4802 = vmatpush.bf16.msra.mxu0 %v6418_v41 }
0x16f0   : > { %4803 = vmatpush.bf16.msra.mxu0 %v6402_v13 }
0x16f2   : > { %4420 = vmatmul.f32.gmra.mxu3 %v4370_v6  ;;  %v6457_v6 = vld [vmem:[%s10067_s2 + $0x768] sm:$0xf] }
0x16fa   : > { %4423 = vmatmul.f32.gmra.mxu3 %v4371_v62  ;;  %v6770_v62 = vld [vmem:[%s10067_s2 + $0x774] sm:$0xf0] }
0x1702   : > { %4426 = vmatmul.f32.gmra.mxu3 %v4372_v56 }
0x170a   : > { %4429 = vmatmul.f32.gmra.mxu3 %v4373_v52  ;;  %v6454_v52 = vor.u32 %v6767_v22, %v6451_v5 }
0x170c   : > { %4829 = vmatpush.bf16.msrb.mxu1 %v6454_v52 }
0x1710   : > { %4830 = vmatpush.bf16.msrb.mxu1 %v6438_v30  ;;  %v9802_v30 = vld [vmem:[%s10079_s14 + $0xb] ss:$0 sm:$0xff] }
0x1712   : > { %4432 = vmatmul.f32.gmra.mxu3 %v4374_v57  ;;  %v6458_v57 = vor.u32 %v6770_v62, %v6457_v6  ;;  %v9792_v6 = vld [vmem:[%s10079_s14 + $0xa] ss:$0 sm:$0xff] }
0x1714   : > { %4858 = vmatpush.bf16.msra.mxu2 %v6458_v57  ;;  %4831 = vmatpush.bf16.msrb.mxu1 %v6422_v39 }
0x1718   : > { %4859 = vmatpush.bf16.msra.mxu2 %v6442_v55  ;;  %4832 = vmatpush.bf16.msrb.mxu1 %v6406_v58 }
0x171a   : > { %4435 = vmatmul.f32.gmra.mxu3 %v4375_v47 }
0x171c   : > { %4860 = vmatpush.bf16.msra.mxu2 %v6426_v35 }
0x1720   : > { %4861 = vmatpush.bf16.msra.mxu2 %v6410_v3 }
0x1722   : > { %4438 = vmatmul.f32.gmra.mxu3 %v4376_v7 }
0x172d   : > { %v9623_v20 = vpop.f32.mrf.mxu3 }
0x172e   : > { %v4442_v56 = vmul.f32 %v9623_v20, %v9623_v20  ;;  %v4461_v0 = vsub.f32 %v9459_v16, %v9623_v20 }
0x1735   : > { %v9625_v23 = vpop.f32.mrf.mxu3 }
0x1736   : > { %v4443_v46 = vmul.f32 %v9625_v23, %v9625_v23  ;;  %v4462_v16 = vsub.f32 %v9461_v31, %v9625_v23 }
0x173d   : > { %v9627_v33 = vpop.f32.mrf.mxu3 }
0x173e   : > { %v4444_v60 = vmul.f32 %v9627_v33, %v9627_v33 }
0x1745   : > { %v9629_v15 = vpop.f32.mrf.mxu3 }
0x174d   : > { %v9631_v38 = vpop.f32.mrf.mxu3 }
0x174e   : > { %v4446_v20 = vmul.f32 %v9631_v38, %v9631_v38 }
0x1755   : > { %v9633_v24 = vpop.f32.mrf.mxu3 }
0x1756   : > { %v4447_v21 = vmul.f32 %v9633_v24, %v9633_v24 }
0x175d   : > { %v9653_v29 = vpop.f32.mrf.mxu3 }
0x1765   : > { %v9691_v53 = vpop.f32.mrf.mxu3 }
0x176d   : > { %v4418_v47 = vpop.f32.mrf.mxu3 }
0x176e   : > { %v4450_v7 = vsub.f32 %v4418_v47, %v4442_v56 }
0x1770   : > { %v4469_v28 = vadd.f32 1e-05, %v4450_v7  ;;  %v4445_v7 = vmul.f32 %v9629_v15, %v9629_v15 }
0x1772   : > { %6898 = vrsqrt.f32 %v4469_v28  ;;  %vm4483_vm2 = vweird.f32 %v4469_v28 }
0x1775   : > { %v4421_v19 = vpop.f32.mrf.mxu3 }
0x1776   : > { %v4451_v51 = vsub.f32 %v4421_v19, %v4443_v46 }
0x1778   : > { %v6899_v43 = vpop.eup %6898  ;;  %v4470_v61 = vadd.f32 1e-05, %v4451_v51 }
0x1779   : > { %v4478_v59 = vmul.f32 %v6899_v43, %v4469_v28  ;;  %vm4484_vm1 = vweird.f32 %v6899_v43 }
0x177a   : > { %6900 = vrsqrt.f32 %v4470_v61  ;;  %vm4485_vm3 = vmor %vm4483_vm2, %vm4484_vm1  ;;  %vm4493_vm8 = vweird.f32 %v4470_v61 }
0x177b   : > { %v4479_v27 = vmul.f32 %v6899_v43, %v4478_v59 }
0x177d   : > { %v4480_v36 = vmul.f32 0.5, %v4479_v27  ;;  %v4424_v4 = vpop.f32.mrf.mxu3  ;;  %v4463_v27 = vsub.f32 %v9463_v37, %v9627_v33  ;;  %v6784_v37 = vld [vmem:[%s10067_s2 + $0x7ec] sm:$0xf]  ;;  %v6523_v33 = vld [vmem:[%s10067_s2 + $0x7f8] sm:$0xf0] }
0x177e   : > { %v4452_v22 = vsub.f32 %v4424_v4, %v4444_v60 }
0x177f   : > { %v4481_v17 = vsub.f32 1.5, %v4480_v36 }
0x1780   : > { %v6901_v5 = vpop.eup %6900  ;;  %v4471_v62 = vadd.f32 1e-05, %v4452_v22 }
0x1781   : > { %v4482_v56 = vmul.f32 %v6899_v43, %v4481_v17  ;;  %v4488_v52 = vmul.f32 %v6901_v5, %v4470_v61  ;;  %vm4494_vm4 = vweird.f32 %v6901_v5 }
0x1782   : > { %6902 = vrsqrt.f32 %v4471_v62  ;;  %vm4495_vm5 = vmor %vm4493_vm8, %vm4494_vm4  ;;  %vm4503_vm7 = vweird.f32 %v4471_v62 }
0x1783   : > { %v4486_v57 = vsel %vm4485_vm3, %v6899_v43, %v4482_v56  ;;  %v4489_v47 = vmul.f32 %v6901_v5, %v4488_v52 }
0x1784   : > { %v4558_v18 = vmul.f32 %v9792_v6, %v4486_v57 }
0x1785   : > { %v4490_v26 = vmul.f32 0.5, %v4489_v47  ;;  %v4427_v25 = vpop.f32.mrf.mxu3  ;;  %v6526_v47 = vor.u32 %v6784_v37, %v6523_v33 }
0x1786   : > { %v4453_v9 = vsub.f32 %v4427_v25, %v4445_v7  ;;  %v4566_v28 = vmul.f32 %v4558_v18, %v4461_v0  ;;  %v4464_v7 = vsub.f32 %v9468_v32, %v9629_v15  ;;  %v4448_v18 = vmul.f32 %v9653_v29, %v9653_v29  ;;  %v6507_v32 = vld [vmem:[%s10067_s2 + $0x7d8] sm:$0xf0]  ;;  %v6776_v15 = vld [vmem:[%s10067_s2 + $0x7ac] sm:$0xf] }
0x1787   : > { %v4491_v48 = vsub.f32 1.5, %v4490_v26  ;;  %4883 = vmatpush.bf16.msrb.mxu0 %v6526_v47 }
0x1788   : > { %v6903_v2 = vpop.eup %6902  ;;  %v4472_v55 = vadd.f32 1e-05, %v4453_v9  ;;  %v4575_v44 = vadd.f32 %v9802_v30, %v4566_v28  ;;  %v6780_v28 = vld [vmem:[%s10067_s2 + $0x7cc] sm:$0xf] }
0x1789   : > { %v4492_v11 = vmul.f32 %v6901_v5, %v4491_v48  ;;  %v4498_v34 = vmul.f32 %v6903_v2, %v4471_v62  ;;  %vm4504_vm6 = vweird.f32 %v6903_v2 }
0x178a   : > { %6904 = vrsqrt.f32 %v4472_v55  ;;  %v4583_v8 = vmul.f32 0.2, %v4575_v44  ;;  %vm4505_vm9 = vmor %vm4503_vm7, %vm4504_vm6  ;;  %vm4513_vm11 = vweird.f32 %v4472_v55 }
0x178b   : > { %v4496_v14 = vsel %vm4495_vm5, %v6901_v5, %v4492_v11  ;;  %v4499_v41 = vmul.f32 %v6903_v2, %v4498_v34  ;;  %v6510_v11 = vor.u32 %v6780_v28, %v6507_v32  ;;  %v6491_v34 = vld [vmem:[%s10067_s2 + $0x7b8] sm:$0xf0]  ;;  %v6756_v28 = vld [vmem:[%s10067_s2 + $0x70c] sm:$0xf] }
0x178c   : > { %v4559_v63 = vmul.f32 %v9792_v6, %v4496_v14  ;;  %v4591_v61 = vmax.f32 %v4575_v44, %v4583_v8  ;;  %v4449_v8 = vmul.f32 %v9691_v53, %v9691_v53  ;;  %v6411_v32 = vld [vmem:[%s10067_s2 + $0x718] sm:$0xf0] }
0x178d   : > { %v4500_v45 = vmul.f32 0.5, %v4499_v41  ;;  %v4430_v46 = vpop.f32.mrf.mxu3  ;;  %4884 = vmatpush.bf16.msrb.mxu0 %v6510_v11 }
0x178e   : > { %v4567_v39 = vmul.f32 %v4559_v63, %v4462_v16  ;;  %v4454_v35 = vsub.f32 %v4430_v46, %v4446_v20 }
0x178f   : > { %v4501_v19 = vsub.f32 1.5, %v4500_v45  ;;  %v6494_v45 = vor.u32 %v6776_v15, %v6491_v34 }
0x1790   : > { %v6905_v51 = vpop.eup %6904  ;;  %v4576_v10 = vadd.f32 %v9802_v30, %v4567_v39  ;;  %v4473_v12 = vadd.f32 1e-05, %v4454_v35  ;;  %v6772_v39 = vld [vmem:[%s10067_s2 + $0x78c] sm:$0xf]  ;;  %v6475_v35 = vld [vmem:[%s10067_s2 + $0x798] sm:$0xf0] }
0x1791   : > { %v4502_v13 = vmul.f32 %v6903_v2, %v4501_v19  ;;  %v4508_v31 = vmul.f32 %v6905_v51, %v4472_v55  ;;  %vm4514_vm10 = vweird.f32 %v6905_v51  ;;  %4885 = vmatpush.bf16.msrb.mxu0 %v6494_v45 }
0x1792   : > { %v4584_v23 = vmul.f32 0.2, %v4576_v10  ;;  %6906 = vrsqrt.f32 %v4473_v12  ;;  %vm4515_vm12 = vmor %vm4513_vm11, %vm4514_vm10  ;;  %vm4523_vm14 = vweird.f32 %v4473_v12 }
0x1793   : > { %v4506_v54 = vsel %vm4505_vm9, %v6903_v2, %v4502_v13  ;;  %v4509_v50 = vmul.f32 %v6905_v51, %v4508_v31 }
0x1794   : > { %v4560_v43 = vmul.f32 %v9792_v6, %v4506_v54  ;;  %v4592_v58 = vmax.f32 %v4576_v10, %v4584_v23  ;;  %v6478_v54 = vor.u32 %v6772_v39, %v6475_v35  ;;  %v4468_v35 = vsub.f32 %v9488_v42, %v9691_v53 }
0x1795   : > { %v4510_v3 = vmul.f32 0.5, %v4509_v50  ;;  %v4433_v59 = vpop.f32.mrf.mxu3  ;;  %v4465_v50 = vsub.f32 %v9473_v1, %v9631_v38  ;;  %v6768_v1 = vld [vmem:[%s10067_s2 + $0x76c] sm:$0xf]  ;;  %v6459_v38 = vld [vmem:[%s10067_s2 + $0x778] sm:$0xf0] }
0x1796   : > { %v4455_v60 = vsub.f32 %v4433_v59, %v4447_v21  ;;  %v9816_v36 = vpack.c.bf16 %v4592_v58, %v4591_v61  ;;  %v4568_v17 = vmul.f32 %v4560_v43, %v4463_v27  ;;  %4886 = vmatpush.bf16.msrb.mxu0 %v6478_v54 }
0x1797   : > { %v4511_v4 = vsub.f32 1.5, %v4510_v3 }
0x1798   : > { %v6907_v22 = vpop.eup %6906  ;;  %v9818_v5 = vadd.f32 1e-05, %v4455_v60  ;;  %4804 = vmatmul.bf16.vlgmr.msra.gmra.mxu0 %v9816_v36  ;;  %4833 = vmatmul.bf16.vlgmr.msrb.gmra.mxu1 %v9816_v36  ;;  %v4577_v25 = vadd.f32 %v9802_v30, %v4568_v17  ;;  %v6443_v17 = vld [vmem:[%s10067_s2 + $0x758] sm:$0xf0] }
0x1799   : > { %v4512_v62 = vmul.f32 %v6905_v51, %v4511_v4  ;;  %v4518_v56 = vmul.f32 %v6907_v22, %v4473_v12  ;;  %4862 = vmatmul.bf16.vlgmr.msra.gmra.mxu2 %v9816_v36  ;;  %vm4524_vm13 = vweird.f32 %v6907_v22  ;;  %v6462_v4 = vor.u32 %v6768_v1, %v6459_v38 }
0x179a   : > { %6908 = vrsqrt.f32 %v9818_v5  ;;  %v4585_v20 = vmul.f32 0.2, %v4577_v25  ;;  %vm4525_vm15 = vmor %vm4523_vm14, %vm4524_vm13  ;;  %vm4533_vm1 = vweird.f32 %v9818_v5 }
0x179b   : > { %v4516_v52 = vsel %vm4515_vm12, %v6905_v51, %v4512_v62  ;;  %v4519_v57 = vmul.f32 %v6907_v22, %v4518_v56  ;;  %v4466_v56 = vsub.f32 %v9478_v40, %v9633_v24  ;;  %4887 = vmatpush.bf16.msrb.mxu0 %v6462_v4 }
0x179c   : > { %v4561_v26 = vmul.f32 %v9792_v6, %v4516_v52  ;;  %v4593_v12 = vmax.f32 %v4577_v25, %v4585_v20  ;;  %v4467_v20 = vsub.f32 %v9483_v49, %v9653_v29 }
0x179d   : > { %v4520_v0 = vmul.f32 0.5, %v4519_v57  ;;  %v4436_v9 = vpop.f32.mrf.mxu3 }
0x179e   : > { %v4569_v48 = vmul.f32 %v4561_v26, %v4464_v7  ;;  %v4456_v2 = vsub.f32 %v4436_v9, %v4448_v18  ;;  %v6760_v7 = vld [vmem:[%s10067_s2 + $0x72c] sm:$0xf]  ;;  %v6427_v18 = vld [vmem:[%s10067_s2 + $0x738] sm:$0xf0] }
0x179f   : > { %v4521_v55 = vsub.f32 1.5, %v4520_v0 }
0x17a0   : > { %v6909_v14 = vpop.eup %6908  ;;  %v9848_v41 = vadd.f32 1e-05, %v4456_v2  ;;  %v4578_v16 = vadd.f32 %v9802_v30, %v4569_v48  ;;  %v6430_v48 = vor.u32 %v6760_v7, %v6427_v18  ;;  %v4912_v18 = vld [vmem:[%s10075_s10] sm:$0xff] }
0x17a1   : > { %v4522_v44 = vmul.f32 %v6907_v22, %v4521_v55  ;;  %v4528_v63 = vmul.f32 %v6909_v14, %v9818_v5  ;;  %vm4534_vm0 = vweird.f32 %v6909_v14 }
0x17a2   : > { %6910 = vrsqrt.f32 %v9848_v41  ;;  %v4586_v46 = vmul.f32 0.2, %v4578_v16  ;;  %vm4535_vm2 = vmor %vm4533_vm1, %vm4534_vm0  ;;  %vm4543_vm4 = vweird.f32 %v9848_v41 }
0x17a3   : > { %v4526_v19 = vsel %vm4525_vm15, %v6907_v22, %v4522_v44  ;;  %v4529_v51 = vmul.f32 %v6909_v14, %v4528_v63  ;;  %v6764_v22 = vld [vmem:[%s10067_s2 + $0x74c] sm:$0xf] }
0x17a4   : > { %v4562_v10 = vmul.f32 %v9792_v6, %v4526_v19  ;;  %v4594_v13 = vmax.f32 %v4578_v16, %v4586_v46  ;;  %v6446_v57 = vor.u32 %v6764_v22, %v6443_v17  ;;  %v6414_v16 = vor.u32 %v6756_v28, %v6411_v32  ;;  %v4922_v28 = vld [vmem:[%s10075_s10 + $0x50] sm:$0xff]  ;;  %v4917_v32 = vld [vmem:[%s10075_s10 + $0x28] sm:$0xff] }
0x17a5   : > { %v4530_v31 = vmul.f32 0.5, %v4529_v51  ;;  %v4439_v23 = vpop.f32.mrf.mxu3 }
0x17a6   : > { %v4457_v21 = vsub.f32 %v4439_v23, %v4449_v8  ;;  %v9864_v43 = vpack.c.bf16 %v4594_v13, %v4593_v12  ;;  %v4570_v3 = vmul.f32 %v4562_v10, %v4465_v50  ;;  %4888 = vmatpush.bf16.msrb.mxu0 %v6446_v57 }
0x17a7   : > { %v4531_v61 = vsub.f32 1.5, %v4530_v31 }
0x17a8   : > { %v6911_v58 = vpop.eup %6910  ;;  %v4476_v59 = vadd.f32 1e-05, %v4457_v21  ;;  %4809 = vmatmul.bf16.gmra.mxu0 %v9864_v43  ;;  %4838 = vmatmul.bf16.gmra.mxu1 %v9864_v43  ;;  %v4579_v33 = vadd.f32 %v9802_v30, %v4570_v3 }
0x17a9   : > { %v4532_v27 = vmul.f32 %v6909_v14, %v4531_v61  ;;  %v4538_v60 = vmul.f32 %v6911_v58, %v9848_v41  ;;  %4867 = vmatmul.bf16.gmra.mxu2 %v9864_v43  ;;  %vm4544_vm3 = vweird.f32 %v6911_v58 }
0x17aa   : > { %6912 = vrsqrt.f32 %v4476_v59  ;;  %v4587_v24 = vmul.f32 0.2, %v4579_v33  ;;  %vm4545_vm8 = vmor %vm4543_vm4, %vm4544_vm3  ;;  %4889 = vmatpush.bf16.msrb.mxu0 %v6430_v48  ;;  %vm4553_vm6 = vweird.f32 %v4476_v59  ;;  %v4920_v48 = vld [vmem:[%s10075_s10 + $0x40] sm:$0xff] }
0x17ab   : > { %v4536_v5 = vsel %vm4535_vm2, %v6909_v14, %v4532_v27  ;;  %v4539_v62 = vmul.f32 %v6911_v58, %v4538_v60 }
0x17ac   : > { %v4563_v37 = vmul.f32 %v9792_v6, %v4536_v5  ;;  %v4595_v34 = vmax.f32 %v4579_v33, %v4587_v24  ;;  %v4916_v24 = vld [vmem:[%s10075_s10 + $0x20] sm:$0xff] }
0x17ad   : > { %v4540_v52 = vmul.f32 0.5, %v4539_v62 }
0x17ae   : > { %v4571_v47 = vmul.f32 %v4563_v37, %v4466_v56  ;;  %4890 = vmatpush.bf16.msrb.mxu0 %v6414_v16  ;;  %v4930_v16 = vld [vmem:[%s10075_s10 + $0x90] sm:$0xff] }
0x17af   : > { %v4541_v26 = vsub.f32 1.5, %v4540_v52 }
0x17b0   : > { %v6913_v25 = vpop.eup %6912  ;;  %v4580_v40 = vadd.f32 %v9802_v30, %v4571_v47 }
0x17b1   : > { %v4542_v0 = vmul.f32 %v6911_v58, %v4541_v26  ;;  %v4548_v9 = vmul.f32 %v6913_v25, %v4476_v59  ;;  %vm4554_vm5 = vweird.f32 %v6913_v25 }
0x17b2   : > { %v4588_v2 = vmul.f32 0.2, %v4580_v40  ;;  %vm4555_vm7 = vmor %vm4553_vm6, %vm4554_vm5 }
0x17b3   : > { %v4546_v15 = vsel %vm4545_vm8, %v6911_v58, %v4542_v0  ;;  %v4549_v55 = vmul.f32 %v6913_v25, %v4548_v9  ;;  %v4918_v0 = vld [vmem:[%s10075_s10 + $0x30] sm:$0xff]  ;;  %v4913_v9 = vld [vmem:[%s10075_s10 + $0x8] sm:$0xff] }
0x17b4   : > { %v4564_v11 = vmul.f32 %v9792_v6, %v4546_v15  ;;  %v4596_v14 = vmax.f32 %v4580_v40, %v4588_v2  ;;  %v4915_v2 = vld [vmem:[%s10075_s10 + $0x18] sm:$0xff]  ;;  %v4924_v15 = vld [vmem:[%s10075_s10 + $0x60] sm:$0xff] }
0x17b5   : > { %v4550_v41 = vmul.f32 0.5, %v4549_v55  ;;  %v4919_v55 = vld [vmem:[%s10075_s10 + $0x38] sm:$0xff] }
0x17b6   : > { %v4601_v44 = vpack.c.bf16 %v4596_v14, %v4595_v34  ;;  %v4572_v45 = vmul.f32 %v4564_v11, %v4467_v20  ;;  %v4926_v11 = vld [vmem:[%s10075_s10 + $0x70] sm:$0xff]  ;;  %v4921_v34 = vld [vmem:[%s10075_s10 + $0x48] sm:$0xff]  ;;  %v4928_v14 = vld [vmem:[%s10075_s10 + $0x80] sm:$0xff] }
0x17b7   : > { %v4551_v63 = vsub.f32 1.5, %v4550_v41  ;;  %v4923_v41 = vld [vmem:[%s10075_s10 + $0x58] sm:$0xff]  ;;  %v4925_v20 = vld [vmem:[%s10075_s10 + $0x68] sm:$0xff] }
0x17b8   : > { %4814 = vmatmul.bf16.gmra.mxu0 %v4601_v44  ;;  %4843 = vmatmul.bf16.gmra.mxu1 %v4601_v44  ;;  %v4581_v51 = vadd.f32 %v9802_v30, %v4572_v45  ;;  %v4934_v45 = vld [vmem:[%s10075_s10 + $0xb0] sm:$0xff] }
0x17b9   : > { %v4552_v46 = vmul.f32 %v6913_v25, %v4551_v63  ;;  %4872 = vmatmul.bf16.gmra.mxu2 %v4601_v44  ;;  %v4927_v63 = vld [vmem:[%s10075_s10 + $0x78] sm:$0xff] }
0x17ba   : > { %v4589_v8 = vmul.f32 0.2, %v4581_v51 }
0x17bb   : > { %v4556_v39 = vsel %vm4555_vm7, %v6913_v25, %v4552_v46  ;;  %v4914_v25 = vld [vmem:[%s10075_s10 + $0x10] sm:$0xff]  ;;  %v4929_v46 = vld [vmem:[%s10075_s10 + $0x88] sm:$0xff] }
0x17bc   : > { %v4565_v19 = vmul.f32 %v9792_v6, %v4556_v39  ;;  %v4597_v12 = vmax.f32 %v4581_v51, %v4589_v8  ;;  %v4936_v39 = vld [vmem:[%s10075_s10 + $0xc0] sm:$0xff]  ;;  %v4933_v51 = vld [vmem:[%s10075_s10 + $0xa8] sm:$0xff]  ;;  %v4942_v8 = vld [vmem:[%s10075_s10 + $0xf0] sm:$0xff] }
0x17be   : > { %v4573_v49 = vmul.f32 %v4565_v19, %v4468_v35  ;;  %v4931_v35 = vld [vmem:[%s10075_s10 + $0x98] sm:$0xff]  ;;  %v4938_v19 = vld [vmem:[%s10075_s10 + $0xd0] sm:$0xff] }
0x17c0   : > { %v4582_v29 = vadd.f32 %v9802_v30, %v4573_v49  ;;  %v4940_v49 = vld [vmem:[%s10075_s10 + $0xe0] sm:$0xff] }
0x17c2   : > { %v4590_v10 = vmul.f32 0.2, %v4582_v29 }
0x17c4   : > { %v4598_v13 = vmax.f32 %v4582_v29, %v4590_v10  ;;  %v4935_v29 = vld [vmem:[%s10075_s10 + $0xb8] sm:$0xff]  ;;  %v4937_v10 = vld [vmem:[%s10075_s10 + $0xc8] sm:$0xff] }
0x17c6   : > { %v4602_v31 = vpack.c.bf16 %v4598_v13, %v4597_v12  ;;  %v4939_v13 = vld [vmem:[%s10075_s10 + $0xd8] sm:$0xff] }
0x17c8   : > { %4819 = vmatmul.bf16.gmra.mxu0 %v4602_v31  ;;  %4848 = vmatmul.bf16.gmra.mxu1 %v4602_v31 }
0x17c9   : > { %4877 = vmatmul.bf16.gmra.mxu2 %v4602_v31 }
0x17d8   : > { %4891 = vmatmul.bf16.vlgmr.msrb.gmra.mxu0 %v9816_v36 }
0x17e8   : > { %4896 = vmatmul.bf16.gmra.mxu0 %v9864_v43 }
0x17f8   : > { %4901 = vmatmul.bf16.gmra.mxu0 %v4601_v44  ;;  %v4932_v44 = vld [vmem:[%s10075_s10 + $0xa0] sm:$0xff] }
0x1808   : > { %4906 = vmatmul.bf16.gmra.mxu0 %v4602_v31  ;;  %v4941_v31 = vld [vmem:[%s10075_s10 + $0xe8] sm:$0xff] }
0x1815   : > { %v4805_v42 = vpop.f32.mrf.mxu0  ;;  %v4834_v53 = vpop.f32.mrf.mxu1 }
0x181c   : > { %v4863_v38 = vpop.f32.mrf.mxu2 }
0x181d   : > { %v4807_v6 = vpop.f32.mrf.mxu0  ;;  %v4836_v23 = vpop.f32.mrf.mxu1 }
0x1824   : > { %v4865_v22 = vpop.f32.mrf.mxu2 }
0x1825   : > { %v4810_v54 = vpop.f32.mrf.mxu0  ;;  %v4839_v30 = vpop.f32.mrf.mxu1 }
0x182c   : > { %v4868_v5 = vpop.f32.mrf.mxu2 }
0x182d   : > { %v4812_v50 = vpop.f32.mrf.mxu0  ;;  %v4841_v21 = vpop.f32.mrf.mxu1 }
0x1834   : > { %v4870_v56 = vpop.f32.mrf.mxu2 }
0x1835   : > { %v4815_v61 = vpop.f32.mrf.mxu0  ;;  %v4844_v58 = vpop.f32.mrf.mxu1 }
0x183c   : > { %v4873_v52 = vpop.f32.mrf.mxu2 }
0x183d   : > { %v4817_v3 = vpop.f32.mrf.mxu0  ;;  %v4846_v59 = vpop.f32.mrf.mxu1 }
0x1844   : > { %v4875_v47 = vpop.f32.mrf.mxu2 }
0x1845   : > { %v4820_v27 = vpop.f32.mrf.mxu0  ;;  %v4849_v60 = vpop.f32.mrf.mxu1 }
0x184c   : > { %v4878_v26 = vpop.f32.mrf.mxu2 }
0x184d   : > { %v4822_v1 = vpop.f32.mrf.mxu0  ;;  %v4851_v36 = vpop.f32.mrf.mxu1 }
0x184e   : > { %4944 = vmatpush.msra.mxu1 %v4851_v36 }
0x1850   : > { %4945 = vmatpush.msra.mxu1 %v4849_v60 }
0x1852   : > { %4946 = vmatpush.msra.mxu1 %v4846_v59 }
0x1854   : > { %4947 = vmatpush.msra.mxu1 %v4844_v58  ;;  %v4880_v40 = vpop.f32.mrf.mxu2 }
0x1855   : > { %v4892_v43 = vpop.f32.mrf.mxu0 }
0x1856   : > { %4948 = vmatpush.msra.mxu1 %v4841_v21 }
0x1858   : > { %4949 = vmatpush.msra.mxu1 %v4839_v30 }
0x185a   : > { %4950 = vmatpush.msra.mxu1 %v4836_v23 }
0x185c   : > { %4951 = vmatpush.msra.mxu1 %v4834_v53  ;;  %v4943_v53 = vld [vmem:[%s10075_s10 + $0xf8] sm:$0xff] }
0x185d   : > { %v4894_v4 = vpop.f32.mrf.mxu0 }
0x185e   : > { %4952 = vmatpush.msra.mxu1 %v4822_v1 }
0x1860   : > { %4953 = vmatpush.msra.mxu1 %v4820_v27 }
0x1862   : > { %4954 = vmatpush.msra.mxu1 %v4817_v3 }
0x1864   : > { %4955 = vmatpush.msra.mxu1 %v4815_v61 }
0x1865   : > { %v4897_v17 = vpop.f32.mrf.mxu0 }
0x1866   : > { %4956 = vmatpush.msra.mxu1 %v4812_v50 }
0x1868   : > { %4957 = vmatpush.msra.mxu1 %v4810_v54 }
0x186a   : > { %4958 = vmatpush.msra.mxu1 %v4807_v6 }
0x186c   : > { %4959 = vmatpush.msra.mxu1 %v4805_v42 }
0x186d   : > { %v4899_v62 = vpop.f32.mrf.mxu0  ;;  %4960 = vmatmul.f32.vlgmr.msra.gmra.mxu1 %v4912_v18 }
0x1875   : > { %v4902_v37 = vpop.f32.mrf.mxu0  ;;  %4963 = vmatmul.f32.gmra.mxu1 %v4914_v25 }
0x187d   : > { %v4904_v33 = vpop.f32.mrf.mxu0  ;;  %4966 = vmatmul.f32.gmra.mxu1 %v4916_v24 }
0x1885   : > { %v4907_v57 = vpop.f32.mrf.mxu0  ;;  %4969 = vmatmul.f32.gmra.mxu1 %v4918_v0 }
0x188d   : > { %v4909_v7 = vpop.f32.mrf.mxu0  ;;  %4972 = vmatmul.f32.gmra.mxu1 %v4920_v48 }
0x188e   : > { %5009 = vmatpush.msrb.mxu2 %v4909_v7 }
0x1890   : > { %5010 = vmatpush.msrb.mxu2 %v4907_v57 }
0x1892   : > { %5011 = vmatpush.msrb.mxu2 %v4904_v33 }
0x1894   : > { %5012 = vmatpush.msrb.mxu2 %v4902_v37 }
0x1895   : > { %4975 = vmatmul.f32.gmra.mxu1 %v4922_v28 }
0x1896   : > { %5013 = vmatpush.msrb.mxu2 %v4899_v62 }
0x1898   : > { %5014 = vmatpush.msrb.mxu2 %v4897_v17 }
0x189a   : > { %5015 = vmatpush.msrb.mxu2 %v4894_v4 }
0x189c   : > { %5016 = vmatpush.msrb.mxu2 %v4892_v43 }
0x189d   : > { %4978 = vmatmul.f32.gmra.mxu1 %v4924_v15 }
0x189e   : > { %5017 = vmatpush.msrb.mxu2 %v4880_v40 }
0x18a0   : > { %5018 = vmatpush.msrb.mxu2 %v4878_v26 }
0x18a2   : > { %5019 = vmatpush.msrb.mxu2 %v4875_v47 }
0x18a4   : > { %5020 = vmatpush.msrb.mxu2 %v4873_v52 }
0x18a5   : > { %4981 = vmatmul.f32.gmra.mxu1 %v4926_v11 }
0x18a6   : > { %5021 = vmatpush.msrb.mxu2 %v4870_v56 }
0x18a8   : > { %5022 = vmatpush.msrb.mxu2 %v4868_v5 }
0x18aa   : > { %5023 = vmatpush.msrb.mxu2 %v4865_v22 }
0x18ac   : > { %5024 = vmatpush.msrb.mxu2 %v4863_v38 }
0x18ad   : > { %5025 = vmatmul.f32.vlgmr.msrb.gmra.mxu2 %v4913_v9  ;;  %4984 = vmatmul.f32.gmra.mxu1 %v4928_v14 }
0x18b5   : > { %5028 = vmatmul.f32.gmra.mxu2 %v4915_v2  ;;  %4987 = vmatmul.f32.gmra.mxu1 %v4930_v16 }
0x18bd   : > { %5031 = vmatmul.f32.gmra.mxu2 %v4917_v32  ;;  %4990 = vmatmul.f32.gmra.mxu1 %v4932_v44 }
0x18c5   : > { %5034 = vmatmul.f32.gmra.mxu2 %v4919_v55  ;;  %4993 = vmatmul.f32.gmra.mxu1 %v4934_v45 }
0x18cd   : > { %5037 = vmatmul.f32.gmra.mxu2 %v4921_v34  ;;  %4996 = vmatmul.f32.gmra.mxu1 %v4936_v39 }
0x18d5   : > { %5040 = vmatmul.f32.gmra.mxu2 %v4923_v41  ;;  %4999 = vmatmul.f32.gmra.mxu1 %v4938_v19 }
0x18dd   : > { %5043 = vmatmul.f32.gmra.mxu2 %v4925_v20  ;;  %5002 = vmatmul.f32.gmra.mxu1 %v4940_v49 }
0x18e5   : > { %5046 = vmatmul.f32.gmra.mxu2 %v4927_v63  ;;  %5005 = vmatmul.f32.gmra.mxu1 %v4942_v8 }
0x18ea   : > { %v4961_v12 = vpop.f32.mrf.mxu1 }
0x18ed   : > { %5049 = vmatmul.f32.gmra.mxu2 %v4929_v46 }
0x18f2   : > { %v4964_v42 = vpop.f32.mrf.mxu1 }
0x18f5   : > { %5052 = vmatmul.f32.gmra.mxu2 %v4931_v35 }
0x18fa   : > { %v4967_v6 = vpop.f32.mrf.mxu1 }
0x18fd   : > { %5055 = vmatmul.f32.gmra.mxu2 %v4933_v51 }
0x1902   : > { %v4970_v23 = vpop.f32.mrf.mxu1 }
0x1905   : > { %5058 = vmatmul.f32.gmra.mxu2 %v4935_v29 }
0x190d   : > { %5061 = vmatmul.f32.gmra.mxu2 %v4937_v10 }
0x1915   : > { %5064 = vmatmul.f32.gmra.mxu2 %v4939_v13 }
0x191d   : > { %5067 = vmatmul.f32.gmra.mxu2 %v4941_v31 }
0x1925   : > { %5070 = vmatmul.f32.gmra.mxu2 %v4943_v53 }
0x1930   : > { %v5026_v54 = vpop.f32.mrf.mxu2 }
0x1931   : > { %v5027_v30 = vadd.f32 %v5026_v54, %v4961_v12 }
0x1933   : > { %6914 = vtanh.f32 %v5027_v30 }
0x1934   : > { %6973 = shalt.err (!%p6970_p4)
}
0x1935   : > { %6803 = dma.vmem_to_hbm [thread:$0]  (%p7137_p5), %s5129_s18, 64, %s5131_s21, %s5112_s24   ;;  %v4973_v21 = vpop.f32.mrf.mxu1 }
0x1936   : > { %s10124_s19 = sshll.u32 %s10135_s28, 3 }
0x1937   : > { %s10030_s17 = scalar_lea.vmem %s10080_s15, %s10124_s19 }
0x1938   : > { %v5029_v50 = vpop.f32.mrf.mxu2 }
0x1939   : > { %v6915_v61 = vpop.eup %6914  ;;  %v5030_v58 = vadd.f32 %v5029_v50, %v4964_v42 }
0x193a   : > { %5090 = vst [vmem:[%s10030_s17] sm:$0xff] %v6915_v61 }
0x193b   : > { %6916 = vtanh.f32 %v5030_v58 }
0x193d   : > { %v4976_v60 = vpop.f32.mrf.mxu1 }
0x1940   : > { %v5032_v3 = vpop.f32.mrf.mxu2 }
0x1941   : > { %v6917_v59 = vpop.eup %6916  ;;  %v5033_v27 = vadd.f32 %v5032_v3, %v4967_v6 }
0x1942   : > { %5091 = vst [vmem:[%s10030_s17 + $0x8] sm:$0xff] %v6917_v59 }
0x1943   : > { %6918 = vtanh.f32 %v5033_v27 }
0x1945   : > { %v4979_v38 = vpop.f32.mrf.mxu1 }
0x1948   : > { %v5035_v1 = vpop.f32.mrf.mxu2 }
0x1949   : > { %v6919_v36 = vpop.eup %6918  ;;  %v5036_v43 = vadd.f32 %v5035_v1, %v4970_v23 }
0x194a   : > { %5092 = vst [vmem:[%s10030_s17 + $0x10] sm:$0xff] %v6919_v36 }
0x194b   : > { %6920 = vtanh.f32 %v5036_v43 }
0x194d   : > { %v4982_v5 = vpop.f32.mrf.mxu1 }
0x1950   : > { %v5038_v4 = vpop.f32.mrf.mxu2 }
0x1951   : > { %v6921_v22 = vpop.eup %6920  ;;  %v5039_v17 = vadd.f32 %v5038_v4, %v4973_v21 }
0x1952   : > { %5093 = vst [vmem:[%s10030_s17 + $0x18] sm:$0xff] %v6921_v22 }
0x1953   : > { %6922 = vtanh.f32 %v5039_v17 }
0x1955   : > { %v4985_v52 = vpop.f32.mrf.mxu1 }
0x1958   : > { %v5041_v62 = vpop.f32.mrf.mxu2 }
0x1959   : > { %v6923_v56 = vpop.eup %6922  ;;  %v5042_v37 = vadd.f32 %v5041_v62, %v4976_v60 }
0x195a   : > { %5094 = vst [vmem:[%s10030_s17 + $0x20] sm:$0xff] %v6923_v56 }
0x195b   : > { %6924 = vtanh.f32 %v5042_v37 }
0x195d   : > { %v4988_v25 = vpop.f32.mrf.mxu1 }
0x1960   : > { %v5044_v33 = vpop.f32.mrf.mxu2 }
0x1961   : > { %v6925_v57 = vpop.eup %6924  ;;  %v5045_v47 = vadd.f32 %v5044_v33, %v4979_v38 }
0x1962   : > { %5095 = vst [vmem:[%s10030_s17 + $0x28] sm:$0xff] %v6925_v57 }
0x1963   : > { %6926 = vtanh.f32 %v5045_v47 }
0x1965   : > { %v4991_v9 = vpop.f32.mrf.mxu1 }
0x1968   : > { %v5047_v7 = vpop.f32.mrf.mxu2 }
0x1969   : > { %v6927_v18 = vpop.eup %6926  ;;  %v5048_v26 = vadd.f32 %v5047_v7, %v4982_v5 }
0x196a   : > { %5096 = vst [vmem:[%s10030_s17 + $0x30] sm:$0xff] %v6927_v18 }
0x196b   : > { %6928 = vtanh.f32 %v5048_v26 }
0x196d   : > { %v4994_v32 = vpop.f32.mrf.mxu1 }
0x1970   : > { %v5050_v40 = vpop.f32.mrf.mxu2 }
0x1971   : > { %v6929_v24 = vpop.eup %6928  ;;  %v5051_v0 = vadd.f32 %v5050_v40, %v4985_v52 }
0x1972   : > { %5097 = vst [vmem:[%s10030_s17 + $0x38] sm:$0xff] %v6929_v24 }
0x1973   : > { %6930 = vtanh.f32 %v5051_v0 }
0x1975   : > { %v4997_v14 = vpop.f32.mrf.mxu1 }
0x1978   : > { %v5053_v48 = vpop.f32.mrf.mxu2 }
0x1979   : > { %v6931_v2 = vpop.eup %6930  ;;  %v5054_v28 = vadd.f32 %v5053_v48, %v4988_v25 }
0x197a   : > { %5098 = vst [vmem:[%s10030_s17 + $0x40] sm:$0xff] %v6931_v2 }
0x197b   : > { %6932 = vtanh.f32 %v5054_v28 }
0x197d   : > { %v5000_v45 = vpop.f32.mrf.mxu1 }
0x1980   : > { %v5056_v15 = vpop.f32.mrf.mxu2 }
0x1981   : > { %v6933_v55 = vpop.eup %6932  ;;  %v5057_v11 = vadd.f32 %v5056_v15, %v4991_v9 }
0x1982   : > { %5099 = vst [vmem:[%s10030_s17 + $0x48] sm:$0xff] %v6933_v55 }
0x1983   : > { %6934 = vtanh.f32 %v5057_v11 }
0x1985   : > { %v5003_v19 = vpop.f32.mrf.mxu1 }
0x1988   : > { %v5059_v34 = vpop.f32.mrf.mxu2 }
0x1989   : > { %v6935_v41 = vpop.eup %6934  ;;  %v5060_v16 = vadd.f32 %v5059_v34, %v4994_v32 }
0x198a   : > { %5100 = vst [vmem:[%s10030_s17 + $0x50] sm:$0xff] %v6935_v41 }
0x198b   : > { %6936 = vtanh.f32 %v5060_v16 }
0x198d   : > { %v5006_v8 = vpop.f32.mrf.mxu1 }
0x1990   : > { %v5062_v20 = vpop.f32.mrf.mxu2 }
0x1991   : > { %v6937_v44 = vpop.eup %6936  ;;  %v5063_v63 = vadd.f32 %v5062_v20, %v4997_v14 }
0x1992   : > { %5101 = vst [vmem:[%s10030_s17 + $0x58] sm:$0xff] %v6937_v44 }
0x1993   : > { %6938 = vtanh.f32 %v5063_v63 }
0x1998   : > { %v5065_v46 = vpop.f32.mrf.mxu2 }
0x1999   : > { %v6939_v39 = vpop.eup %6938  ;;  %v5066_v35 = vadd.f32 %v5065_v46, %v5000_v45 }
0x199a   : > { %5102 = vst [vmem:[%s10030_s17 + $0x60] sm:$0xff] %v6939_v39 }
0x199b   : > { %6940 = vtanh.f32 %v5066_v35 }
0x19a0   : > { %v5068_v51 = vpop.f32.mrf.mxu2 }
0x19a1   : > { %v6941_v49 = vpop.eup %6940  ;;  %v5069_v29 = vadd.f32 %v5068_v51, %v5003_v19 }
0x19a2   : > { %5103 = vst [vmem:[%s10030_s17 + $0x68] sm:$0xff] %v6941_v49 }
0x19a3   : > { %6942 = vtanh.f32 %v5069_v29 }
0x19a8   : > { %v5071_v10 = vpop.f32.mrf.mxu2 }
0x19a9   : > { %v6943_v12 = vpop.eup %6942  ;;  %v5072_v13 = vadd.f32 %v5071_v10, %v5006_v8 }
0x19aa   : > { %5104 = vst [vmem:[%s10030_s17 + $0x70] sm:$0xff] %v6943_v12 }
0x19ab   : > { %6944 = vtanh.f32 %v5072_v13 }
0x19b1   : > { %v6945_v31 = vpop.eup %6944 }
0x19b2   : > { %5105 = vst [vmem:[%s10030_s17 + $0x78] sm:$0xff] %v6945_v31 }
0x19b3 PF: > { %s10125_s0 = sld [smem:[#allocation7_spill]] }
0x19b4   : > { %s10126_s28 = sld [smem:[#allocation5_spill]] }
0x19b9   : > { %p6809_p5 = scmp.ge.s32.totalorder %s10125_s0, 2 }
0x19ba   : > { %s5150_s18 = sand.u32 1, %s10126_s28  }
0x19bb   : > { %p6806_p7 = pnand %p6809_p5, %p7141_p6  ;;  %s5151_s21 = scalar_lea.sflag [#allocation3], %s5150_s18 }
0x19bd   : > { %p6807_p8 = pneg %p6806_p7 }
0x19bf   : > { %6991 = dma.done.wait (%p6807_p8), %s5151_s21, 64  }
0x19c0   : > { %6993 = vsyncadd (%p6807_p8), %s5151_s21, 4294967232  ;;  %s10128_s24 = sld [smem:[#allocation8_spill]]  ;;  %s10131_s21 = smov %s7000_s22 }
0x19c1   : > { %s10129_s23 = sld [smem:[#allocation6_spill]] }
0x19c2   : > { %s10130_s29 = sld [smem:[#allocation9_spill]] }
0x19c6   : > { %p27_p9 = scmp.ge.s32.totalorder %s10128_s24, 4  }
0x19c7   : > { %s10132_s22 = smov %s10129_s23 }
0x19c8   : > { %s10133_s23 = smov %s10130_s29  ;;  %29 = sbr.rel (!%p27_p9) target bundleno = 9 (0x9), region = 142 }
0x19cd   :  { %5157 = vsyncpa [#allocation3], 1 }
0x19ce   :  { %5159 = vsyncpa [#allocation3 + $0x1], 1 }

</bundles_post_ra>
